<compile_context>
chip_gen: v7x
topology: tpu7x:2x2x1
jax: 0.10.0
libtpu: 0.0.40
codegen_flags: <defaults>
</compile_context>

<pallas_src>
import functools
import math

import jax
import jax.numpy as jnp
from jax import lax
from jax.experimental import pallas as pl
from jax.experimental.pallas import tpu as pltpu

_EPS = 1e-5
# Safe on every generation (<= v7x's 64 MiB physical; raises v5e's 16 MiB default).
_VMEM_LIMIT = 32 * 1024 * 1024


# --------------------------------- kernels ---------------------------------
def _stage1_kernel(x_ref, w_ref, b_ref, h_ref, s_ref, q_ref):
    """conv1 (3->64) as three VPU broadcast-FMAs + per-tile BN partial stats."""
    x = x_ref[...]                                       # (T, 3)  f32
    w = w_ref[...]                                       # (3, C)  f32
    h = (x[:, 0:1] * w[0:1, :]
         + x[:, 1:2] * w[1:2, :]
         + x[:, 2:3] * w[2:3, :]
         + b_ref[...])                                   # (T, C)  f32
    h_ref[...] = h.astype(h_ref.dtype)
    s_ref[...] = jnp.sum(h, axis=0, keepdims=True)[None]        # (1, 1, C)
    q_ref[...] = jnp.sum(h * h, axis=0, keepdims=True)[None]    # (1, 1, C)


def _mm_stage_kernel(h_ref, sc_ref, sh_ref, w_ref, b_ref,
                     o_ref, s_ref, q_ref, *, matmul_dtype):
    """Folded-BN affine + ReLU + matmul (+bias) + per-tile BN partial stats."""
    h = h_ref[...].astype(jnp.float32)
    h = jnp.maximum(h * sc_ref[...] + sh_ref[...], 0.0)          # (T, Cin) f32
    o = jnp.dot(h.astype(matmul_dtype), w_ref[...],
                preferred_element_type=jnp.float32) + b_ref[...]  # (T, Cout) f32
    o_ref[...] = o.astype(o_ref.dtype)
    s_ref[...] = jnp.sum(o, axis=0, keepdims=True)[None]
    q_ref[...] = jnp.sum(o * o, axis=0, keepdims=True)[None]


def _max_stage_kernel(h_ref, sc_ref, sh_ref, o_ref):
    """Folded-BN affine + ReLU + running max over the point tiles of one batch."""
    t = pl.program_id(1)
    h = h_ref[...].astype(jnp.float32)
    h = jnp.maximum(h * sc_ref[...] + sh_ref[...], 0.0)          # (T, 1024)
    m = jnp.max(h, axis=0, keepdims=True)[None]                  # (1, 1, 1024)

    @pl.when(t == 0)
    def _init():
        o_ref[...] = m

    @pl.when(t > 0)
    def _update():
        o_ref[...] = jnp.maximum(o_ref[...], m)


# ----------------------------- pallas_call glue -----------------------------
def _compiler_params(sems):
    return pltpu.CompilerParams(dimension_semantics=sems,
                                vmem_limit_bytes=_VMEM_LIMIT)


def _run_stage1(x, w, b, tile, n_tiles, act_dtype):
    rows, c_out = x.shape[0], w.shape[1]
    return pl.pallas_call(
        _stage1_kernel,
        grid=(n_tiles,),
        in_specs=[
            pl.BlockSpec((tile, 3), lambda i: (i, 0)),
            pl.BlockSpec((3, c_out), lambda i: (0, 0)),      # VMEM-resident
            pl.BlockSpec((1, c_out), lambda i: (0, 0)),
        ],
        out_specs=(
            pl.BlockSpec((tile, c_out), lambda i: (i, 0)),
            pl.BlockSpec((1, 1, c_out), lambda i: (i, 0, 0)),
            pl.BlockSpec((1, 1, c_out), lambda i: (i, 0, 0)),
        ),
        out_shape=(
            jax.ShapeDtypeStruct((rows, c_out), act_dtype),
            jax.ShapeDtypeStruct((n_tiles, 1, c_out), jnp.float32),
            jax.ShapeDtypeStruct((n_tiles, 1, c_out), jnp.float32),
        ),
        compiler_params=_compiler_params(("parallel",)),
    )(x, w, b)


def _run_mm_stage(h, scale, shift, w, b, tile, n_tiles, matmul_dtype, act_dtype):
    rows, c_in = h.shape
    c_out = w.shape[1]
    kern = functools.partial(_mm_stage_kernel, matmul_dtype=matmul_dtype)
    return pl.pallas_call(
        kern,
        grid=(n_tiles,),
        in_specs=[
            pl.BlockSpec((tile, c_in), lambda i: (i, 0)),
            pl.BlockSpec((1, c_in), lambda i: (0, 0)),
            pl.BlockSpec((1, c_in), lambda i: (0, 0)),
            pl.BlockSpec((c_in, c_out), lambda i: (0, 0)),   # VMEM-resident
            pl.BlockSpec((1, c_out), lambda i: (0, 0)),
        ],
        out_specs=(
            pl.BlockSpec((tile, c_out), lambda i: (i, 0)),
            pl.BlockSpec((1, 1, c_out), lambda i: (i, 0, 0)),
            pl.BlockSpec((1, 1, c_out), lambda i: (i, 0, 0)),
        ),
        out_shape=(
            jax.ShapeDtypeStruct((rows, c_out), act_dtype),
            jax.ShapeDtypeStruct((n_tiles, 1, c_out), jnp.float32),
            jax.ShapeDtypeStruct((n_tiles, 1, c_out), jnp.float32),
        ),
        compiler_params=_compiler_params(("parallel",)),
    )(h, scale, shift, w, b)


def _run_max_stage(h, scale, shift, tile, batch, tiles_per_batch):
    c = h.shape[1]
    out = pl.pallas_call(
        _max_stage_kernel,
        grid=(batch, tiles_per_batch),
        in_specs=[
            pl.BlockSpec((tile, c),
                         lambda bi, ti: (bi * tiles_per_batch + ti, 0)),
            pl.BlockSpec((1, c), lambda bi, ti: (0, 0)),
            pl.BlockSpec((1, c), lambda bi, ti: (0, 0)),
        ],
        out_specs=pl.BlockSpec((1, 1, c), lambda bi, ti: (bi, 0, 0)),
        out_shape=jax.ShapeDtypeStruct((batch, 1, c), jnp.float32),
        compiler_params=_compiler_params(("parallel", "arbitrary")),
    )(h, scale, shift)
    return out.reshape(batch, c)


# ------------------------------- host helpers --------------------------------
def _fold_bn(sum_p, sumsq_p, gamma, beta, count):
    """Per-tile partial (sum, sumsq) -> per-channel affine == training-mode BN."""
    mean = jnp.sum(sum_p, axis=0) / count                 # (1, C), f32
    ex2 = jnp.sum(sumsq_p, axis=0) / count                # (1, C)
    var = jnp.maximum(ex2 - mean * mean, 0.0)             # biased variance
    scale = gamma * lax.rsqrt(var + _EPS)
    shift = beta - mean * scale
    return scale, shift


def _pick_tile(n_points, target):
    """Largest multiple-of-8 divisor of n_points that is <= target."""
    best, cand, limit = 8, 8, min(target, n_points)
    while cand <= limit:
        if n_points % cand == 0:
            best = cand
        cand += 8
    return best


def t_net_forward(x, params, *, tile_rows=128, matmul_dtype=jnp.float32):
    """T_Net forward.  x: (B, 3, N) point cloud -> (B, 1024) global feature.

    tile_rows: row-tile target (128 is safe everywhere; ~256 is fine on v6e's
    128 MiB VMEM, keep ~128 on v5e / v7x).
    """
    (w1, b1, g1, be1, w2, b2, g2, be2, w3, b3, g3, be3) = params
    B, C, N = x.shape
    assert C == 3, f"expected 3 input channels, got {C}"
    assert N % 8 == 0, "number of points must be a multiple of 8"

    rows = B * N
    tile = _pick_tile(N, tile_rows)      # tile | N  => tiles never cross a batch
    n_tiles = rows // tile
    tiles_per_batch = N // tile
    act_dtype = matmul_dtype             # inter-stage activation storage dtype

    # (B, 3, N) -> per-point rows (B*N, 3), channels-last.
    x_rows = jnp.transpose(x.astype(jnp.float32), (0, 2, 1)).reshape(rows, 3)

    # Cast the big weights once in the wrapper: halves their DMA bytes and
    # VMEM residency in bf16 mode.
    w2c = w2.astype(matmul_dtype)
    w3c = w3.astype(matmul_dtype)

    # stage 1: conv1(3->64) + partial BN1 stats
    h1, s1, q1 = _run_stage1(x_rows, w1, b1, tile, n_tiles, act_dtype)
    sc1, sh1 = _fold_bn(s1, q1, g1, be1, rows)
    # stage 2: bn1+relu -> conv2(64->128) + partial BN2 stats
    h2, s2, q2 = _run_mm_stage(h1, sc1, sh1, w2c, b2, tile, n_tiles,
                               matmul_dtype, act_dtype)
    sc2, sh2 = _fold_bn(s2, q2, g2, be2, rows)
    # stage 3: bn2+relu -> conv3(128->1024) + partial BN3 stats
    h3, s3, q3 = _run_mm_stage(h2, sc2, sh2, w3c, b3, tile, n_tiles,
                               matmul_dtype, act_dtype)
    sc3, sh3 = _fold_bn(s3, q3, g3, be3, rows)
    # stage 4: bn3+relu -> per-batch max over points
    return _run_max_stage(h3, sc3, sh3, tile, B, tiles_per_batch)


# --------------------------- parameter construction --------------------------
def make_params(key):
    ks = iter(jax.random.split(key, 12))

    def lin(fan_in, fan_out):
        bound = 1.0 / math.sqrt(fan_in)
        w = jax.random.uniform(next(ks), (fan_in, fan_out), jnp.float32, -bound, bound)
        b = jax.random.uniform(next(ks), (1, fan_out), jnp.float32, -bound, bound)
        return w, b

    def norm(c):
        g = jax.random.uniform(next(ks), (1, c), jnp.float32, 0.8, 1.2)
        b = jax.random.uniform(next(ks), (1, c), jnp.float32, -0.1, 0.1)
        return g, b

    w1, b1 = lin(3, 64);     g1, be1 = norm(64)       # Conv1d(3,64,1)   + BN(64)
    w2, b2 = lin(64, 128);   g2, be2 = norm(128)      # Conv1d(64,128,1) + BN(128)
    w3, b3 = lin(128, 1024); g3, be3 = norm(1024)     # Conv1d(128,1024,1)+BN(1024)
    return [w1, b1, g1, be1, w2, b2, g2, be2, w3, b3, g3, be3]


# ------------------------------ pure-JAX reference ---------------------------
def _bn_train_ref(h, gamma, beta):
    mean = jnp.mean(h, axis=0, keepdims=True)
    var = jnp.mean(jnp.square(h - mean), axis=0, keepdims=True)
    return (h - mean) * lax.rsqrt(var + _EPS) * gamma + beta


def t_net_reference(x, params):
    (w1, b1, g1, be1, w2, b2, g2, be2, w3, b3, g3, be3) = params
    B, _, N = x.shape
    h = jnp.transpose(x.astype(jnp.float32), (0, 2, 1)).reshape(B * N, 3)
    h = jnp.maximum(_bn_train_ref(h @ w1 + b1, g1, be1), 0.0)
    h = jnp.maximum(_bn_train_ref(h @ w2 + b2, g2, be2), 0.0)
    h = jnp.maximum(_bn_train_ref(h @ w3 + b3, g3, be3), 0.0)
    return jnp.max(h.reshape(B, N, 1024), axis=1)


# ------------------------------------ main -----------------------------------
if __name__ == "__main__":
    B, N = 2, 256
    key = jax.random.PRNGKey(0)
    k_x, k_p = jax.random.split(key)

    x = jax.random.normal(k_x, (B, 3, N), jnp.float32)    # (B, C=3, N) like Conv1d
    params = make_params(k_p)

    ref = jax.block_until_ready(t_net_reference(x, params))

    # f32 path: checked tightly against the PyTorch-faithful reference.
    fwd_f32 = jax.jit(functools.partial(t_net_forward, matmul_dtype=jnp.float32))
    out = jax.block_until_ready(fwd_f32(x, params))
    assert out.shape == (B, 1024), out.shape
    assert jnp.allclose(out, ref, rtol=2e-3, atol=2e-3), (
        float(jnp.max(jnp.abs(out - ref))))

    # bf16 MXU path (v6e / v7x fast path): loose check against f32 reference.
    fwd_bf16 = jax.jit(functools.partial(t_net_forward, matmul_dtype=jnp.bfloat16))
    out_bf16 = jax.block_until_ready(fwd_bf16(x, params))
    assert out_bf16.shape == (B, 1024), out_bf16.shape
    assert jnp.allclose(out_bf16, ref, rtol=5e-2, atol=5e-2), (
        float(jnp.max(jnp.abs(out_bf16 - ref))))

    print("KERNEL_OK")
</pallas_src>

<mosaic_0001>
module attributes {stable_mosaic.version = 11 : i64} {
  func.func @_stage1_kernel(%arg0: i32, %arg1: memref<128x3xf32, #tpu.memory_space<vmem>>, %arg2: memref<3x64xf32, #tpu.memory_space<vmem>>, %arg3: memref<1x64xf32, #tpu.memory_space<vmem>>, %arg4: memref<128x64xf32, #tpu.memory_space<vmem>>, %arg5: memref<1x1x64xf32, #tpu.memory_space<vmem>>, %arg6: memref<1x1x64xf32, #tpu.memory_space<vmem>>) attributes {dimension_semantics = [#tpu.dimension_semantics<parallel>], iteration_bounds = array<i64: 4>, scalar_prefetch = 0 : i64, scratch_operands = 0 : i64, tpu.core_type = #tpu.core_type<tc>, window_params = [{transform_indices = @transform_0, window_bounds = array<i64: 128, 3>}, {pipeline_mode = #tpu.pipeline_mode<synchronous>, transform_indices = @transform_1, window_bounds = array<i64: 3, 64>}, {pipeline_mode = #tpu.pipeline_mode<synchronous>, transform_indices = @transform_2, window_bounds = array<i64: 1, 64>}, {transform_indices = @transform_3, window_bounds = array<i64: 128, 64>}, {transform_indices = @transform_4, window_bounds = array<i64: 1, 1, 64>}, {transform_indices = @transform_5, window_bounds = array<i64: 1, 1, 64>}]} {
    %c0 = arith.constant 0 : index
    %c0_0 = arith.constant 0 : index
    %0 = vector.load %arg1[%c0, %c0_0] : memref<128x3xf32, #tpu.memory_space<vmem>>, vector<128x3xf32>
    %c0_1 = arith.constant 0 : index
    %c0_2 = arith.constant 0 : index
    %1 = vector.load %arg2[%c0_1, %c0_2] : memref<3x64xf32, #tpu.memory_space<vmem>>, vector<3x64xf32>
    %2 = vector.extract_strided_slice %0 {offsets = [0, 0], sizes = [128, 1], strides = [1, 1]} : vector<128x3xf32> to vector<128x1xf32>
    %3 = vector.extract_strided_slice %1 {offsets = [0, 0], sizes = [1, 64], strides = [1, 1]} : vector<3x64xf32> to vector<1x64xf32>
    %4 = vector.broadcast %2 : vector<128x1xf32> to vector<128x64xf32>
    %5 = vector.broadcast %3 : vector<1x64xf32> to vector<128x64xf32>
    %6 = arith.mulf %4, %5 : vector<128x64xf32>
    %7 = vector.extract_strided_slice %0 {offsets = [0, 1], sizes = [128, 1], strides = [1, 1]} : vector<128x3xf32> to vector<128x1xf32>
    %8 = vector.extract_strided_slice %1 {offsets = [1, 0], sizes = [1, 64], strides = [1, 1]} : vector<3x64xf32> to vector<1x64xf32>
    %9 = vector.broadcast %7 : vector<128x1xf32> to vector<128x64xf32>
    %10 = vector.broadcast %8 : vector<1x64xf32> to vector<128x64xf32>
    %11 = arith.mulf %9, %10 : vector<128x64xf32>
    %12 = arith.addf %6, %11 : vector<128x64xf32>
    %13 = vector.extract_strided_slice %0 {offsets = [0, 2], sizes = [128, 1], strides = [1, 1]} : vector<128x3xf32> to vector<128x1xf32>
    %14 = vector.extract_strided_slice %1 {offsets = [2, 0], sizes = [1, 64], strides = [1, 1]} : vector<3x64xf32> to vector<1x64xf32>
    %15 = vector.broadcast %13 : vector<128x1xf32> to vector<128x64xf32>
    %16 = vector.broadcast %14 : vector<1x64xf32> to vector<128x64xf32>
    %17 = arith.mulf %15, %16 : vector<128x64xf32>
    %18 = arith.addf %12, %17 : vector<128x64xf32>
    %c0_3 = arith.constant 0 : index
    %c0_4 = arith.constant 0 : index
    %19 = vector.load %arg3[%c0_3, %c0_4] : memref<1x64xf32, #tpu.memory_space<vmem>>, vector<1x64xf32>
    %20 = vector.broadcast %19 : vector<1x64xf32> to vector<128x64xf32>
    %21 = arith.addf %18, %20 : vector<128x64xf32>
    %c0_5 = arith.constant 0 : index
    %c0_6 = arith.constant 0 : index
    %22 = vector.load %arg4[%c0_5, %c0_6] : memref<128x64xf32, #tpu.memory_space<vmem>>, vector<128x64xf32>
    tpu.vector_store %arg4[%c0_5, %c0_6], %21 {strides = array<i32>} : memref<128x64xf32, #tpu.memory_space<vmem>>, vector<128x64xf32>,
    %cst = arith.constant dense<0.000000e+00> : vector<64xf32>
    %23 = vector.multi_reduction <add>, %21, %cst [0] : vector<128x64xf32> to vector<64xf32>
    %24 = vector.shape_cast %23 : vector<64xf32> to vector<1x64xf32>
    %25 = vector.shape_cast %24 : vector<1x64xf32> to vector<1x1x64xf32>
    %c0_7 = arith.constant 0 : index
    %c0_8 = arith.constant 0 : index
    %c0_9 = arith.constant 0 : index
    %26 = vector.load %arg5[%c0_7, %c0_8, %c0_9] : memref<1x1x64xf32, #tpu.memory_space<vmem>>, vector<1x1x64xf32>
    tpu.vector_store %arg5[%c0_7, %c0_8, %c0_9], %25 {strides = array<i32>} : memref<1x1x64xf32, #tpu.memory_space<vmem>>, vector<1x1x64xf32>,
    %27 = arith.mulf %21, %21 : vector<128x64xf32>
    %cst_10 = arith.constant dense<0.000000e+00> : vector<64xf32>
    %28 = vector.multi_reduction <add>, %27, %cst_10 [0] : vector<128x64xf32> to vector<64xf32>
    %29 = vector.shape_cast %28 : vector<64xf32> to vector<1x64xf32>
    %30 = vector.shape_cast %29 : vector<1x64xf32> to vector<1x1x64xf32>
    %c0_11 = arith.constant 0 : index
    %c0_12 = arith.constant 0 : index
    %c0_13 = arith.constant 0 : index
    %31 = vector.load %arg6[%c0_11, %c0_12, %c0_13] : memref<1x1x64xf32, #tpu.memory_space<vmem>>, vector<1x1x64xf32>
    tpu.vector_store %arg6[%c0_11, %c0_12, %c0_13], %30 {strides = array<i32>} : memref<1x1x64xf32, #tpu.memory_space<vmem>>, vector<1x1x64xf32>,
    return
  }
  func.func @transform_0(%arg0: i32) -> (i32, i32) {
    %c0_i32 = arith.constant 0 : i32
    %c0_i32_0 = arith.constant 0 : i32
    return %arg0, %c0_i32 : i32, i32
  }
  func.func @transform_1(%arg0: i32) -> (i32, i32) {
    %c0_i32 = arith.constant 0 : i32
    %c0_i32_0 = arith.constant 0 : i32
    %c0_i32_1 = arith.constant 0 : i32
    return %c0_i32, %c0_i32_0 : i32, i32
  }
  func.func @transform_2(%arg0: i32) -> (i32, i32) {
    %c0_i32 = arith.constant 0 : i32
    %c0_i32_0 = arith.constant 0 : i32
    %c0_i32_1 = arith.constant 0 : i32
    return %c0_i32, %c0_i32_0 : i32, i32
  }
  func.func @transform_3(%arg0: i32) -> (i32, i32) {
    %c0_i32 = arith.constant 0 : i32
    %c0_i32_0 = arith.constant 0 : i32
    return %arg0, %c0_i32 : i32, i32
  }
  func.func @transform_4(%arg0: i32) -> (i32, i32, i32) {
    %c0_i32 = arith.constant 0 : i32
    %c0_i32_0 = arith.constant 0 : i32
    %c0_i32_1 = arith.constant 0 : i32
    return %arg0, %c0_i32, %c0_i32_0 : i32, i32, i32
  }
  func.func @transform_5(%arg0: i32) -> (i32, i32, i32) {
    %c0_i32 = arith.constant 0 : i32
    %c0_i32_0 = arith.constant 0 : i32
    %c0_i32_1 = arith.constant 0 : i32
    return %arg0, %c0_i32, %c0_i32_0 : i32, i32, i32
  }
}

module attributes {stable_mosaic.version = 11 : i64} {
  func.func @_mm_stage_kernel(%arg0: i32, %arg1: memref<128x128xf32, #tpu.memory_space<vmem>>, %arg2: memref<1x128xf32, #tpu.memory_space<vmem>>, %arg3: memref<1x128xf32, #tpu.memory_space<vmem>>, %arg4: memref<128x1024xf32, #tpu.memory_space<vmem>>, %arg5: memref<1x1024xf32, #tpu.memory_space<vmem>>, %arg6: memref<128x1024xf32, #tpu.memory_space<vmem>>, %arg7: memref<1x1x1024xf32, #tpu.memory_space<vmem>>, %arg8: memref<1x1x1024xf32, #tpu.memory_space<vmem>>) attributes {dimension_semantics = [#tpu.dimension_semantics<parallel>], iteration_bounds = array<i64: 4>, scalar_prefetch = 0 : i64, scratch_operands = 0 : i64, tpu.core_type = #tpu.core_type<tc>, window_params = [{transform_indices = @transform_0, window_bounds = array<i64: 128, 128>}, {pipeline_mode = #tpu.pipeline_mode<synchronous>, transform_indices = @transform_1, window_bounds = array<i64: 1, 128>}, {pipeline_mode = #tpu.pipeline_mode<synchronous>, transform_indices = @transform_2, window_bounds = array<i64: 1, 128>}, {pipeline_mode = #tpu.pipeline_mode<synchronous>, transform_indices = @transform_3, window_bounds = array<i64: 128, 1024>}, {pipeline_mode = #tpu.pipeline_mode<synchronous>, transform_indices = @transform_4, window_bounds = array<i64: 1, 1024>}, {transform_indices = @transform_5, window_bounds = array<i64: 128, 1024>}, {transform_indices = @transform_6, window_bounds = array<i64: 1, 1, 1024>}, {transform_indices = @transform_7, window_bounds = array<i64: 1, 1, 1024>}]} {
    %c0 = arith.constant 0 : index
    %c0_0 = arith.constant 0 : index
    %0 = vector.load %arg1[%c0, %c0_0] : memref<128x128xf32, #tpu.memory_space<vmem>>, vector<128x128xf32>
    %c0_1 = arith.constant 0 : index
    %c0_2 = arith.constant 0 : index
    %1 = vector.load %arg2[%c0_1, %c0_2] : memref<1x128xf32, #tpu.memory_space<vmem>>, vector<1x128xf32>
    %2 = vector.broadcast %1 : vector<1x128xf32> to vector<128x128xf32>
    %3 = arith.mulf %0, %2 : vector<128x128xf32>
    %c0_3 = arith.constant 0 : index
    %c0_4 = arith.constant 0 : index
    %4 = vector.load %arg3[%c0_3, %c0_4] : memref<1x128xf32, #tpu.memory_space<vmem>>, vector<1x128xf32>
    %5 = vector.broadcast %4 : vector<1x128xf32> to vector<128x128xf32>
    %6 = arith.addf %3, %5 : vector<128x128xf32>
    %cst = arith.constant 0.000000e+00 : f32
    %7 = vector.broadcast %cst : f32 to vector<128x128xf32>
    %8 = arith.maximumf %6, %7 : vector<128x128xf32>
    %c0_5 = arith.constant 0 : index
    %c0_6 = arith.constant 0 : index
    %9 = vector.load %arg4[%c0_5, %c0_6] : memref<128x1024xf32, #tpu.memory_space<vmem>>, vector<128x1024xf32>
    %cst_7 = arith.constant dense<0.000000e+00> : vector<128x1024xf32>
    %10 = tpu.matmul %8, %9, %cst_7 {dimension_numbers = #tpu.dot_dimension_numbers<[1], [0], [0], [1], [0, 0, 1, 1], [], []>} : vector<128x128xf32>, vector<128x1024xf32>, vector<128x1024xf32> -> vector<128x1024xf32>
    %c0_8 = arith.constant 0 : index
    %c0_9 = arith.constant 0 : index
    %11 = vector.load %arg5[%c0_8, %c0_9] : memref<1x1024xf32, #tpu.memory_space<vmem>>, vector<1x1024xf32>
    %12 = vector.broadcast %11 : vector<1x1024xf32> to vector<128x1024xf32>
    %13 = arith.addf %10, %12 : vector<128x1024xf32>
    %c0_10 = arith.constant 0 : index
    %c0_11 = arith.constant 0 : index
    %14 = vector.load %arg6[%c0_10, %c0_11] : memref<128x1024xf32, #tpu.memory_space<vmem>>, vector<128x1024xf32>
    tpu.vector_store %arg6[%c0_10, %c0_11], %13 {strides = array<i32>} : memref<128x1024xf32, #tpu.memory_space<vmem>>, vector<128x1024xf32>,
    %cst_12 = arith.constant dense<0.000000e+00> : vector<1024xf32>
    %15 = vector.multi_reduction <add>, %13, %cst_12 [0] : vector<128x1024xf32> to vector<1024xf32>
    %16 = vector.shape_cast %15 : vector<1024xf32> to vector<1x1024xf32>
    %17 = vector.shape_cast %16 : vector<1x1024xf32> to vector<1x1x1024xf32>
    %c0_13 = arith.constant 0 : index
    %c0_14 = arith.constant 0 : index
    %c0_15 = arith.constant 0 : index
    %18 = vector.load %arg7[%c0_13, %c0_14, %c0_15] : memref<1x1x1024xf32, #tpu.memory_space<vmem>>, vector<1x1x1024xf32>
    tpu.vector_store %arg7[%c0_13, %c0_14, %c0_15], %17 {strides = array<i32>} : memref<1x1x1024xf32, #tpu.memory_space<vmem>>, vector<1x1x1024xf32>,
    %19 = arith.mulf %13, %13 : vector<128x1024xf32>
    %cst_16 = arith.constant dense<0.000000e+00> : vector<1024xf32>
    %20 = vector.multi_reduction <add>, %19, %cst_16 [0] : vector<128x1024xf32> to vector<1024xf32>
    %21 = vector.shape_cast %20 : vector<1024xf32> to vector<1x1024xf32>
    %22 = vector.shape_cast %21 : vector<1x1024xf32> to vector<1x1x1024xf32>
    %c0_17 = arith.constant 0 : index
    %c0_18 = arith.constant 0 : index
    %c0_19 = arith.constant 0 : index
    %23 = vector.load %arg8[%c0_17, %c0_18, %c0_19] : memref<1x1x1024xf32, #tpu.memory_space<vmem>>, vector<1x1x1024xf32>
    tpu.vector_store %arg8[%c0_17, %c0_18, %c0_19], %22 {strides = array<i32>} : memref<1x1x1024xf32, #tpu.memory_space<vmem>>, vector<1x1x1024xf32>,
    return
  }
  func.func @transform_0(%arg0: i32) -> (i32, i32) {
    %c0_i32 = arith.constant 0 : i32
    %c0_i32_0 = arith.constant 0 : i32
    return %arg0, %c0_i32 : i32, i32
  }
  func.func @transform_1(%arg0: i32) -> (i32, i32) {
    %c0_i32 = arith.constant 0 : i32
    %c0_i32_0 = arith.constant 0 : i32
    %c0_i32_1 = arith.constant 0 : i32
    return %c0_i32, %c0_i32_0 : i32, i32
  }
  func.func @transform_2(%arg0: i32) -> (i32, i32) {
    %c0_i32 = arith.constant 0 : i32
    %c0_i32_0 = arith.constant 0 : i32
    %c0_i32_1 = arith.constant 0 : i32
    return %c0_i32, %c0_i32_0 : i32, i32
  }
  func.func @transform_3(%arg0: i32) -> (i32, i32) {
    %c0_i32 = arith.constant 0 : i32
    %c0_i32_0 = arith.constant 0 : i32
    %c0_i32_1 = arith.constant 0 : i32
    return %c0_i32, %c0_i32_0 : i32, i32
  }
  func.func @transform_4(%arg0: i32) -> (i32, i32) {
    %c0_i32 = arith.constant 0 : i32
    %c0_i32_0 = arith.constant 0 : i32
    %c0_i32_1 = arith.constant 0 : i32
    return %c0_i32, %c0_i32_0 : i32, i32
  }
  func.func @transform_5(%arg0: i32) -> (i32, i32) {
    %c0_i32 = arith.constant 0 : i32
    %c0_i32_0 = arith.constant 0 : i32
    return %arg0, %c0_i32 : i32, i32
  }
  func.func @transform_6(%arg0: i32) -> (i32, i32, i32) {
    %c0_i32 = arith.constant 0 : i32
    %c0_i32_0 = arith.constant 0 : i32
    %c0_i32_1 = arith.constant 0 : i32
    return %arg0, %c0_i32, %c0_i32_0 : i32, i32, i32
  }
  func.func @transform_7(%arg0: i32) -> (i32, i32, i32) {
    %c0_i32 = arith.constant 0 : i32
    %c0_i32_0 = arith.constant 0 : i32
    %c0_i32_1 = arith.constant 0 : i32
    return %arg0, %c0_i32, %c0_i32_0 : i32, i32, i32
  }
}

module attributes {stable_mosaic.version = 11 : i64} {
  func.func @_mm_stage_kernel(%arg0: i32, %arg1: memref<128x64xf32, #tpu.memory_space<vmem>>, %arg2: memref<1x64xf32, #tpu.memory_space<vmem>>, %arg3: memref<1x64xf32, #tpu.memory_space<vmem>>, %arg4: memref<64x128xf32, #tpu.memory_space<vmem>>, %arg5: memref<1x128xf32, #tpu.memory_space<vmem>>, %arg6: memref<128x128xf32, #tpu.memory_space<vmem>>, %arg7: memref<1x1x128xf32, #tpu.memory_space<vmem>>, %arg8: memref<1x1x128xf32, #tpu.memory_space<vmem>>) attributes {dimension_semantics = [#tpu.dimension_semantics<parallel>], iteration_bounds = array<i64: 4>, scalar_prefetch = 0 : i64, scratch_operands = 0 : i64, tpu.core_type = #tpu.core_type<tc>, window_params = [{transform_indices = @transform_0, window_bounds = array<i64: 128, 64>}, {pipeline_mode = #tpu.pipeline_mode<synchronous>, transform_indices = @transform_1, window_bounds = array<i64: 1, 64>}, {pipeline_mode = #tpu.pipeline_mode<synchronous>, transform_indices = @transform_2, window_bounds = array<i64: 1, 64>}, {pipeline_mode = #tpu.pipeline_mode<synchronous>, transform_indices = @transform_3, window_bounds = array<i64: 64, 128>}, {pipeline_mode = #tpu.pipeline_mode<synchronous>, transform_indices = @transform_4, window_bounds = array<i64: 1, 128>}, {transform_indices = @transform_5, window_bounds = array<i64: 128, 128>}, {transform_indices = @transform_6, window_bounds = array<i64: 1, 1, 128>}, {transform_indices = @transform_7, window_bounds = array<i64: 1, 1, 128>}]} {
    %c0 = arith.constant 0 : index
    %c0_0 = arith.constant 0 : index
    %0 = vector.load %arg1[%c0, %c0_0] : memref<128x64xf32, #tpu.memory_space<vmem>>, vector<128x64xf32>
    %c0_1 = arith.constant 0 : index
    %c0_2 = arith.constant 0 : index
    %1 = vector.load %arg2[%c0_1, %c0_2] : memref<1x64xf32, #tpu.memory_space<vmem>>, vector<1x64xf32>
    %2 = vector.broadcast %1 : vector<1x64xf32> to vector<128x64xf32>
    %3 = arith.mulf %0, %2 : vector<128x64xf32>
    %c0_3 = arith.constant 0 : index
    %c0_4 = arith.constant 0 : index
    %4 = vector.load %arg3[%c0_3, %c0_4] : memref<1x64xf32, #tpu.memory_space<vmem>>, vector<1x64xf32>
    %5 = vector.broadcast %4 : vector<1x64xf32> to vector<128x64xf32>
    %6 = arith.addf %3, %5 : vector<128x64xf32>
    %cst = arith.constant 0.000000e+00 : f32
    %7 = vector.broadcast %cst : f32 to vector<128x64xf32>
    %8 = arith.maximumf %6, %7 : vector<128x64xf32>
    %c0_5 = arith.constant 0 : index
    %c0_6 = arith.constant 0 : index
    %9 = vector.load %arg4[%c0_5, %c0_6] : memref<64x128xf32, #tpu.memory_space<vmem>>, vector<64x128xf32>
    %cst_7 = arith.constant dense<0.000000e+00> : vector<128x128xf32>
    %10 = tpu.matmul %8, %9, %cst_7 {dimension_numbers = #tpu.dot_dimension_numbers<[1], [0], [0], [1], [0, 0, 1, 1], [], []>} : vector<128x64xf32>, vector<64x128xf32>, vector<128x128xf32> -> vector<128x128xf32>
    %c0_8 = arith.constant 0 : index
    %c0_9 = arith.constant 0 : index
    %11 = vector.load %arg5[%c0_8, %c0_9] : memref<1x128xf32, #tpu.memory_space<vmem>>, vector<1x128xf32>
    %12 = vector.broadcast %11 : vector<1x128xf32> to vector<128x128xf32>
    %13 = arith.addf %10, %12 : vector<128x128xf32>
    %c0_10 = arith.constant 0 : index
    %c0_11 = arith.constant 0 : index
    %14 = vector.load %arg6[%c0_10, %c0_11] : memref<128x128xf32, #tpu.memory_space<vmem>>, vector<128x128xf32>
    tpu.vector_store %arg6[%c0_10, %c0_11], %13 {strides = array<i32>} : memref<128x128xf32, #tpu.memory_space<vmem>>, vector<128x128xf32>,
    %cst_12 = arith.constant dense<0.000000e+00> : vector<128xf32>
    %15 = vector.multi_reduction <add>, %13, %cst_12 [0] : vector<128x128xf32> to vector<128xf32>
    %16 = vector.shape_cast %15 : vector<128xf32> to vector<1x128xf32>
    %17 = vector.shape_cast %16 : vector<1x128xf32> to vector<1x1x128xf32>
    %c0_13 = arith.constant 0 : index
    %c0_14 = arith.constant 0 : index
    %c0_15 = arith.constant 0 : index
    %18 = vector.load %arg7[%c0_13, %c0_14, %c0_15] : memref<1x1x128xf32, #tpu.memory_space<vmem>>, vector<1x1x128xf32>
    tpu.vector_store %arg7[%c0_13, %c0_14, %c0_15], %17 {strides = array<i32>} : memref<1x1x128xf32, #tpu.memory_space<vmem>>, vector<1x1x128xf32>,
    %19 = arith.mulf %13, %13 : vector<128x128xf32>
    %cst_16 = arith.constant dense<0.000000e+00> : vector<128xf32>
    %20 = vector.multi_reduction <add>, %19, %cst_16 [0] : vector<128x128xf32> to vector<128xf32>
    %21 = vector.shape_cast %20 : vector<128xf32> to vector<1x128xf32>
    %22 = vector.shape_cast %21 : vector<1x128xf32> to vector<1x1x128xf32>
    %c0_17 = arith.constant 0 : index
    %c0_18 = arith.constant 0 : index
    %c0_19 = arith.constant 0 : index
    %23 = vector.load %arg8[%c0_17, %c0_18, %c0_19] : memref<1x1x128xf32, #tpu.memory_space<vmem>>, vector<1x1x128xf32>
    tpu.vector_store %arg8[%c0_17, %c0_18, %c0_19], %22 {strides = array<i32>} : memref<1x1x128xf32, #tpu.memory_space<vmem>>, vector<1x1x128xf32>,
    return
  }
  func.func @transform_0(%arg0: i32) -> (i32, i32) {
    %c0_i32 = arith.constant 0 : i32
    %c0_i32_0 = arith.constant 0 : i32
    return %arg0, %c0_i32 : i32, i32
  }
  func.func @transform_1(%arg0: i32) -> (i32, i32) {
    %c0_i32 = arith.constant 0 : i32
    %c0_i32_0 = arith.constant 0 : i32
    %c0_i32_1 = arith.constant 0 : i32
    return %c0_i32, %c0_i32_0 : i32, i32
  }
  func.func @transform_2(%arg0: i32) -> (i32, i32) {
    %c0_i32 = arith.constant 0 : i32
    %c0_i32_0 = arith.constant 0 : i32
    %c0_i32_1 = arith.constant 0 : i32
    return %c0_i32, %c0_i32_0 : i32, i32
  }
  func.func @transform_3(%arg0: i32) -> (i32, i32) {
    %c0_i32 = arith.constant 0 : i32
    %c0_i32_0 = arith.constant 0 : i32
    %c0_i32_1 = arith.constant 0 : i32
    return %c0_i32, %c0_i32_0 : i32, i32
  }
  func.func @transform_4(%arg0: i32) -> (i32, i32) {
    %c0_i32 = arith.constant 0 : i32
    %c0_i32_0 = arith.constant 0 : i32
    %c0_i32_1 = arith.constant 0 : i32
    return %c0_i32, %c0_i32_0 : i32, i32
  }
  func.func @transform_5(%arg0: i32) -> (i32, i32) {
    %c0_i32 = arith.constant 0 : i32
    %c0_i32_0 = arith.constant 0 : i32
    return %arg0, %c0_i32 : i32, i32
  }
  func.func @transform_6(%arg0: i32) -> (i32, i32, i32) {
    %c0_i32 = arith.constant 0 : i32
    %c0_i32_0 = arith.constant 0 : i32
    %c0_i32_1 = arith.constant 0 : i32
    return %arg0, %c0_i32, %c0_i32_0 : i32, i32, i32
  }
  func.func @transform_7(%arg0: i32) -> (i32, i32, i32) {
    %c0_i32 = arith.constant 0 : i32
    %c0_i32_0 = arith.constant 0 : i32
    %c0_i32_1 = arith.constant 0 : i32
    return %arg0, %c0_i32, %c0_i32_0 : i32, i32, i32
  }
}

module attributes {stable_mosaic.version = 11 : i64} {
  func.func @_max_stage_kernel(%arg0: i32, %arg1: i32, %arg2: memref<128x1024xf32, #tpu.memory_space<vmem>>, %arg3: memref<1x1024xf32, #tpu.memory_space<vmem>>, %arg4: memref<1x1024xf32, #tpu.memory_space<vmem>>, %arg5: memref<1x1x1024xf32, #tpu.memory_space<vmem>>) attributes {dimension_semantics = [#tpu.dimension_semantics<parallel>, #tpu.dimension_semantics<arbitrary>], iteration_bounds = array<i64: 2, 2>, scalar_prefetch = 0 : i64, scratch_operands = 0 : i64, tpu.core_type = #tpu.core_type<tc>, window_params = [{transform_indices = @transform_0, window_bounds = array<i64: 128, 1024>}, {pipeline_mode = #tpu.pipeline_mode<synchronous>, transform_indices = @transform_1, window_bounds = array<i64: 1, 1024>}, {pipeline_mode = #tpu.pipeline_mode<synchronous>, transform_indices = @transform_2, window_bounds = array<i64: 1, 1024>}, {transform_indices = @transform_3, window_bounds = array<i64: 1, 1, 1024>}]} {
    %c0 = arith.constant 0 : index
    %c0_0 = arith.constant 0 : index
    %0 = vector.load %arg2[%c0, %c0_0] : memref<128x1024xf32, #tpu.memory_space<vmem>>, vector<128x1024xf32>
    %c0_1 = arith.constant 0 : index
    %c0_2 = arith.constant 0 : index
    %1 = vector.load %arg3[%c0_1, %c0_2] : memref<1x1024xf32, #tpu.memory_space<vmem>>, vector<1x1024xf32>
    %2 = vector.broadcast %1 : vector<1x1024xf32> to vector<128x1024xf32>
    %3 = arith.mulf %0, %2 : vector<128x1024xf32>
    %c0_3 = arith.constant 0 : index
    %c0_4 = arith.constant 0 : index
    %4 = vector.load %arg4[%c0_3, %c0_4] : memref<1x1024xf32, #tpu.memory_space<vmem>>, vector<1x1024xf32>
    %5 = vector.broadcast %4 : vector<1x1024xf32> to vector<128x1024xf32>
    %6 = arith.addf %3, %5 : vector<128x1024xf32>
    %cst = arith.constant 0.000000e+00 : f32
    %7 = vector.broadcast %cst : f32 to vector<128x1024xf32>
    %8 = arith.maximumf %6, %7 : vector<128x1024xf32>
    %cst_5 = arith.constant dense<0xFF800000> : vector<1024xf32>
    %9 = vector.multi_reduction <maximumf>, %8, %cst_5 [0] : vector<128x1024xf32> to vector<1024xf32>
    %10 = vector.shape_cast %9 : vector<1024xf32> to vector<1x1024xf32>
    %11 = vector.shape_cast %10 : vector<1x1024xf32> to vector<1x1x1024xf32>
    %c0_i32 = arith.constant 0 : i32
    %12 = arith.cmpi eq, %arg1, %c0_i32 : i32
    %13 = arith.extui %12 : i1 to i32
    %c0_i32_6 = arith.constant 0 : i32
    %14 = arith.cmpi ne, %13, %c0_i32_6 : i32
    scf.if %14 {
      %c0_9 = arith.constant 0 : index
      %c0_10 = arith.constant 0 : index
      %c0_11 = arith.constant 0 : index
      %18 = vector.load %arg5[%c0_9, %c0_10, %c0_11] : memref<1x1x1024xf32, #tpu.memory_space<vmem>>, vector<1x1x1024xf32>
      tpu.vector_store %arg5[%c0_9, %c0_10, %c0_11], %11 {strides = array<i32>} : memref<1x1x1024xf32, #tpu.memory_space<vmem>>, vector<1x1x1024xf32>,
    } else {
    }
    %c0_i32_7 = arith.constant 0 : i32
    %15 = arith.cmpi sgt, %arg1, %c0_i32_7 : i32
    %16 = arith.extui %15 : i1 to i32
    %c0_i32_8 = arith.constant 0 : i32
    %17 = arith.cmpi ne, %16, %c0_i32_8 : i32
    scf.if %17 {
      %c0_9 = arith.constant 0 : index
      %c0_10 = arith.constant 0 : index
      %c0_11 = arith.constant 0 : index
      %18 = vector.load %arg5[%c0_9, %c0_10, %c0_11] : memref<1x1x1024xf32, #tpu.memory_space<vmem>>, vector<1x1x1024xf32>
      %19 = arith.maximumf %18, %11 : vector<1x1x1024xf32>
      %c0_12 = arith.constant 0 : index
      %c0_13 = arith.constant 0 : index
      %c0_14 = arith.constant 0 : index
      %20 = vector.load %arg5[%c0_12, %c0_13, %c0_14] : memref<1x1x1024xf32, #tpu.memory_space<vmem>>, vector<1x1x1024xf32>
      tpu.vector_store %arg5[%c0_12, %c0_13, %c0_14], %19 {strides = array<i32>} : memref<1x1x1024xf32, #tpu.memory_space<vmem>>, vector<1x1x1024xf32>,
    } else {
    }
    return
  }
  func.func @transform_0(%arg0: i32, %arg1: i32) -> (i32, i32) {
    %c2_i32 = arith.constant 2 : i32
    %0 = arith.muli %arg0, %c2_i32 : i32
    %1 = arith.addi %0, %arg1 : i32
    %c0_i32 = arith.constant 0 : i32
    %c0_i32_0 = arith.constant 0 : i32
    return %1, %c0_i32 : i32, i32
  }
  func.func @transform_1(%arg0: i32, %arg1: i32) -> (i32, i32) {
    %c0_i32 = arith.constant 0 : i32
    %c0_i32_0 = arith.constant 0 : i32
    %c0_i32_1 = arith.constant 0 : i32
    return %c0_i32, %c0_i32_0 : i32, i32
  }
  func.func @transform_2(%arg0: i32, %arg1: i32) -> (i32, i32) {
    %c0_i32 = arith.constant 0 : i32
    %c0_i32_0 = arith.constant 0 : i32
    %c0_i32_1 = arith.constant 0 : i32
    return %c0_i32, %c0_i32_0 : i32, i32
  }
  func.func @transform_3(%arg0: i32, %arg1: i32) -> (i32, i32, i32) {
    %c0_i32 = arith.constant 0 : i32
    %c0_i32_0 = arith.constant 0 : i32
    %c0_i32_1 = arith.constant 0 : i32
    return %arg0, %c0_i32, %c0_i32_0 : i32, i32, i32
  }
}

</mosaic_0001>

<bundles_post_ra>
// kernel: t_net_forward.5
= control target key start
LH: loop header
LB: loop body
LE: loop exit
PB: predicated region body
PF: predicated region fallthrough
CT: control target
= control target key end

     0   :  { %13 = vsyncpa [#allocation3], 0  ;;  %s1301_s0 = inlined_call_operand.vmem [shape: f32[512,64], index: 0, kind: input, shape index: {}]   ;;  %s1302_s1 = inlined_call_operand.vmem [shape: f32[1,64], index: 1, kind: input, shape index: {}]   ;;  %s1303_s2 = inlined_call_operand.vmem [shape: f32[1,64], index: 2, kind: input, shape index: {}]   ;;  %s1304_s3 = inlined_call_operand.hbm [shape: f32[64,128], index: 3, kind: input, shape index: {}]   ;;  %s1305_s4 = inlined_call_operand.hbm [shape: f32[1,128], index: 4, kind: input, shape index: {}]   ;;  %s1306_s5 = inlined_call_operand.vmem [shape: f32[512,128], index: 5, kind: output, shape index: {0}]   ;;  %s1307_s6 = inlined_call_operand.vmem [shape: f32[4,1,128], index: 6, kind: output, shape index: {1}]   ;;  %s1308_s7 = inlined_call_operand.vmem [shape: f32[4,1,128], index: 7, kind: output, shape index: {2}]  }
   0x1   :  { %14 = vsyncpa [#allocation5], 0  ;;  %s1087_s24 = smov 0  }
   0x2 LB: > { %s1093_s25 = sadd.s32 4294967295, %s1041_s24   ;;  %p820_p0 = scmp.ge.s32.totalorder %s1041_s24, 1  ;;  %s1041_s24 = sphi %s1087_s24, %s20_s24  }
   0x3   : > { %p213_p1 = scmp.lt.s32.totalorder %s1041_s24, 5  ;;  %s1043_s26 = smov [#allocation2]  }
   0x4   : > { %s231_s27 = sshll.u32 %s1043_s26, 4  ;;  %p1309_p3 = scmp.eq.s32.totalorder %s1093_s25, 0  ;;  %s232_s27 = int_to_ptr.vmem [resolvable:$true] %s231_s27 }
   0x5   : > { %p1097_p2 = pnand %p820_p0, %p213_p1  ;;  %s1044_s29 = smov [#allocation4]  }
   0x6   : > { %s245_s30 = sshll.u32 %s1044_s29, 4  ;;  %s971_s11 = scalar_lea.hbm %s1304_s3, 1024  ;;  %s1110_s30 = int_to_ptr.vmem [resolvable:$true] %s245_s30 }
   0x7   : > { %s1311_s28 = scalar_select %p1097_p2, 1, 0 }
   0x8   : > { %p948_p4 = pneg %p1097_p2  ;;  %p972_p6 = scmp.ne.s32.totalorder %s1304_s3, %s971_s11 }
   0x9   : > { %p978_p10 = scmp.lt.u32.totalorder %s971_s11, %s1304_s3 }
   0xa   : > { %p1106_p5 = pnand %p1309_p3, %p948_p4 }
   0xc   : > { %p973_p7 = pneg %p1106_p5 }
   0xe   : > { %p974_p8 = pnand %p973_p7, %p972_p6 }
  0x10   : > { %p975_p9 = pneg %p974_p8 }
  0x12   : > { %p980_p11 = pnand %p978_p10, %p975_p9 }
  0x14   : > { %983 = shalt.err (!%p980_p11)
}
  0x15   : > { %s984_s16 = scalar_lea.vmem %s232_s27, 1024  ;;  %p992_p1 = scmp.lt.s32.totalorder %s232_s27, %s232_s27 }
  0x16   : > { %p985_p12 = scmp.ne.s32.totalorder %s232_s27, %s984_s16  ;;  %p993_p4 = scmp.lt.s32.totalorder %s984_s16, %s984_s16 }
  0x18   : > { %p987_p13 = pnand %p985_p12, %p973_p7  ;;  %p994_p3 = por %p993_p4, %p992_p1 }
  0x1a   : > { %p988_p0 = pneg %p987_p13 }
  0x1c   : > { %p995_p2 = pnand %p994_p3, %p988_p0 }
  0x1e   : > { %998 = shalt.err (!%p995_p2)
}
  0x1f   : > { %s1045_s17 = smov 128   ;;  %s1046_s18 = smov 8  }
  0x20   : > { %951 = dma.hbm_to_vmem [thread:$0]  (!%p1106_p5), %s1304_s3, 1024, %s232_s27, [#allocation3], %s1045_s17, %s1045_s17, %s1046_s18  }
  0x21   : > { %s999_s23 = scalar_lea.hbm %s1305_s4, 16 }
  0x22   : > { %p1000_p6 = scmp.ne.s32.totalorder %s1305_s4, %s999_s23  ;;  %p1006_p8 = scmp.lt.u32.totalorder %s999_s23, %s1305_s4 }
  0x24   : > { %p1002_p2 = pnand %p1000_p6, %p973_p7 }
  0x26   : > { %p1003_p3 = pneg %p1002_p2 }
  0x28   : > { %p1008_p9 = pnand %p1006_p8, %p1003_p3 }
  0x2a   : > { %1011 = shalt.err (!%p1008_p9)
}
  0x2b   : > { %s1012_s27 = scalar_lea.vmem %s1110_s30, 16  ;;  %s1019_s11 = scalar_lea.vmem %s1110_s30, 32 }
  0x2c   : > { %p1013_p10 = scmp.ne.s32.totalorder %s1110_s30, %s1012_s27  ;;  %p1020_p13 = scmp.lt.s32.totalorder %s1110_s30, %s1110_s30 }
  0x2d   : > { %p1021_p0 = scmp.lt.s32.totalorder %s1019_s11, %s1012_s27 }
  0x2e   : > { %p1015_p11 = pnand %p1013_p10, %p973_p7 }
  0x2f   : > { %p1022_p1 = por %p1021_p0, %p1020_p13 }
  0x30   : > { %p1016_p12 = pneg %p1015_p11 }
  0x32   : > { %p1023_p4 = pnand %p1022_p1, %p1016_p12 }
  0x34   : > { %1026 = shalt.err (!%p1023_p4)
}
  0x35   : > { %954 = dma.hbm_to_vmem [thread:$0]  (!%p1106_p5), %s1305_s4, 16, %s1110_s30, [#allocation5]  }
  0x36   : > { %p1313_p6 = scmp.ne.s32.totalorder %s1311_s28, 0 }
  0x37   : > { %p1314_p7 = scmp.eq.s32.totalorder (!%p1313_p6), %s1093_s25, 0 }
  0x38   : > { %267 = sbr.rel (%p1313_p6) target bundleno = 349 (0x15d), region = 40 }
  0x3f   : > { %1032 = dma.done.wait (%p1314_p7), [#allocation3], 1024   ;;  %p1315_p2 = pmov %p1314_p7 }
  0x41   : > { %1034 = vsyncadd (%p1315_p2), [#allocation3], 4294966272  ;;  %p1316_p3 = pmov %p1315_p2 }
  0x42   : > { %p1317_p8 = pmov %p1315_p2 }
  0x43   : > { %1036 = dma.done.wait (%p1316_p3), [#allocation5], 16  }
  0x44   : > { %1038 = vsyncadd (%p1317_p8), [#allocation5], 4294967280  ;;  %s827_s8 = sshll.u32 %s1093_s25, 4  ;;  %v405_v0 = vld [vmem:[#allocation2] sm:$0xff]  ;;  %v406_v1 = vld [vmem:[#allocation2 + $0x8] sm:$0xff]  ;;  %vm420_vm0 = vcmask 523264  }
  0x45   : > { %p310_p9 = scmp.lt.s32.totalorder %s827_s8, 63  ;;  %v407_v2 = vld [vmem:[#allocation2 + $0x10] sm:$0xff]  ;;  %v916_v3 = vpack.c.bf16 %v406_v1, %v405_v0  ;;  %v408_v4 = vld [vmem:[#allocation2 + $0x18] sm:$0xff]  ;;  %v409_v6 = vld [vmem:[#allocation2 + $0x20] sm:$0xff]  ;;  %p321_p5 = scmp.lt.s32.totalorder %s1093_s25, 3 }
  0x46   : > { %v920_v5 = vpack.c.bf16 %v408_v4, %v407_v2  ;;  %v410_v7 = vld [vmem:[#allocation2 + $0x28] sm:$0xff]  ;;  %v1185_v9 = vld [vmem:[%s1302_s1] ss:$0 sm:$0xff]  ;;  %v411_v15 = vld [vmem:[#allocation2 + $0x30] sm:$0xff] }
  0x47   : > { %s1319_s8 = smov (!%p310_p9, %s827_s8), 63  ;;  %917 = vmatprep.subr.bf16.mxu0 %v916_v3  ;;  %932 = vmatprep.subr.bf16.mxu1 %v916_v3  ;;  %v1190_v10 = vld [vmem:[%s1303_s2] ss:$0 sm:$0xff]  ;;  %v924_v14 = vpack.c.bf16 %v410_v7, %v409_v6  ;;  %v412_v16 = vld [vmem:[#allocation2 + $0x38] sm:$0xff]  ;;  %s1321_s25 = smov (!%p321_p5, %s1093_s25), 3 }
  0x48   : > { %s828_s28 = sshll.u32 %s1319_s8, 3  ;;  %919 = vmatpush3.bf16.msra.mxu0 %v916_v3  ;;  %936 = vmatpush3.bf16.msra.mxu1 %v916_v3  ;;  %v928_v27 = vpack.c.bf16 %v412_v16, %v411_v15  ;;  %s323_s29 = scalar_lea.vmem %s1307_s6, %s1321_s25 }
  0x49   : > { %s1179_s15 = scalar_lea.vmem %s1301_s0, %s828_s28  ;;  %921 = vmatprep.subr.bf16.mxu0 %v920_v5  ;;  %933 = vmatprep.subr.bf16.mxu1 %v920_v5  ;;  %s1260_s22 = scalar_lea.vmem %s1306_s5, %s828_s28 }
  0x4a   : > { %v327_v8 = vld [vmem:[%s1179_s15] sm:$0xff]  ;;  %v328_v12 = vld [vmem:[%s1179_s15 + $0x8] sm:$0xff]  ;;  %v329_v13 = vld [vmem:[%s1179_s15 + $0x10] sm:$0xff]  ;;  %s326_s27 = scalar_lea.vmem %s1308_s7, %s1321_s25 }
  0x4b   : > { %v350_v11 = vmul.f32 %v1185_v9, %v327_v8  ;;  %v330_v18 = vld [vmem:[%s1179_s15 + $0x18] sm:$0xff]  ;;  %v351_v19 = vmul.f32 %v1185_v9, %v328_v12  ;;  %v352_v20 = vmul.f32 %v1185_v9, %v329_v13  ;;  %v331_v21 = vld [vmem:[%s1179_s15 + $0x20] sm:$0xff]  ;;  %v336_v23 = vld [vmem:[%s1179_s15 + $0x48] sm:$0xff] }
  0x4c   : > { %v335_v22 = vld [vmem:[%s1179_s15 + $0x40] sm:$0xff]  ;;  %923 = vmatpush3.bf16.msra.mxu0 %v920_v5  ;;  %937 = vmatpush3.bf16.msra.mxu1 %v920_v5  ;;  %v337_v25 = vld [vmem:[%s1179_s15 + $0x50] sm:$0xff]  ;;  %v338_v26 = vld [vmem:[%s1179_s15 + $0x58] sm:$0xff]  ;;  %v353_v29 = vmul.f32 %v1185_v9, %v330_v18  ;;  %v354_v30 = vmul.f32 %v1185_v9, %v331_v21  ;;  %v359_v33 = vmul.f32 %v1185_v9, %v336_v23 }
  0x4d   : > { %v373_v17 = vadd.f32 %v1190_v10, %v350_v11  ;;  %925 = vmatprep.subr.bf16.mxu0 %v924_v14  ;;  %934 = vmatprep.subr.bf16.mxu1 %v924_v14  ;;  %v339_v28 = vld [vmem:[%s1179_s15 + $0x60] sm:$0xff]  ;;  %v332_v31 = vld [vmem:[%s1179_s15 + $0x28] sm:$0xff]  ;;  %v358_v32 = vmul.f32 %v1185_v9, %v335_v22  ;;  %v374_v34 = vadd.f32 %v1190_v10, %v351_v19  ;;  %v333_v36 = vld [vmem:[%s1179_s15 + $0x30] sm:$0xff] }
  0x4e   : > { %v375_v35 = vadd.f32 %v1190_v10, %v352_v20  ;;  %v360_v37 = vmul.f32 %v1185_v9, %v337_v25  ;;  %v361_v38 = vmul.f32 %v1185_v9, %v338_v26  ;;  %v382_v40 = vadd.f32 %v1190_v10, %v359_v33  ;;  %v340_v42 = vld [vmem:[%s1179_s15 + $0x68] sm:$0xff]  ;;  %v341_v45 = vld [vmem:[%s1179_s15 + $0x70] sm:$0xff]  ;;  %v334_v51 = vld [vmem:[%s1179_s15 + $0x38] sm:$0xff] }
  0x4f   : > { %v389_v24 = vmax.f32 %v373_v17, 0.0  ;;  %v381_v39 = vadd.f32 %v1190_v10, %v358_v32  ;;  %v362_v41 = vmul.f32 %v1185_v9, %v339_v28  ;;  %v355_v43 = vmul.f32 %v1185_v9, %v332_v31  ;;  %v342_v59 = vld [vmem:[%s1179_s15 + $0x78] sm:$0xff] }
  0x50   : > { %927 = vmatpush3.bf16.msra.mxu0 %v924_v14  ;;  %938 = vmatpush3.bf16.msra.mxu1 %v924_v14  ;;  %v383_v44 = vadd.f32 %v1190_v10, %v360_v37  ;;  %v376_v46 = vadd.f32 %v1190_v10, %v353_v29  ;;  %v377_v47 = vadd.f32 %v1190_v10, %v354_v30  ;;  %v390_v50 = vmax.f32 %v374_v34, 0.0 }
  0x51   : > { %892 = vmatprep.mubr.msk.f32.mxu0 %vm420_vm0, %v389_v24  ;;  %929 = vmatprep.subr.bf16.mxu0 %v928_v27  ;;  %v356_v48 = vmul.f32 %v1185_v9, %v333_v36  ;;  %v397_v49 = vmax.f32 %v381_v39, 0.0  ;;  %v398_v52 = vmax.f32 %v382_v40, 0.0  ;;  %v384_v53 = vadd.f32 %v1190_v10, %v361_v38 }
  0x52   : > { %935 = vmatprep.subr.bf16.mxu1 %v928_v27  ;;  %v363_v54 = vmul.f32 %v1185_v9, %v340_v42  ;;  %v391_v55 = vmax.f32 %v375_v35, 0.0  ;;  %v399_v56 = vmax.f32 %v383_v44, 0.0  ;;  %v385_v57 = vadd.f32 %v1190_v10, %v362_v41 }
  0x53   : > { %v364_v58 = vmul.f32 %v1185_v9, %v341_v45  ;;  %904 = vmatprep.mubr.msk.f32.mxu1 %vm420_vm0, %v397_v49  ;;  %v378_v60 = vadd.f32 %v1190_v10, %v355_v43  ;;  %v357_v61 = vmul.f32 %v1185_v9, %v334_v51  ;;  %v392_v62 = vmax.f32 %v376_v46, 0.0 }
  0x54   : > { %931 = vmatpush3.bf16.msra.mxu0 %v928_v27  ;;  %939 = vmatpush3.bf16.msra.mxu1 %v928_v27  ;;  %v400_v63 = vmax.f32 %v384_v53, 0.0  ;;  %v386_v0 = vadd.f32 %v1190_v10, %v363_v54  ;;  %v365_v1 = vmul.f32 %v1185_v9, %v342_v59  ;;  %v393_v2 = vmax.f32 %v377_v47, 0.0 }
  0x55   : > { %v379_v3 = vadd.f32 %v1190_v10, %v356_v48  ;;  %v401_v4 = vmax.f32 %v385_v57, 0.0  ;;  %v387_v5 = vadd.f32 %v1190_v10, %v364_v58  ;;  %v394_v6 = vmax.f32 %v378_v60, 0.0 }
  0x56   : > { %v380_v7 = vadd.f32 %v1190_v10, %v357_v61  ;;  %v402_v8 = vmax.f32 %v386_v0, 0.0  ;;  %v388_v9 = vadd.f32 %v1190_v10, %v365_v1  ;;  %v833_v10 = vld [vmem:[#allocation4] ss:$0 sm:$0xff] }
  0x57   : > { %893 = vmatmul.mubr.msk.f32.vlgmr.msra.gmra.mrb[0].mxu0 %vm420_vm0, %v390_v50  ;;  %905 = vmatmul.mubr.msk.f32.vlgmr.msra.gmra.mrb[0].mxu1 %vm420_vm0, %v398_v52  ;;  %v395_v11 = vmax.f32 %v379_v3, 0.0  ;;  %v403_v12 = vmax.f32 %v387_v5, 0.0 }
  0x58   : > { %895 = vmatprep.mubr.msk.f32.mxu0 %vm420_vm0, %v391_v55  ;;  %907 = vmatprep.mubr.msk.f32.mxu1 %vm420_vm0, %v399_v56  ;;  %v396_v13 = vmax.f32 %v380_v7, 0.0  ;;  %v404_v14 = vmax.f32 %v388_v9, 0.0 }
  0x5b   : > { %896 = vmatmul.mubr.msk.f32.gmra.mrb[2].mxu0 %vm420_vm0, %v392_v62  ;;  %908 = vmatmul.mubr.msk.f32.gmra.mrb[2].mxu1 %vm420_vm0, %v400_v63 }
  0x5c   : > { %898 = vmatprep.mubr.msk.f32.mxu0 %vm420_vm0, %v393_v2  ;;  %910 = vmatprep.mubr.msk.f32.mxu1 %vm420_vm0, %v401_v4 }
  0x5f   : > { %899 = vmatmul.mubr.msk.f32.gmra.mrb[4].mxu0 %vm420_vm0, %v394_v6  ;;  %911 = vmatmul.mubr.msk.f32.gmra.mrb[4].mxu1 %vm420_vm0, %v402_v8 }
  0x60   : > { %901 = vmatprep.mubr.msk.f32.mxu0 %vm420_vm0, %v395_v11  ;;  %913 = vmatprep.mubr.msk.f32.mxu1 %vm420_vm0, %v403_v12 }
  0x63   : > { %902 = vmatmul.mubr.msk.f32.gmra.mrb[6].mxu0 %vm420_vm0, %v396_v13  ;;  %914 = vmatmul.mubr.msk.f32.gmra.mrb[6].mxu1 %vm420_vm0, %v404_v14 }
 0x12a   : > { %v894_v15 = vpop.f32.mrb[0].mxu0  ;;  %v906_v16 = vpop.f32.mrb[0].mxu1 }
 0x12b   : > { %v541_v17 = vadd.f32 %v894_v15, %v833_v10  ;;  %v535_v18 = vpop.f32.mrb[1].mxu0  ;;  %v1262_v19 = vadd.f32 %v906_v16, %v833_v10  ;;  %v575_v20 = vpop.f32.mrb[1].mxu1 }
 0x12c   : > { %v536_v21 = vadd.f32 %v833_v10, %v535_v18  ;;  %v1264_v22 = vadd.f32 %v833_v10, %v575_v20 }
 0x12d   : > { %615 = vst [vmem:[%s1260_s22 + $0x8] sm:$0xff] %v541_v17  ;;  %v653_v23 = vmul.f32 %v541_v17, %v541_v17  ;;  %623 = vst [vmem:[%s1260_s22 + $0x48] sm:$0xff] %v1262_v19  ;;  %v661_v7 = vmul.f32 %v1262_v19, %v1262_v19 }
 0x12e   : > { %614 = vst [vmem:[%s1260_s22] sm:$0xff] %v536_v21  ;;  %v630_v24 = vadd.f32 %v541_v17, %v536_v21  ;;  %v652_v25 = vmul.f32 %v536_v21, %v536_v21  ;;  %v897_v26 = vpop.f32.mrb[2].mxu0  ;;  %622 = vst [vmem:[%s1260_s22 + $0x40] sm:$0xff] %v1264_v22  ;;  %v909_v27 = vpop.f32.mrb[2].mxu1  ;;  %v660_v4 = vmul.f32 %v1264_v22, %v1264_v22 }
 0x12f   : > { %v551_v28 = vadd.f32 %v897_v26, %v833_v10  ;;  %v545_v29 = vpop.f32.mrb[3].mxu0  ;;  %v591_v30 = vadd.f32 %v909_v27, %v833_v10  ;;  %v585_v31 = vpop.f32.mrb[3].mxu1 }
 0x130   : > { %v668_v32 = vadd.f32 %v653_v23, %v652_v25  ;;  %v546_v33 = vadd.f32 %v833_v10, %v545_v29  ;;  %v586_v34 = vadd.f32 %v833_v10, %v585_v31 }
 0x131   : > { %617 = vst [vmem:[%s1260_s22 + $0x18] sm:$0xff] %v551_v28  ;;  %625 = vst [vmem:[%s1260_s22 + $0x58] sm:$0xff] %v591_v30  ;;  %v655_v39 = vmul.f32 %v551_v28, %v551_v28  ;;  %v663_v14 = vmul.f32 %v591_v30, %v591_v30 }
 0x132   : > { %616 = vst [vmem:[%s1260_s22 + $0x10] sm:$0xff] %v546_v33  ;;  %v631_v35 = vadd.f32 %v630_v24, %v546_v33  ;;  %v654_v36 = vmul.f32 %v546_v33, %v546_v33  ;;  %v900_v37 = vpop.f32.mrb[4].mxu0  ;;  %624 = vst [vmem:[%s1260_s22 + $0x50] sm:$0xff] %v586_v34  ;;  %v912_v38 = vpop.f32.mrb[4].mxu1  ;;  %v662_v11 = vmul.f32 %v586_v34, %v586_v34 }
 0x133   : > { %v561_v40 = vadd.f32 %v900_v37, %v833_v10  ;;  %v555_v41 = vpop.f32.mrb[5].mxu0  ;;  %v601_v42 = vadd.f32 %v912_v38, %v833_v10  ;;  %v595_v43 = vpop.f32.mrb[5].mxu1 }
 0x134   : > { %v669_v44 = vadd.f32 %v668_v32, %v654_v36  ;;  %v556_v45 = vadd.f32 %v833_v10, %v555_v41  ;;  %v632_v46 = vadd.f32 %v631_v35, %v551_v28  ;;  %v596_v47 = vadd.f32 %v833_v10, %v595_v43 }
 0x135   : > { %619 = vst [vmem:[%s1260_s22 + $0x28] sm:$0xff] %v561_v40  ;;  %627 = vst [vmem:[%s1260_s22 + $0x68] sm:$0xff] %v601_v42  ;;  %v657_v53 = vmul.f32 %v561_v40, %v561_v40  ;;  %v665_v20 = vmul.f32 %v601_v42, %v601_v42 }
 0x136   : > { %618 = vst [vmem:[%s1260_s22 + $0x20] sm:$0xff] %v556_v45  ;;  %v633_v48 = vadd.f32 %v632_v46, %v556_v45  ;;  %v656_v49 = vmul.f32 %v556_v45, %v556_v45  ;;  %v670_v50 = vadd.f32 %v669_v44, %v655_v39  ;;  %v903_v51 = vpop.f32.mrb[6].mxu0  ;;  %626 = vst [vmem:[%s1260_s22 + $0x60] sm:$0xff] %v596_v47  ;;  %v915_v52 = vpop.f32.mrb[6].mxu1 }
 0x137   : > { %v571_v54 = vadd.f32 %v903_v51, %v833_v10  ;;  %v565_v55 = vpop.f32.mrb[7].mxu0  ;;  %v611_v56 = vadd.f32 %v915_v52, %v833_v10  ;;  %v605_v57 = vpop.f32.mrb[7].mxu1  ;;  %v664_v16 = vmul.f32 %v596_v47, %v596_v47 }
 0x138   : > { %v671_v58 = vadd.f32 %v670_v50, %v656_v49  ;;  %v566_v59 = vadd.f32 %v833_v10, %v565_v55  ;;  %v634_v60 = vadd.f32 %v633_v48, %v561_v40  ;;  %v606_v61 = vadd.f32 %v833_v10, %v605_v57 }
 0x139   : > { %621 = vst [vmem:[%s1260_s22 + $0x38] sm:$0xff] %v571_v54  ;;  %629 = vst [vmem:[%s1260_s22 + $0x78] sm:$0xff] %v611_v56  ;;  %v659_v1 = vmul.f32 %v571_v54, %v571_v54  ;;  %v667_v26 = vmul.f32 %v611_v56, %v611_v56 }
 0x13a   : > { %620 = vst [vmem:[%s1260_s22 + $0x30] sm:$0xff] %v566_v59  ;;  %v635_v62 = vadd.f32 %v634_v60, %v566_v59  ;;  %v658_v63 = vmul.f32 %v566_v59, %v566_v59  ;;  %v672_v0 = vadd.f32 %v671_v58, %v657_v53  ;;  %628 = vst [vmem:[%s1260_s22 + $0x70] sm:$0xff] %v606_v61 }
 0x13b   : > { %v666_v23 = vmul.f32 %v606_v61, %v606_v61 }
 0x13c   : > { %v673_v2 = vadd.f32 %v672_v0, %v658_v63  ;;  %v636_v3 = vadd.f32 %v635_v62, %v571_v54 }
 0x13e   : > { %v637_v5 = vadd.f32 %v636_v3, %v1264_v22  ;;  %v674_v6 = vadd.f32 %v673_v2, %v659_v1 }
 0x140   : > { %v675_v8 = vadd.f32 %v674_v6, %v660_v4  ;;  %v638_v9 = vadd.f32 %v637_v5, %v1262_v19 }
 0x142   : > { %v639_v12 = vadd.f32 %v638_v9, %v586_v34  ;;  %v676_v13 = vadd.f32 %v675_v8, %v661_v7 }
 0x144   : > { %v677_v10 = vadd.f32 %v676_v13, %v662_v11  ;;  %v640_v15 = vadd.f32 %v639_v12, %v591_v30 }
 0x146   : > { %v641_v17 = vadd.f32 %v640_v15, %v596_v47  ;;  %v678_v18 = vadd.f32 %v677_v10, %v663_v14 }
 0x148   : > { %v679_v21 = vadd.f32 %v678_v18, %v664_v16  ;;  %v642_v22 = vadd.f32 %v641_v17, %v601_v42 }
 0x14a   : > { %v643_v24 = vadd.f32 %v642_v22, %v606_v61  ;;  %v680_v25 = vadd.f32 %v679_v21, %v665_v20 }
 0x14c   : > { %v644_v27 = vadd.f32 %v643_v24, %v611_v56  ;;  %v681_v19 = vadd.f32 %v680_v25, %v666_v23 }
 0x14e   : > { %v645_v28 = vrot.slane %v644_v27, 4  ;;  %v682_v29 = vadd.f32 %v681_v19, %v667_v26 }
 0x150   : > { %v646_v31 = vadd.f32 %v645_v28, %v644_v27  ;;  %v683_v32 = vrot.slane %v682_v29, 4 }
 0x152   : > { %v647_v33 = vrot.slane %v646_v31, 2  ;;  %v684_v30 = vadd.f32 %v683_v32, %v682_v29 }
 0x154   : > { %v648_v34 = vadd.f32 %v647_v33, %v646_v31  ;;  %v685_v35 = vrot.slane %v684_v30, 2 }
 0x156   : > { %v649_v36 = vrot.slane %v648_v34, 1  ;;  %v686_v37 = vadd.f32 %v685_v35, %v684_v30 }
 0x158   : > { %v650_v38 = vadd.f32 %v649_v36, %v648_v34  ;;  %v687_v39 = vrot.slane %v686_v37, 1 }
 0x15a   : > { %651 = vst [vmem:[%s323_s29] sm:$0x1] %v650_v38  ;;  %v688_v40 = vadd.f32 %v687_v39, %v686_v37 }
 0x15c   : > { %689 = vst [vmem:[%s326_s27] sm:$0x1] %v688_v40 }
 0x15d PF: > { %s20_s24 = sadd.s32 1, %s1041_s24  }
 0x15e   : > { %p17_p10 = scmp.ge.s32.totalorder %s20_s24, 6  }
 0x160   :  { %19 = sbr.rel (!%p17_p10) target bundleno = 2 (0x2), region = 103 }
 0x167   :  { %736 = vsyncpa [#allocation3], 1 }
 0x168   :  { %738 = vsyncpa [#allocation3 + $0x1], 1 }
 0x169   :  { %739 = vsyncpa [#allocation5], 1 }

// kernel: t_net_forward.4
= control target key start
LH: loop header
LB: loop body
LE: loop exit
PB: predicated region body
PF: predicated region fallthrough
CT: control target
= control target key end

     0   :  { %11 = vsyncpa [#allocation3], 0  ;;  %s1345_s0 = inlined_call_operand.vmem [shape: f32[512,3], index: 0, kind: input, shape index: {}]   ;;  %s1346_s1 = inlined_call_operand.hbm [shape: f32[3,64], index: 1, kind: input, shape index: {}]   ;;  %s1347_s2 = inlined_call_operand.hbm [shape: f32[1,64], index: 2, kind: input, shape index: {}]   ;;  %s1348_s3 = inlined_call_operand.vmem [shape: f32[512,64], index: 3, kind: output, shape index: {0}]   ;;  %s1349_s4 = inlined_call_operand.vmem [shape: f32[4,1,64], index: 4, kind: output, shape index: {1}]   ;;  %s1350_s5 = inlined_call_operand.vmem [shape: f32[4,1,64], index: 5, kind: output, shape index: {2}]  }
   0x1   :  { %12 = vsyncpa [#allocation5], 0  ;;  %s1012_s18 = smov 0  }
   0x2 LB: > { %s1018_s19 = sadd.s32 4294967295, %s975_s18   ;;  %p851_p0 = scmp.ge.s32.totalorder %s975_s18, 1  ;;  %s975_s18 = sphi %s1012_s18, %s18_s18  }
   0x3   : > { %p169_p1 = scmp.lt.s32.totalorder %s975_s18, 5  ;;  %p1351_p2 = scmp.eq.s32.totalorder %s1018_s19, 0 }
   0x4   : > { %s977_s21 = smov [#allocation2]   ;;  %s978_s23 = smov [#allocation4]  }
   0x5   : > { %p1023_p3 = pnand %p851_p0, %p169_p1  ;;  %s182_s22 = sshll.u32 %s977_s21, 4  ;;  %s183_s22 = int_to_ptr.vmem [resolvable:$true] %s182_s22 }
   0x6   : > { %s193_s24 = sshll.u32 %s978_s23, 4  ;;  %s905_s28 = scalar_lea.hbm %s1346_s1, 64  ;;  %s1035_s24 = int_to_ptr.vmem [resolvable:$true] %s193_s24 }
   0x7   : > { %s1353_s20 = scalar_select %p1023_p3, 1, 0 }
   0x8   : > { %p873_p4 = pneg %p1023_p3  ;;  %p906_p6 = scmp.ne.s32.totalorder %s1346_s1, %s905_s28 }
   0x9   : > { %p912_p10 = scmp.lt.u32.totalorder %s905_s28, %s1346_s1 }
   0xa   : > { %p1031_p5 = pnand %p1351_p2, %p873_p4 }
   0xc   : > { %p907_p7 = pneg %p1031_p5 }
   0xe   : > { %p908_p8 = pnand %p907_p7, %p906_p6 }
  0x10   : > { %p909_p9 = pneg %p908_p8 }
  0x12   : > { %p914_p11 = pnand %p912_p10, %p909_p9 }
  0x14   : > { %917 = shalt.err (!%p914_p11)
}
  0x15   : > { %s918_s8 = scalar_lea.vmem %s183_s22, 64  ;;  %p926_p1 = scmp.lt.s32.totalorder %s183_s22, %s183_s22 }
  0x16   : > { %p919_p12 = scmp.ne.s32.totalorder %s183_s22, %s918_s8  ;;  %p927_p4 = scmp.lt.s32.totalorder %s918_s8, %s918_s8 }
  0x18   : > { %p921_p13 = pnand %p919_p12, %p907_p7  ;;  %p928_p2 = por %p927_p4, %p926_p1 }
  0x1a   : > { %p922_p0 = pneg %p921_p13 }
  0x1c   : > { %p929_p3 = pnand %p928_p2, %p922_p0 }
  0x1e   : > { %932 = shalt.err (!%p929_p3)
}
  0x1f   : > { %876 = dma.hbm_to_vmem [thread:$0]  (!%p1031_p5), %s1346_s1, 64, %s183_s22, [#allocation3]  }
  0x20   : > { %s933_s13 = scalar_lea.hbm %s1347_s2, 16 }
  0x21   : > { %p934_p6 = scmp.ne.s32.totalorder %s1347_s2, %s933_s13  ;;  %p940_p3 = scmp.lt.u32.totalorder %s933_s13, %s1347_s2 }
  0x23   : > { %p936_p8 = pnand %p934_p6, %p907_p7 }
  0x25   : > { %p937_p2 = pneg %p936_p8 }
  0x27   : > { %p942_p9 = pnand %p940_p3, %p937_p2 }
  0x29   : > { %945 = shalt.err (!%p942_p9)
}
  0x2a   : > { %s946_s21 = scalar_lea.vmem %s1035_s24, 16  ;;  %s953_s22 = scalar_lea.vmem %s1035_s24, 32 }
  0x2b   : > { %p947_p10 = scmp.ne.s32.totalorder %s1035_s24, %s946_s21  ;;  %p954_p13 = scmp.lt.s32.totalorder %s1035_s24, %s1035_s24 }
  0x2c   : > { %p955_p0 = scmp.lt.s32.totalorder %s953_s22, %s946_s21 }
  0x2d   : > { %p949_p11 = pnand %p947_p10, %p907_p7 }
  0x2e   : > { %p956_p1 = por %p955_p0, %p954_p13 }
  0x2f   : > { %p950_p12 = pneg %p949_p11 }
  0x31   : > { %p957_p4 = pnand %p956_p1, %p950_p12 }
  0x33   : > { %960 = shalt.err (!%p957_p4)
}
  0x34   : > { %879 = dma.hbm_to_vmem [thread:$0]  (!%p1031_p5), %s1347_s2, 16, %s1035_s24, [#allocation5]  }
  0x35   : > { %p1355_p6 = scmp.ne.s32.totalorder %s1353_s20, 0 }
  0x36   : > { %p1356_p7 = scmp.eq.s32.totalorder (!%p1355_p6), %s1018_s19, 0 }
  0x37   : > { %215 = sbr.rel (%p1355_p6) target bundleno = 325 (0x145), region = 32 }
  0x3e   : > { %966 = dma.done.wait (%p1356_p7), [#allocation3], 64   ;;  %p1357_p8 = pmov %p1356_p7 }
  0x3f   : > { %p1358_p2 = pmov %p1356_p7 }
  0x40   : > { %968 = vsyncadd (%p1357_p8), [#allocation3], 4294967232 }
  0x41   : > { %970 = dma.done.wait (%p1358_p2), [#allocation5], 16   ;;  %p1359_p3 = pmov %p1358_p2 }
  0x42   : > { %s858_s25 = sshll.u32 %s1018_s19, 4  ;;  %v979_v0 = vmov 0   ;;  %v980_v17 = vmov 1   ;;  %v981_v18 = vmov 2   ;;  %v368_v31 = vlaneseq  ;;  %v287_v38 = vld [vmem:[#allocation2] sm:$0x7] }
  0x43   : > { %972 = vsyncadd (%p1359_p3), [#allocation5], 4294967280  ;;  %898 = vset.pattern.permute.xlu1 %v979_v0  ;;  %897 = vset.pattern.permute.xlu0 %v979_v0  ;;  %p254_p5 = scmp.lt.s32.totalorder %s858_s25, 63  ;;  %v1138_v55 = vld [vmem:[#allocation4] ss:$0 sm:$0xff]  ;;  %vm611_vm0 = vcmask 523264  }
  0x44   : > { %v369_v34 = vshrl.u32 %v368_v31, 7  ;;  %p265_p9 = scmp.lt.s32.totalorder %s1018_s19, 3  ;;  %vm665_vm1 = vcmask 516096  }
  0x45   : > { %s1361_s25 = smov (!%p254_p5, %s858_s25), 63 }
  0x46   : > { %s859_s20 = sshll.u32 %s1361_s25, 3  ;;  %v454_v35 = vsub.s32 1, %v369_v34  ;;  %v370_v39 = vsub.s32 0, %v369_v34  ;;  %v554_v41 = vsub.s32 2, %v369_v34  ;;  %s1363_s19 = smov (!%p265_p9, %s1018_s19), 3 }
  0x47   : > { %s257_s28 = scalar_lea.vmem %s1345_s0, %s859_s20  ;;  %s1146_s6 = scalar_lea.vmem %s1348_s3, %s859_s20 }
  0x48   : > { %v273_v1 = vld [vmem:[%s257_s28 + $0x10] sm:$0xff]  ;;  %v271_v2 = vld [vmem:[%s257_s28] sm:$0xff]  ;;  %v274_v3 = vld [vmem:[%s257_s28 + $0x18] sm:$0xff]  ;;  %v1126_v40 = vrot.slane %v287_v38, %v454_v35  ;;  %v1128_v44 = vrot.slane %v287_v38, %v370_v39  ;;  %v1131_v46 = vrot.slane %v287_v38, %v554_v41  ;;  %s267_s9 = scalar_lea.vmem %s1349_s4, %s1363_s19  ;;  %s270_s12 = scalar_lea.vmem %s1350_s5, %s1363_s19 }
  0x49   : > { %300 = vperm.xlu1 %898, %v273_v1   ;;  %290 = vperm.xlu0 %897, %v271_v2   ;;  %v272_v4 = vld [vmem:[%s257_s28 + $0x8] sm:$0xff]  ;;  %v275_v6 = vld [vmem:[%s257_s28 + $0x20] sm:$0xff]  ;;  %v278_v7 = vld [vmem:[%s257_s28 + $0x38] sm:$0xff] }
  0x4a   : > { %v276_v5 = vld [vmem:[%s257_s28 + $0x28] sm:$0xff]  ;;  %v277_v8 = vld [vmem:[%s257_s28 + $0x30] sm:$0xff]  ;;  %v279_v10 = vld [vmem:[%s257_s28 + $0x40] sm:$0xff] }
  0x4b   : > { %v280_v9 = vld [vmem:[%s257_s28 + $0x48] sm:$0xff]  ;;  %v282_v11 = vld [vmem:[%s257_s28 + $0x58] sm:$0xff]  ;;  %v281_v12 = vld [vmem:[%s257_s28 + $0x50] sm:$0xff] }
  0x4c   : > { %v284_v13 = vld [vmem:[%s257_s28 + $0x68] sm:$0xff]  ;;  %v283_v14 = vld [vmem:[%s257_s28 + $0x60] sm:$0xff]  ;;  %v286_v15 = vld [vmem:[%s257_s28 + $0x78] sm:$0xff] }
  0x4d   : > { %305 = vperm.xlu1 %898, %v274_v3   ;;  %295 = vperm.xlu0 %897, %v272_v4   ;;  %v285_v16 = vld [vmem:[%s257_s28 + $0x70] sm:$0xff] }
  0x51   : > { %315 = vperm.xlu1 %898, %v276_v5   ;;  %310 = vperm.xlu0 %897, %v275_v6  }
  0x55   : > { %325 = vperm.xlu1 %898, %v278_v7   ;;  %320 = vperm.xlu0 %897, %v277_v8  }
  0x59   : > { %335 = vperm.xlu1 %898, %v280_v9   ;;  %330 = vperm.xlu0 %897, %v279_v10  }
  0x5d   : > { %345 = vperm.xlu1 %898, %v282_v11   ;;  %340 = vperm.xlu0 %897, %v281_v12  }
  0x61   : > { %355 = vperm.xlu1 %898, %v284_v13   ;;  %350 = vperm.xlu0 %897, %v283_v14  }
  0x65   : > { %365 = vperm.xlu1 %898, %v286_v15   ;;  %360 = vperm.xlu0 %897, %v285_v16  }
  0x69   : > { %900 = vset.pattern.permute.xlu1 %v980_v17  ;;  %899 = vset.pattern.permute.xlu0 %v980_v17 }
  0x6a   : > { %393 = vperm.xlu1 %900, %v272_v4   ;;  %389 = vperm.xlu0 %899, %v271_v2  }
  0x6e   : > { %397 = vperm.xlu1 %900, %v273_v1   ;;  %901 = vset.pattern.permute.xlu0 %v981_v18 }
  0x6f   : > { %489 = vperm.xlu0 %901, %v271_v2  }
  0x72   : > { %902 = vset.pattern.permute.xlu1 %v981_v18 }
  0x73   : > { %493 = vperm.xlu1 %902, %v272_v4   ;;  %497 = vperm.xlu0 %901, %v273_v1  }
  0x77   : > { %903 = vset.pattern.permute.xlu1 %v980_v17  ;;  %501 = vperm.xlu0 %901, %v274_v3  }
  0x78   : > { %401 = vperm.xlu1 %903, %v274_v3  }
  0x7b   : > { %505 = vperm.xlu0 %901, %v275_v6  }
  0x7c   : > { %405 = vperm.xlu1 %903, %v275_v6  }
  0x7f   : > { %509 = vperm.xlu0 %901, %v276_v5  }
  0x80   : > { %409 = vperm.xlu1 %903, %v276_v5  }
  0x83   : > { %513 = vperm.xlu0 %901, %v277_v8  }
  0x84   : > { %413 = vperm.xlu1 %903, %v277_v8  }
  0x87   : > { %517 = vperm.xlu0 %901, %v278_v7  }
  0x88   : > { %417 = vperm.xlu1 %903, %v278_v7  }
  0x8b   : > { %521 = vperm.xlu0 %901, %v279_v10  }
  0x8c   : > { %421 = vperm.xlu1 %903, %v279_v10  }
  0x8f   : > { %525 = vperm.xlu0 %901, %v280_v9  }
  0x90   : > { %425 = vperm.xlu1 %903, %v280_v9  }
  0x93   : > { %529 = vperm.xlu0 %901, %v281_v12  }
  0x94   : > { %429 = vperm.xlu1 %903, %v281_v12  }
  0x97   : > { %533 = vperm.xlu0 %901, %v282_v11  }
  0x98   : > { %433 = vperm.xlu1 %903, %v282_v11  }
  0x9b   : > { %537 = vperm.xlu0 %901, %v283_v14  }
  0x9c   : > { %437 = vperm.xlu1 %903, %v283_v14  }
  0x9f   : > { %541 = vperm.xlu0 %901, %v284_v13  }
  0xa0   : > { %441 = vperm.xlu1 %903, %v284_v13  }
  0xa3   : > { %545 = vperm.xlu0 %901, %v285_v16  }
  0xa4   : > { %445 = vperm.xlu1 %903, %v285_v16  }
  0xa8   : > { %449 = vperm.xlu1 %903, %v286_v15  }
  0xac   : > { %904 = vset.pattern.permute.xlu1 %v981_v18 }
  0xad   : > { %549 = vperm.xlu1 %904, %v286_v15  }
  0xc8   : > { %v301_v19 = vpop.permute.xlu1 %300  ;;  %v291_v20 = vpop.permute.xlu0 %290 }
  0xc9   : > { %v372_v47 = vmul.f32 %v1128_v44, %v291_v20  ;;  %v374_v56 = vmul.f32 %v1128_v44, %v301_v19 }
  0xcc   : > { %v306_v21 = vpop.permute.xlu1 %305  ;;  %v296_v22 = vpop.permute.xlu0 %295 }
  0xcd   : > { %v373_v54 = vmul.f32 %v1128_v44, %v296_v22  ;;  %v375_v7 = vmul.f32 %v1128_v44, %v306_v21 }
  0xd0   : > { %v1104_v23 = vpop.permute.xlu1 %315  ;;  %v311_v24 = vpop.permute.xlu0 %310 }
  0xd1   : > { %v376_v13 = vmul.f32 %v1128_v44, %v311_v24  ;;  %v377_v21 = vmul.f32 %v1128_v44, %v1104_v23 }
  0xd4   : > { %v1106_v25 = vpop.permute.xlu1 %325  ;;  %v1108_v26 = vpop.permute.xlu0 %320 }
  0xd5   : > { %v378_v41 = vmul.f32 %v1128_v44, %v1108_v26 }
  0xd8   : > { %v1110_v27 = vpop.permute.xlu1 %335  ;;  %v1112_v28 = vpop.permute.xlu0 %330 }
  0xdc   : > { %v1114_v29 = vpop.permute.xlu1 %345  ;;  %v1116_v30 = vpop.permute.xlu0 %340 }
  0xe0   : > { %v1118_v32 = vpop.permute.xlu1 %355  ;;  %v1120_v33 = vpop.permute.xlu0 %350 }
  0xe4   : > { %v1122_v36 = vpop.permute.xlu1 %365  ;;  %v1124_v37 = vpop.permute.xlu0 %360 }
  0xe9   : > { %v394_v42 = vpop.permute.xlu1 %393  ;;  %v390_v43 = vpop.permute.xlu0 %389 }
  0xea   : > { %v456_v45 = vmul.f32 %v1126_v40, %v390_v43  ;;  %v457_v49 = vmul.f32 %v1126_v40, %v394_v42 }
  0xec   : > { %v472_v51 = vadd.f32 %v456_v45, %v372_v47  ;;  %v473_v58 = vadd.f32 %v457_v49, %v373_v54 }
  0xed   : > { %v398_v48 = vpop.permute.xlu1 %397 }
  0xee   : > { %v490_v50 = vpop.permute.xlu0 %489  ;;  %v458_v52 = vmul.f32 %v1126_v40, %v398_v48 }
  0xef   : > { %v556_v53 = vmul.f32 %v1131_v46, %v490_v50  ;;  %v379_v50 = vmul.f32 %v1128_v44, %v1106_v25 }
  0xf0   : > { %v474_v61 = vadd.f32 %v458_v52, %v374_v56 }
  0xf1   : > { %v572_v57 = vadd.f32 %v556_v53, %v472_v51 }
  0xf2   : > { %v494_v59 = vpop.permute.xlu1 %493  ;;  %v498_v60 = vpop.permute.xlu0 %497 }
  0xf3   : > { %v1149_v62 = vadd.f32 %v1138_v55, %v572_v57  ;;  %v557_v63 = vmul.f32 %v1131_v46, %v494_v59  ;;  %v558_v0 = vmul.f32 %v1131_v46, %v498_v60 }
  0xf5   : > { %612 = vst.msk [vmem:[%s1146_s6] sm:$0xff] %vm611_vm0, %v1149_v62  ;;  %v573_v1 = vadd.f32 %v557_v63, %v473_v58  ;;  %v574_v2 = vadd.f32 %v558_v0, %v474_v61  ;;  %v380_v58 = vmul.f32 %v1128_v44, %v1112_v28 }
  0xf6   : > { %v502_v3 = vpop.permute.xlu0 %501 }
  0xf7   : > { %v596_v4 = vadd.f32 %v1138_v55, %v573_v1  ;;  %v1158_v5 = vadd.f32 %v1138_v55, %v574_v2  ;;  %v402_v6 = vpop.permute.xlu1 %401  ;;  %v559_v9 = vmul.f32 %v1131_v46, %v502_v3  ;;  %v381_v2 = vmul.f32 %v1128_v44, %v1110_v27 }
  0xf8   : > { %v459_v8 = vmul.f32 %v1126_v40, %v402_v6  ;;  %v382_v27 = vmul.f32 %v1128_v44, %v1116_v30 }
  0xf9   : > { %613 = vst.msk [vmem:[%s1146_s6 + $0x8] sm:$0xff] %vm611_vm0, %v596_v4  ;;  %614 = vst.msk [vmem:[%s1146_s6 + $0x10] sm:$0xff] %vm611_vm0, %v1158_v5  ;;  %v668_v3 = vmul.f32 %v596_v4, %v596_v4 }
  0xfa   : > { %v475_v10 = vadd.f32 %v459_v8, %v375_v7  ;;  %v506_v11 = vpop.permute.xlu0 %505  ;;  %v667_v7 = vmul.f32 %v1149_v62, %v1149_v62  ;;  %v629_v8 = vsel %vm611_vm0, %v596_v4, 0.0 }
  0xfb   : > { %v406_v12 = vpop.permute.xlu1 %405  ;;  %v560_v17 = vmul.f32 %v1131_v46, %v506_v11 }
  0xfc   : > { %v575_v14 = vadd.f32 %v559_v9, %v475_v10  ;;  %v460_v15 = vmul.f32 %v1126_v40, %v406_v12 }
  0xfe   : > { %v1171_v16 = vadd.f32 %v1138_v55, %v575_v14  ;;  %v476_v18 = vadd.f32 %v460_v15, %v376_v13  ;;  %v510_v19 = vpop.permute.xlu0 %509  ;;  %v628_v14 = vsel %vm611_vm0, %v1149_v62, 0.0  ;;  %v684_v15 = vsel %vm611_vm0, %v668_v3, 0.0 }
  0xff   : > { %v410_v20 = vpop.permute.xlu1 %409  ;;  %v561_v34 = vmul.f32 %v1131_v46, %v510_v19  ;;  %v669_v19 = vmul.f32 %v1158_v5, %v1158_v5 }
 0x100   : > { %615 = vst.msk [vmem:[%s1146_s6 + $0x18] sm:$0xff] %vm611_vm0, %v1171_v16  ;;  %v576_v22 = vadd.f32 %v560_v17, %v476_v18  ;;  %v461_v24 = vmul.f32 %v1126_v40, %v410_v20  ;;  %v630_v18 = vadd.f32 %v629_v8, %v628_v14  ;;  %v670_v30 = vmul.f32 %v1171_v16, %v1171_v16 }
 0x101   : > { %v683_v20 = vsel %vm611_vm0, %v667_v7, 0.0 }
 0x102   : > { %v1181_v31 = vadd.f32 %v1138_v55, %v576_v22  ;;  %v477_v35 = vadd.f32 %v461_v24, %v377_v21  ;;  %v514_v38 = vpop.permute.xlu0 %513 }
 0x103   : > { %v414_v39 = vpop.permute.xlu1 %413  ;;  %v562_v45 = vmul.f32 %v1131_v46, %v514_v38 }
 0x104   : > { %616 = vst.msk [vmem:[%s1146_s6 + $0x20] sm:$0xff] %vm611_vm0, %v1181_v31  ;;  %v577_v23 = vadd.f32 %v561_v34, %v477_v35  ;;  %v462_v42 = vmul.f32 %v1126_v40, %v414_v39  ;;  %v383_v34 = vmul.f32 %v1128_v44, %v1114_v29  ;;  %v685_v35 = vadd.f32 %v684_v15, %v683_v20 }
 0x105   : > { %v671_v38 = vmul.f32 %v1181_v31, %v1181_v31  ;;  %v686_v29 = vsel %vm611_vm0, %v669_v19, 0.0 }
 0x106   : > { %v1191_v43 = vadd.f32 %v1138_v55, %v577_v23  ;;  %v478_v47 = vadd.f32 %v462_v42, %v378_v41  ;;  %v518_v48 = vpop.permute.xlu0 %517  ;;  %v631_v41 = vsel %vm611_vm0, %v1158_v5, 0.0  ;;  %v633_v23 = vsel %vm611_vm0, %v1171_v16, 0.0 }
 0x107   : > { %v418_v49 = vpop.permute.xlu1 %417  ;;  %v563_v53 = vmul.f32 %v1131_v46, %v518_v48  ;;  %v688_v48 = vsel %vm611_vm0, %v670_v30, 0.0  ;;  %v635_v5 = vsel %vm611_vm0, %v1181_v31, 0.0 }
 0x108   : > { %617 = vst.msk [vmem:[%s1146_s6 + $0x28] sm:$0xff] %vm611_vm0, %v1191_v43  ;;  %v578_v26 = vadd.f32 %v562_v45, %v478_v47  ;;  %v463_v51 = vmul.f32 %v1126_v40, %v418_v49  ;;  %v632_v47 = vadd.f32 %v631_v41, %v630_v18  ;;  %v672_v49 = vmul.f32 %v1191_v43, %v1191_v43 }
 0x10a   : > { %v1201_v52 = vadd.f32 %v1138_v55, %v578_v26  ;;  %v479_v54 = vadd.f32 %v463_v51, %v379_v50  ;;  %v522_v56 = vpop.permute.xlu0 %521 }
 0x10b   : > { %v422_v57 = vpop.permute.xlu1 %421  ;;  %v564_v61 = vmul.f32 %v1131_v46, %v522_v56  ;;  %v634_v56 = vadd.f32 %v633_v23, %v632_v47 }
 0x10c   : > { %618 = vst.msk [vmem:[%s1146_s6 + $0x30] sm:$0xff] %vm611_vm0, %v1201_v52  ;;  %v579_v25 = vadd.f32 %v563_v53, %v479_v54  ;;  %v464_v59 = vmul.f32 %v1126_v40, %v422_v57  ;;  %v384_v53 = vmul.f32 %v1128_v44, %v1120_v33  ;;  %v687_v54 = vadd.f32 %v686_v29, %v685_v35 }
 0x10d   : > { %v690_v57 = vsel %vm611_vm0, %v671_v38, 0.0  ;;  %v673_v31 = vmul.f32 %v1201_v52, %v1201_v52  ;;  %v692_v33 = vsel %vm611_vm0, %v672_v49, 0.0 }
 0x10e   : > { %v1211_v60 = vadd.f32 %v1138_v55, %v579_v25  ;;  %v480_v63 = vadd.f32 %v464_v59, %v380_v58  ;;  %v526_v0 = vpop.permute.xlu0 %525  ;;  %v637_v25 = vsel %vm611_vm0, %v1191_v43, 0.0 }
 0x10f   : > { %v426_v1 = vpop.permute.xlu1 %425  ;;  %v565_v10 = vmul.f32 %v1131_v46, %v526_v0  ;;  %v636_v0 = vadd.f32 %v635_v5, %v634_v56 }
 0x110   : > { %619 = vst.msk [vmem:[%s1146_s6 + $0x38] sm:$0xff] %vm611_vm0, %v1211_v60  ;;  %v580_v28 = vadd.f32 %v564_v61, %v480_v63  ;;  %v465_v6 = vmul.f32 %v1126_v40, %v426_v1  ;;  %v689_v63 = vadd.f32 %v688_v48, %v687_v54  ;;  %v639_v1 = vsel %vm611_vm0, %v1201_v52, 0.0 }
 0x111   : > { %v638_v8 = vadd.f32 %v637_v25, %v636_v0  ;;  %v641_v15 = vsel %vm611_vm0, %v1211_v60, 0.0 }
 0x112   : > { %v1224_v9 = vadd.f32 %v1138_v55, %v580_v28  ;;  %v481_v11 = vadd.f32 %v465_v6, %v381_v2  ;;  %v530_v12 = vpop.permute.xlu0 %529  ;;  %v674_v2 = vmul.f32 %v1211_v60, %v1211_v60  ;;  %v691_v7 = vadd.f32 %v690_v57, %v689_v63 }
 0x113   : > { %v430_v13 = vpop.permute.xlu1 %429  ;;  %v566_v21 = vmul.f32 %v1131_v46, %v530_v12  ;;  %v694_v12 = vsel %vm611_vm0, %v673_v31, 0.0  ;;  %v640_v14 = vadd.f32 %v639_v1, %v638_v8  ;;  %v386_v60 = vmul.f32 %v1128_v44, %v1124_v37 }
 0x114   : > { %620 = vst.msk [vmem:[%s1146_s6 + $0x40] sm:$0xff] %vm611_vm0, %v1224_v9  ;;  %v581_v4 = vadd.f32 %v565_v10, %v481_v11  ;;  %v466_v17 = vmul.f32 %v1126_v40, %v430_v13  ;;  %v385_v11 = vmul.f32 %v1128_v44, %v1118_v32  ;;  %v693_v13 = vadd.f32 %v692_v33, %v691_v7 }
 0x115   : > { %v643_v20 = vsel %vm611_vm0, %v1224_v9, 0.0 }
 0x116   : > { %v1242_v62 = vadd.f32 %v1138_v55, %v581_v4  ;;  %v482_v22 = vadd.f32 %v466_v17, %v382_v27  ;;  %v534_v24 = vpop.permute.xlu0 %533  ;;  %v675_v4 = vmul.f32 %v1224_v9, %v1224_v9  ;;  %v696_v17 = vsel %vm611_vm0, %v674_v2, 0.0 }
 0x117   : > { %v434_v39 = vpop.permute.xlu1 %433  ;;  %v567_v50 = vmul.f32 %v1131_v46, %v534_v24  ;;  %v695_v30 = vadd.f32 %v694_v12, %v693_v13 }
 0x118   : > { %621 = vst.msk [vmem:[%s1146_s6 + $0x48] sm:$0xff] %vm611_vm0, %v1242_v62  ;;  %v582_v42 = vadd.f32 %v566_v21, %v482_v22  ;;  %v467_v45 = vmul.f32 %v1126_v40, %v434_v39  ;;  %v676_v21 = vmul.f32 %v1242_v62, %v1242_v62  ;;  %v698_v41 = vsel %vm611_vm0, %v675_v4, 0.0 }
 0x119   : > { %v697_v39 = vadd.f32 %v696_v17, %v695_v30  ;;  %v645_v9 = vsel %vm611_vm0, %v1242_v62, 0.0 }
 0x11a   : > { %v605_v16 = vadd.f32 %v1138_v55, %v582_v42  ;;  %v483_v26 = vadd.f32 %v467_v45, %v383_v34  ;;  %v538_v51 = vpop.permute.xlu0 %537  ;;  %v642_v34 = vadd.f32 %v641_v15, %v640_v14  ;;  %v700_v29 = vsel %vm611_vm0, %v676_v21, 0.0 }
 0x11b   : > { %v438_v58 = vpop.permute.xlu1 %437  ;;  %v568_v3 = vmul.f32 %v1131_v46, %v538_v51 }
 0x11c   : > { %622 = vst.msk [vmem:[%s1146_s6 + $0x50] sm:$0xff] %vm611_vm0, %v605_v16  ;;  %v583_v59 = vadd.f32 %v567_v50, %v483_v26  ;;  %v468_v61 = vmul.f32 %v1126_v40, %v438_v58  ;;  %v677_v23 = vmul.f32 %v605_v16, %v605_v16  ;;  %v644_v42 = vadd.f32 %v643_v20, %v642_v34 }
 0x11d   : > { %v647_v48 = vsel %vm611_vm0, %v605_v16, 0.0  ;;  %v699_v50 = vadd.f32 %v698_v41, %v697_v39  ;;  %v387_v16 = vmul.f32 %v1128_v44, %v1122_v36 }
 0x11e   : > { %v606_v43 = vadd.f32 %v1138_v55, %v583_v59  ;;  %v484_v28 = vadd.f32 %v468_v61, %v384_v53  ;;  %v542_v6 = vpop.permute.xlu0 %541  ;;  %v646_v26 = vadd.f32 %v645_v9, %v644_v42  ;;  %v702_v53 = vsel %vm611_vm0, %v677_v23, 0.0 }
 0x11f   : > { %v442_v10 = vpop.permute.xlu1 %441  ;;  %v569_v18 = vmul.f32 %v1131_v46, %v542_v6  ;;  %v701_v57 = vadd.f32 %v700_v29, %v699_v50 }
 0x120   : > { %623 = vst.msk [vmem:[%s1146_s6 + $0x58] sm:$0xff] %vm611_vm0, %v606_v43  ;;  %v584_v52 = vadd.f32 %v568_v3, %v484_v28  ;;  %v469_v27 = vmul.f32 %v1126_v40, %v442_v10  ;;  %v678_v49 = vmul.f32 %v606_v43, %v606_v43  ;;  %v649_v54 = vsel %vm611_vm0, %v606_v43, 0.0 }
 0x121   : > { %v648_v58 = vadd.f32 %v647_v48, %v646_v26  ;;  %v703_v63 = vadd.f32 %v702_v53, %v701_v57 }
 0x122   : > { %v607_v32 = vadd.f32 %v1138_v55, %v584_v52  ;;  %v485_v19 = vadd.f32 %v469_v27, %v385_v11  ;;  %v546_v22 = vpop.permute.xlu0 %545  ;;  %v704_v31 = vsel %vm611_vm0, %v678_v49, 0.0 }
 0x123   : > { %v446_v24 = vpop.permute.xlu1 %445  ;;  %v570_v47 = vmul.f32 %v1131_v46, %v546_v22  ;;  %v650_v0 = vadd.f32 %v649_v54, %v648_v58  ;;  %v705_v36 = vadd.f32 %v704_v31, %v703_v63 }
 0x124   : > { %624 = vst.msk [vmem:[%s1146_s6 + $0x60] sm:$0xff] %vm611_vm0, %v607_v32  ;;  %v585_v35 = vadd.f32 %v569_v18, %v485_v19  ;;  %v470_v38 = vmul.f32 %v1126_v40, %v446_v24  ;;  %v679_v51 = vmul.f32 %v607_v32, %v607_v32  ;;  %v651_v59 = vsel %vm611_vm0, %v607_v32, 0.0 }
 0x125   : > { %v652_v44 = vadd.f32 %v651_v59, %v650_v0 }
 0x126   : > { %v608_v45 = vadd.f32 %v1138_v55, %v585_v35  ;;  %v486_v37 = vadd.f32 %v470_v38, %v386_v60  ;;  %v706_v33 = vsel %vm611_vm0, %v679_v51, 0.0 }
 0x127   : > { %v450_v5 = vpop.permute.xlu1 %449  ;;  %v707_v8 = vadd.f32 %v706_v33, %v705_v36 }
 0x128   : > { %625 = vst.msk [vmem:[%s1146_s6 + $0x68] sm:$0xff] %vm611_vm0, %v608_v45  ;;  %v586_v62 = vadd.f32 %v570_v47, %v486_v37  ;;  %v471_v56 = vmul.f32 %v1126_v40, %v450_v5  ;;  %v680_v61 = vmul.f32 %v608_v45, %v608_v45  ;;  %v653_v40 = vsel %vm611_vm0, %v608_v45, 0.0 }
 0x129   : > { %v654_v10 = vadd.f32 %v653_v40, %v652_v44 }
 0x12a   : > { %v609_v25 = vadd.f32 %v1138_v55, %v586_v62  ;;  %v487_v43 = vadd.f32 %v471_v56, %v387_v16  ;;  %v708_v28 = vsel %vm611_vm0, %v680_v61, 0.0 }
 0x12b   : > { %v709_v52 = vadd.f32 %v708_v28, %v707_v8 }
 0x12c   : > { %626 = vst.msk [vmem:[%s1146_s6 + $0x70] sm:$0xff] %vm611_vm0, %v609_v25  ;;  %v550_v1 = vpop.permute.xlu1 %549  ;;  %v681_v2 = vmul.f32 %v609_v25, %v609_v25  ;;  %v655_v6 = vsel %vm611_vm0, %v609_v25, 0.0 }
 0x12d   : > { %v571_v3 = vmul.f32 %v1131_v46, %v550_v1  ;;  %v656_v27 = vadd.f32 %v655_v6, %v654_v10 }
 0x12e   : > { %v710_v11 = vsel %vm611_vm0, %v681_v2, 0.0 }
 0x12f   : > { %v587_v7 = vadd.f32 %v571_v3, %v487_v43  ;;  %v711_v15 = vadd.f32 %v710_v11, %v709_v52 }
 0x131   : > { %v610_v12 = vadd.f32 %v1138_v55, %v587_v7 }
 0x133   : > { %627 = vst.msk [vmem:[%s1146_s6 + $0x78] sm:$0xff] %vm611_vm0, %v610_v12  ;;  %v657_v46 = vsel %vm611_vm0, %v610_v12, 0.0  ;;  %v682_v13 = vmul.f32 %v610_v12, %v610_v12 }
 0x134   : > { %v658_v14 = vadd.f32 %v657_v46, %v656_v27 }
 0x135   : > { %v712_v4 = vsel %vm611_vm0, %v682_v13, 0.0 }
 0x136   : > { %v659_v17 = vrot.slane %v658_v14, 4  ;;  %v713_v32 = vadd.f32 %v712_v4, %v711_v15 }
 0x138   : > { %v660_v18 = vadd.f32 %v659_v17, %v658_v14  ;;  %v714_v19 = vrot.slane %v713_v32, 4 }
 0x13a   : > { %v661_v30 = vrot.slane %v660_v18, 2  ;;  %v715_v20 = vadd.f32 %v714_v19, %v713_v32 }
 0x13c   : > { %v662_v55 = vadd.f32 %v661_v30, %v660_v18  ;;  %v716_v21 = vrot.slane %v715_v20, 2 }
 0x13e   : > { %v663_v22 = vrot.slane %v662_v55, 1  ;;  %v717_v24 = vadd.f32 %v716_v21, %v715_v20 }
 0x140   : > { %v664_v60 = vadd.f32 %v663_v22, %v662_v55  ;;  %v718_v34 = vrot.slane %v717_v24, 1 }
 0x142   : > { %666 = vst.msk [vmem:[%s267_s9] sm:$0x1] %vm665_vm1, %v664_v60  ;;  %v719_v35 = vadd.f32 %v718_v34, %v717_v24 }
 0x144   : > { %720 = vst.msk [vmem:[%s270_s12] sm:$0x1] %vm665_vm1, %v719_v35 }
 0x145 PF: > { %s18_s18 = sadd.s32 1, %s975_s18  }
 0x146   : > { %p15_p10 = scmp.ge.s32.totalorder %s18_s18, 6  }
 0x148   :  { %17 = sbr.rel (!%p15_p10) target bundleno = 2 (0x2), region = 95 }
 0x14f   :  { %767 = vsyncpa [#allocation3], 1 }
 0x150   :  { %769 = vsyncpa [#allocation3 + $0x1], 1 }
 0x151   :  { %770 = vsyncpa [#allocation5], 1 }

// kernel: t_net_forward.6
= control target key start
LH: loop header
LB: loop body
LE: loop exit
PB: predicated region body
PF: predicated region fallthrough
CT: control target
= control target key end

     0   :  { %13 = vsyncpa [#allocation3], 0  ;;  %s3209_s0 = inlined_call_operand.vmem [shape: f32[512,128], index: 0, kind: input, shape index: {}]   ;;  %s3210_s1 = inlined_call_operand.vmem [shape: f32[1,128], index: 1, kind: input, shape index: {}]   ;;  %s3211_s2 = inlined_call_operand.vmem [shape: f32[1,128], index: 2, kind: input, shape index: {}]   ;;  %s3212_s3 = inlined_call_operand.hbm [shape: f32[128,1024], index: 3, kind: input, shape index: {}]   ;;  %s3213_s4 = inlined_call_operand.hbm [shape: f32[1,1024], index: 4, kind: input, shape index: {}]   ;;  %s3214_s5 = inlined_call_operand.vmem [shape: f32[512,1024], index: 5, kind: output, shape index: {0}]   ;;  %s3215_s6 = inlined_call_operand.vmem [shape: f32[4,1,1024], index: 6, kind: output, shape index: {1}]   ;;  %s3216_s7 = inlined_call_operand.vmem [shape: f32[4,1,1024], index: 7, kind: output, shape index: {2}]  }
   0x1   :  { %14 = vsyncpa [#allocation5], 0  ;;  %s2377_s24 = smov 0  }
   0x2 LB: > { %s2383_s25 = sadd.s32 4294967295, %s2329_s24   ;;  %p2079_p0 = scmp.ge.s32.totalorder %s2329_s24, 1  ;;  %s2329_s24 = sphi %s2377_s24, %s20_s24  }
   0x3   : > { %p213_p1 = scmp.lt.s32.totalorder %s2329_s24, 5  ;;  %s2331_s26 = smov [#allocation2]  }
   0x4   : > { %s231_s27 = sshll.u32 %s2331_s26, 4  ;;  %p3217_p3 = scmp.eq.s32.totalorder %s2383_s25, 0  ;;  %s232_s27 = int_to_ptr.vmem [resolvable:$true] %s231_s27 }
   0x5   : > { %p2387_p2 = pnand %p2079_p0, %p213_p1  ;;  %s2332_s29 = smov [#allocation4]  }
   0x6   : > { %s245_s30 = sshll.u32 %s2332_s29, 4  ;;  %s2259_s11 = scalar_lea.hbm %s3212_s3, 16384  ;;  %s2400_s30 = int_to_ptr.vmem [resolvable:$true] %s245_s30 }
   0x7   : > { %s3219_s28 = scalar_select %p2387_p2, 1, 0 }
   0x8   : > { %p2234_p4 = pneg %p2387_p2  ;;  %p2260_p6 = scmp.ne.s32.totalorder %s3212_s3, %s2259_s11 }
   0x9   : > { %p2266_p10 = scmp.lt.u32.totalorder %s2259_s11, %s3212_s3 }
   0xa   : > { %p2396_p5 = pnand %p3217_p3, %p2234_p4 }
   0xc   : > { %p2261_p7 = pneg %p2396_p5 }
   0xe   : > { %p2262_p8 = pnand %p2261_p7, %p2260_p6 }
  0x10   : > { %p2263_p9 = pneg %p2262_p8 }
  0x12   : > { %p2268_p11 = pnand %p2266_p10, %p2263_p9 }
  0x14   : > { %2271 = shalt.err (!%p2268_p11)
}
  0x15   : > { %s2272_s16 = scalar_lea.vmem %s232_s27, 16384  ;;  %p2280_p1 = scmp.lt.s32.totalorder %s232_s27, %s232_s27 }
  0x16   : > { %p2273_p12 = scmp.ne.s32.totalorder %s232_s27, %s2272_s16  ;;  %p2281_p4 = scmp.lt.s32.totalorder %s2272_s16, %s2272_s16 }
  0x18   : > { %p2275_p13 = pnand %p2273_p12, %p2261_p7  ;;  %p2282_p3 = por %p2281_p4, %p2280_p1 }
  0x1a   : > { %p2276_p0 = pneg %p2275_p13 }
  0x1c   : > { %p2283_p2 = pnand %p2282_p3, %p2276_p0 }
  0x1e   : > { %2286 = shalt.err (!%p2283_p2)
}
  0x1f   : > { %s2333_s17 = smov 1024   ;;  %s2334_s18 = smov 64  }
  0x20   : > { %2237 = dma.hbm_to_vmem [thread:$0]  (!%p2396_p5), %s3212_s3, 16384, %s232_s27, [#allocation3], %s2333_s17, %s2333_s17, %s2334_s18  }
  0x21   : > { %s2287_s23 = scalar_lea.hbm %s3213_s4, 128 }
  0x22   : > { %p2288_p6 = scmp.ne.s32.totalorder %s3213_s4, %s2287_s23  ;;  %p2294_p8 = scmp.lt.u32.totalorder %s2287_s23, %s3213_s4 }
  0x24   : > { %p2290_p2 = pnand %p2288_p6, %p2261_p7 }
  0x26   : > { %p2291_p3 = pneg %p2290_p2 }
  0x28   : > { %p2296_p9 = pnand %p2294_p8, %p2291_p3 }
  0x2a   : > { %2299 = shalt.err (!%p2296_p9)
}
  0x2b   : > { %s2300_s27 = scalar_lea.vmem %s2400_s30, 128  ;;  %p2308_p13 = scmp.lt.s32.totalorder %s2400_s30, %s2400_s30 }
  0x2c   : > { %p2301_p10 = scmp.ne.s32.totalorder %s2400_s30, %s2300_s27  ;;  %p2309_p0 = scmp.lt.s32.totalorder %s2300_s27, %s2300_s27 }
  0x2e   : > { %p2303_p11 = pnand %p2301_p10, %p2261_p7  ;;  %p2310_p1 = por %p2309_p0, %p2308_p13 }
  0x30   : > { %p2304_p12 = pneg %p2303_p11 }
  0x32   : > { %p2311_p4 = pnand %p2310_p1, %p2304_p12 }
  0x34   : > { %2314 = shalt.err (!%p2311_p4)
}
  0x35   : > { %2240 = dma.hbm_to_vmem [thread:$0]  (!%p2396_p5), %s3213_s4, 128, %s2400_s30, [#allocation5]  }
  0x36   : > { %p3221_p6 = scmp.ne.s32.totalorder %s3219_s28, 0 }
  0x37   : > { %p3222_p2 = scmp.eq.s32.totalorder (!%p3221_p6), %s2383_s25, 0 }
  0x38   : > { %267 = sbr.rel (%p3221_p6) target bundleno = 486 (0x1e6), region = 40 }
  0x3f   : > { %2320 = dma.done.wait (%p3222_p2), [#allocation3], 16384   ;;  %p3223_p7 = pmov %p3222_p2 }
  0x40   : > { %p3224_p3 = pmov %p3222_p2 }
  0x41   : > { %2322 = vsyncadd (%p3223_p7), [#allocation3], 4294950912 }
  0x42   : > { %2324 = dma.done.wait (%p3224_p3), [#allocation5], 128   ;;  %p3225_p8 = pmov %p3222_p2 }
  0x43   : > { %v2335_v0 = vmov 0.0   ;;  %v412_v1 = vld [vmem:[#allocation2 + $0x8] sm:$0xff]  ;;  %v414_v3 = vld [vmem:[#allocation2 + $0x18] sm:$0xff]  ;;  %v411_v6 = vld [vmem:[#allocation2] sm:$0xff]  ;;  %s2086_s28 = sshll.u32 %s2383_s25, 4  ;;  %p325_p9 = scmp.lt.s32.totalorder %s2383_s25, 3 }
  0x44   : > { %2326 = vsyncadd (%p3225_p8), [#allocation5], 4294967168  ;;  %645 = vmatprep.mubr.f32.mxu0 %v2335_v0  ;;  %806 = vmatprep.mubr.f32.mxu1 %v2335_v0  ;;  %v420_v2 = vld [vmem:[#allocation2 + $0x48] sm:$0xff]  ;;  %v422_v5 = vld [vmem:[#allocation2 + $0x58] sm:$0xff]  ;;  %p2464_p5 = scmp.lt.s32.totalorder %s2086_s28, 63 }
  0x45   : > { %v2098_v4 = vpack.c.bf16 %v420_v2, %v412_v1  ;;  %v419_v7 = vld [vmem:[#allocation2 + $0x40] sm:$0xff]  ;;  %v2130_v8 = vpack.c.bf16 %v422_v5, %v414_v3  ;;  %v413_v10 = vld [vmem:[#allocation2 + $0x10] sm:$0xff]  ;;  %v428_v12 = vld [vmem:[#allocation2 + $0x88] sm:$0xff]  ;;  %s3230_s25 = smov (!%p325_p9, %s2383_s25), 3 }
  0x46   : > { %v2100_v9 = vpack.c.bf16 %v419_v7, %v411_v6  ;;  %v421_v11 = vld [vmem:[#allocation2 + $0x50] sm:$0xff]  ;;  %v436_v14 = vld [vmem:[#allocation2 + $0xc8] sm:$0xff]  ;;  %v430_v15 = vld [vmem:[#allocation2 + $0x98] sm:$0xff]  ;;  %s3228_s28 = smov (!%p2464_p5, %s2086_s28), 63  ;;  %s2091_s26 = sshll.u32 %s3230_s25, 3 }
  0x47   : > { %2099 = vmatprep.subr.bf16.mxu0 %v2098_v4  ;;  %v2132_v13 = vpack.c.bf16 %v421_v11, %v413_v10  ;;  %v438_v16 = vld [vmem:[#allocation2 + $0xd8] sm:$0xff]  ;;  %2131 = vmatprep.subr.bf16.mxu1 %v2130_v8  ;;  %v2102_v17 = vpack.c.bf16 %v436_v14, %v428_v12  ;;  %v427_v19 = vld [vmem:[#allocation2 + $0x80] sm:$0xff]  ;;  %v429_v21 = vld [vmem:[#allocation2 + $0x90] sm:$0xff]  ;;  %s2087_s8 = sshll.u32 %s3228_s28, 3  ;;  %s2097_s20 = sshll.u32 %s3228_s28, 6 }
  0x48   : > { %2101 = vmatpush1.bf16.msra.mxu0 %v2100_v9  ;;  %v2134_v18 = vpack.c.bf16 %v438_v16, %v430_v15  ;;  %v435_v20 = vld [vmem:[#allocation2 + $0xc0] sm:$0xff]  ;;  %v437_v23 = vld [vmem:[#allocation2 + $0xd0] sm:$0xff]  ;;  %v444_v24 = vld [vmem:[#allocation2 + $0x108] sm:$0xff]  ;;  %s2478_s15 = scalar_lea.vmem %s3209_s0, %s2087_s8  ;;  %s2708_s23 = scalar_lea.vmem %s3214_s5, %s2097_s20 }
  0x49   : > { %2133 = vmatpush1.bf16.msra.mxu1 %v2132_v13  ;;  %v2104_v22 = vpack.c.bf16 %v435_v20, %v427_v19  ;;  %v452_v25 = vld [vmem:[#allocation2 + $0x148] sm:$0xff]  ;;  %2103 = vmatprep.subr.bf16.mxu0 %v2102_v17  ;;  %v2136_v26 = vpack.c.bf16 %v437_v23, %v429_v21  ;;  %v446_v28 = vld [vmem:[#allocation2 + $0x118] sm:$0xff]  ;;  %v443_v30 = vld [vmem:[#allocation2 + $0x100] sm:$0xff]  ;;  %s328_s10 = scalar_lea.vmem %s3215_s6, %s2091_s26  ;;  %s332_s11 = scalar_lea.vmem %s3216_s7, %s2091_s26 }
  0x4a   : > { %2135 = vmatprep.subr.bf16.mxu1 %v2134_v18  ;;  %v2106_v27 = vpack.c.bf16 %v452_v25, %v444_v24  ;;  %v454_v29 = vld [vmem:[#allocation2 + $0x158] sm:$0xff]  ;;  %v451_v32 = vld [vmem:[#allocation2 + $0x140] sm:$0xff]  ;;  %v445_v33 = vld [vmem:[#allocation2 + $0x110] sm:$0xff] }
  0x4b   : > { %v2138_v31 = vpack.c.bf16 %v454_v29, %v446_v28  ;;  %v453_v34 = vld [vmem:[#allocation2 + $0x150] sm:$0xff]  ;;  %v2108_v35 = vpack.c.bf16 %v451_v32, %v443_v30  ;;  %v460_v36 = vld [vmem:[#allocation2 + $0x188] sm:$0xff]  ;;  %v462_v38 = vld [vmem:[#allocation2 + $0x198] sm:$0xff] }
  0x4c   : > { %2105 = vmatpush1.bf16.msra.mxu0 %v2104_v22  ;;  %v468_v37 = vld [vmem:[#allocation2 + $0x1c8] sm:$0xff]  ;;  %v2140_v39 = vpack.c.bf16 %v453_v34, %v445_v33  ;;  %v470_v41 = vld [vmem:[#allocation2 + $0x1d8] sm:$0xff]  ;;  %v459_v42 = vld [vmem:[#allocation2 + $0x180] sm:$0xff] }
  0x4d   : > { %2137 = vmatpush1.bf16.msra.mxu1 %v2136_v26  ;;  %2107 = vmatprep.subr.bf16.mxu0 %v2106_v27  ;;  %v2110_v40 = vpack.c.bf16 %v468_v37, %v460_v36  ;;  %v467_v43 = vld [vmem:[#allocation2 + $0x1c0] sm:$0xff]  ;;  %v2142_v44 = vpack.c.bf16 %v470_v41, %v462_v38  ;;  %v461_v45 = vld [vmem:[#allocation2 + $0x190] sm:$0xff]  ;;  %v476_v47 = vld [vmem:[#allocation2 + $0x208] sm:$0xff] }
  0x4e   : > { %2139 = vmatprep.subr.bf16.mxu1 %v2138_v31  ;;  %v469_v46 = vld [vmem:[#allocation2 + $0x1d0] sm:$0xff]  ;;  %v484_v48 = vld [vmem:[#allocation2 + $0x248] sm:$0xff]  ;;  %v478_v49 = vld [vmem:[#allocation2 + $0x218] sm:$0xff]  ;;  %v2112_v51 = vpack.c.bf16 %v467_v43, %v459_v42 }
  0x4f   : > { %v486_v50 = vld [vmem:[#allocation2 + $0x258] sm:$0xff]  ;;  %v2144_v52 = vpack.c.bf16 %v469_v46, %v461_v45  ;;  %v2114_v53 = vpack.c.bf16 %v484_v48, %v476_v47  ;;  %v475_v54 = vld [vmem:[#allocation2 + $0x200] sm:$0xff]  ;;  %v477_v56 = vld [vmem:[#allocation2 + $0x210] sm:$0xff] }
  0x50   : > { %2109 = vmatpush1.bf16.msra.mxu0 %v2108_v35  ;;  %v483_v55 = vld [vmem:[#allocation2 + $0x240] sm:$0xff]  ;;  %v2146_v57 = vpack.c.bf16 %v486_v50, %v478_v49  ;;  %v485_v58 = vld [vmem:[#allocation2 + $0x250] sm:$0xff]  ;;  %v492_v59 = vld [vmem:[#allocation2 + $0x288] sm:$0xff] }
  0x51   : > { %2141 = vmatpush1.bf16.msra.mxu1 %v2140_v39  ;;  %2111 = vmatprep.subr.bf16.mxu0 %v2110_v40  ;;  %v500_v60 = vld [vmem:[#allocation2 + $0x2c8] sm:$0xff]  ;;  %v494_v61 = vld [vmem:[#allocation2 + $0x298] sm:$0xff]  ;;  %v2116_v63 = vpack.c.bf16 %v483_v55, %v475_v54  ;;  %v2148_v1 = vpack.c.bf16 %v485_v58, %v477_v56  ;;  %v491_v3 = vld [vmem:[#allocation2 + $0x280] sm:$0xff] }
  0x52   : > { %2143 = vmatprep.subr.bf16.mxu1 %v2142_v44  ;;  %v502_v62 = vld [vmem:[#allocation2 + $0x2d8] sm:$0xff]  ;;  %v2118_v2 = vpack.c.bf16 %v500_v60, %v492_v59  ;;  %v499_v4 = vld [vmem:[#allocation2 + $0x2c0] sm:$0xff]  ;;  %v493_v5 = vld [vmem:[#allocation2 + $0x290] sm:$0xff] }
  0x53   : > { %v2150_v6 = vpack.c.bf16 %v502_v62, %v494_v61  ;;  %v501_v7 = vld [vmem:[#allocation2 + $0x2d0] sm:$0xff]  ;;  %v508_v8 = vld [vmem:[#allocation2 + $0x308] sm:$0xff]  ;;  %v510_v10 = vld [vmem:[#allocation2 + $0x318] sm:$0xff]  ;;  %v2120_v12 = vpack.c.bf16 %v499_v4, %v491_v3 }
  0x54   : > { %2113 = vmatpush1.bf16.msra.mxu0 %v2112_v51  ;;  %v516_v9 = vld [vmem:[#allocation2 + $0x348] sm:$0xff]  ;;  %v518_v11 = vld [vmem:[#allocation2 + $0x358] sm:$0xff]  ;;  %v507_v13 = vld [vmem:[#allocation2 + $0x300] sm:$0xff]  ;;  %v2152_v15 = vpack.c.bf16 %v501_v7, %v493_v5 }
  0x55   : > { %2145 = vmatpush1.bf16.msra.mxu1 %v2144_v52  ;;  %2115 = vmatprep.subr.bf16.mxu0 %v2114_v53  ;;  %v515_v14 = vld [vmem:[#allocation2 + $0x340] sm:$0xff]  ;;  %v2122_v16 = vpack.c.bf16 %v516_v9, %v508_v8  ;;  %v509_v17 = vld [vmem:[#allocation2 + $0x310] sm:$0xff]  ;;  %v2154_v20 = vpack.c.bf16 %v518_v11, %v510_v10  ;;  %v524_v22 = vld [vmem:[#allocation2 + $0x388] sm:$0xff] }
  0x56   : > { %2147 = vmatprep.subr.bf16.mxu1 %v2146_v57  ;;  %v333_v18 = vld [vmem:[%s2478_s15] sm:$0xff]  ;;  %v517_v21 = vld [vmem:[#allocation2 + $0x350] sm:$0xff]  ;;  %v532_v23 = vld [vmem:[#allocation2 + $0x3c8] sm:$0xff]  ;;  %v2124_v27 = vpack.c.bf16 %v515_v14, %v507_v13 }
  0x57   : > { %v2484_v19 = vld [vmem:[%s3210_s1] ss:$0 sm:$0xff]  ;;  %v526_v24 = vld [vmem:[#allocation2 + $0x398] sm:$0xff]  ;;  %v2156_v30 = vpack.c.bf16 %v517_v21, %v509_v17  ;;  %v2126_v31 = vpack.c.bf16 %v532_v23, %v524_v22  ;;  %v525_v33 = vld [vmem:[#allocation2 + $0x390] sm:$0xff] }
  0x58   : > { %2117 = vmatpush1.bf16.msra.mxu0 %v2116_v63  ;;  %v534_v25 = vld [vmem:[#allocation2 + $0x3d8] sm:$0xff]  ;;  %v356_v26 = vmul.f32 %v2484_v19, %v333_v18  ;;  %v523_v28 = vld [vmem:[#allocation2 + $0x380] sm:$0xff]  ;;  %v334_v34 = vld [vmem:[%s2478_s15 + $0x8] sm:$0xff] }
  0x59   : > { %2149 = vmatpush1.bf16.msra.mxu1 %v2148_v1  ;;  %2119 = vmatprep.subr.bf16.mxu0 %v2118_v2  ;;  %v2490_v29 = vld [vmem:[%s3211_s2] ss:$0 sm:$0xff]  ;;  %v2158_v35 = vpack.c.bf16 %v534_v25, %v526_v24  ;;  %v533_v36 = vld [vmem:[#allocation2 + $0x3d0] sm:$0xff]  ;;  %v416_v37 = vld [vmem:[#allocation2 + $0x28] sm:$0xff]  ;;  %v357_v42 = vmul.f32 %v2484_v19, %v334_v34 }
  0x5a   : > { %2151 = vmatprep.subr.bf16.mxu1 %v2150_v6  ;;  %v531_v32 = vld [vmem:[#allocation2 + $0x3c0] sm:$0xff]  ;;  %v424_v38 = vld [vmem:[#allocation2 + $0x68] sm:$0xff]  ;;  %v379_v39 = vadd.f32 %v2490_v29, %v356_v26  ;;  %v418_v40 = vld [vmem:[#allocation2 + $0x38] sm:$0xff]  ;;  %v2160_v45 = vpack.c.bf16 %v533_v36, %v525_v33 }
  0x5b   : > { %v426_v41 = vld [vmem:[#allocation2 + $0x78] sm:$0xff]  ;;  %v2128_v43 = vpack.c.bf16 %v531_v32, %v523_v28  ;;  %v335_v44 = vld [vmem:[%s2478_s15 + $0x10] sm:$0xff]  ;;  %v2162_v46 = vpack.c.bf16 %v424_v38, %v416_v37  ;;  %v415_v47 = vld [vmem:[#allocation2 + $0x20] sm:$0xff]  ;;  %v380_v53 = vadd.f32 %v2490_v29, %v357_v42 }
  0x5c   : > { %2121 = vmatpush1.bf16.msra.mxu0 %v2120_v12  ;;  %v423_v48 = vld [vmem:[#allocation2 + $0x60] sm:$0xff]  ;;  %v2194_v49 = vpack.c.bf16 %v426_v41, %v418_v40  ;;  %v417_v50 = vld [vmem:[#allocation2 + $0x30] sm:$0xff]  ;;  %v2496_v52 = vmax.f32 %v379_v39, 0.0  ;;  %v358_v54 = vmul.f32 %v2484_v19, %v335_v44  ;;  %v432_v55 = vld [vmem:[#allocation2 + $0xa8] sm:$0xff] }
  0x5d   : > { %2153 = vmatpush1.bf16.msra.mxu1 %v2152_v15  ;;  %2123 = vmatprep.subr.bf16.mxu0 %v2122_v16  ;;  %v425_v51 = vld [vmem:[#allocation2 + $0x70] sm:$0xff]  ;;  %v440_v56 = vld [vmem:[#allocation2 + $0xe8] sm:$0xff]  ;;  %v2164_v57 = vpack.c.bf16 %v423_v48, %v415_v47  ;;  %v434_v58 = vld [vmem:[#allocation2 + $0xb8] sm:$0xff]  ;;  %v2502_v3 = vmax.f32 %v380_v53, 0.0 }
  0x5e   : > { %2155 = vmatprep.subr.bf16.mxu1 %v2154_v20  ;;  %v442_v59 = vld [vmem:[#allocation2 + $0xf8] sm:$0xff]  ;;  %v2196_v61 = vpack.c.bf16 %v425_v51, %v417_v50  ;;  %v2166_v62 = vpack.c.bf16 %v440_v56, %v432_v55  ;;  %v431_v63 = vld [vmem:[#allocation2 + $0xa0] sm:$0xff]  ;;  %v433_v2 = vld [vmem:[#allocation2 + $0xb0] sm:$0xff]  ;;  %v381_v4 = vadd.f32 %v2490_v29, %v358_v54 }
  0x5f   : > { %v336_v60 = vld [vmem:[%s2478_s15 + $0x18] sm:$0xff]  ;;  %v439_v1 = vld [vmem:[#allocation2 + $0xe0] sm:$0xff]  ;;  %v2198_v5 = vpack.c.bf16 %v442_v59, %v434_v58  ;;  %v441_v6 = vld [vmem:[#allocation2 + $0xf0] sm:$0xff] }
  0x60   : > { %2125 = vmatpush1.bf16.msra.mxu0 %v2124_v27  ;;  %v359_v7 = vmul.f32 %v2484_v19, %v336_v60  ;;  %v448_v8 = vld [vmem:[#allocation2 + $0x128] sm:$0xff]  ;;  %v337_v10 = vld [vmem:[%s2478_s15 + $0x20] sm:$0xff]  ;;  %v450_v11 = vld [vmem:[#allocation2 + $0x138] sm:$0xff]  ;;  %v2168_v13 = vpack.c.bf16 %v439_v1, %v431_v63  ;;  %v2200_v14 = vpack.c.bf16 %v441_v6, %v433_v2  ;;  %v2511_v20 = vmax.f32 %v381_v4, 0.0 }
  0x61   : > { %2157 = vmatpush1.bf16.msra.mxu1 %v2156_v30  ;;  %2127 = vmatprep.subr.bf16.mxu0 %v2126_v31  ;;  %v456_v9 = vld [vmem:[#allocation2 + $0x168] sm:$0xff]  ;;  %v458_v12 = vld [vmem:[#allocation2 + $0x178] sm:$0xff]  ;;  %v447_v16 = vld [vmem:[#allocation2 + $0x120] sm:$0xff]  ;;  %v360_v22 = vmul.f32 %v2484_v19, %v337_v10 }
  0x62   : > { %2159 = vmatprep.subr.bf16.mxu1 %v2158_v35  ;;  %v2170_v15 = vpack.c.bf16 %v456_v9, %v448_v8  ;;  %v455_v17 = vld [vmem:[#allocation2 + $0x160] sm:$0xff]  ;;  %v449_v18 = vld [vmem:[#allocation2 + $0x130] sm:$0xff]  ;;  %v382_v21 = vadd.f32 %v2490_v29, %v359_v7  ;;  %v2202_v23 = vpack.c.bf16 %v458_v12, %v450_v11  ;;  %v464_v25 = vld [vmem:[#allocation2 + $0x1a8] sm:$0xff] }
  0x63   : > { %v457_v24 = vld [vmem:[#allocation2 + $0x170] sm:$0xff]  ;;  %v472_v26 = vld [vmem:[#allocation2 + $0x1e8] sm:$0xff]  ;;  %v466_v28 = vld [vmem:[#allocation2 + $0x1b8] sm:$0xff]  ;;  %v2172_v31 = vpack.c.bf16 %v455_v17, %v447_v16  ;;  %v383_v38 = vadd.f32 %v2490_v29, %v360_v22 }
  0x64   : > { %2129 = vmatpush1.bf16.msra.mxu0 %v2128_v43  ;;  %v338_v27 = vld [vmem:[%s2478_s15 + $0x28] sm:$0xff]  ;;  %v474_v30 = vld [vmem:[#allocation2 + $0x1f8] sm:$0xff]  ;;  %v2204_v32 = vpack.c.bf16 %v457_v24, %v449_v18  ;;  %v2174_v33 = vpack.c.bf16 %v472_v26, %v464_v25  ;;  %v463_v34 = vld [vmem:[#allocation2 + $0x1a0] sm:$0xff]  ;;  %v2520_v37 = vmax.f32 %v382_v21, 0.0 }
  0x65   : > { %2161 = vmatpush1.bf16.msra.mxu1 %v2160_v45  ;;  %2163 = vmatprep.subr.bf16.mxu0 %v2162_v46  ;;  %v471_v35 = vld [vmem:[#allocation2 + $0x1e0] sm:$0xff]  ;;  %v465_v36 = vld [vmem:[#allocation2 + $0x1b0] sm:$0xff]  ;;  %v361_v39 = vmul.f32 %v2484_v19, %v338_v27  ;;  %v2206_v40 = vpack.c.bf16 %v474_v30, %v466_v28  ;;  %v480_v42 = vld [vmem:[#allocation2 + $0x228] sm:$0xff]  ;;  %v2529_v54 = vmax.f32 %v383_v38, 0.0 }
  0x66   : > { %2195 = vmatprep.subr.bf16.mxu1 %v2194_v49  ;;  %v473_v41 = vld [vmem:[#allocation2 + $0x1f0] sm:$0xff]  ;;  %v488_v43 = vld [vmem:[#allocation2 + $0x268] sm:$0xff]  ;;  %v482_v45 = vld [vmem:[#allocation2 + $0x238] sm:$0xff]  ;;  %v2176_v47 = vpack.c.bf16 %v471_v35, %v463_v34 }
  0x67   : > { %646 = vmatmul.mubr.f32.vlgmr.msra.gmra.mrb[0].mxu0 %v2496_v52  ;;  %v339_v44 = vld [vmem:[%s2478_s15 + $0x30] sm:$0xff]  ;;  %v490_v46 = vld [vmem:[#allocation2 + $0x278] sm:$0xff]  ;;  %v2208_v48 = vpack.c.bf16 %v473_v41, %v465_v36  ;;  %v2178_v49 = vpack.c.bf16 %v488_v43, %v480_v42  ;;  %v479_v50 = vld [vmem:[#allocation2 + $0x220] sm:$0xff]  ;;  %v384_v55 = vadd.f32 %v2490_v29, %v361_v39 }
  0x68   : > { %807 = vmatmul.mubr.f32.vlgmr.msra.gmra.mrb[0].mxu1 %v2496_v52  ;;  %2165 = vmatpush1.bf16.msra.mxu0 %v2164_v57  ;;  %v487_v51 = vld [vmem:[#allocation2 + $0x260] sm:$0xff]  ;;  %v481_v53 = vld [vmem:[#allocation2 + $0x230] sm:$0xff]  ;;  %v362_v56 = vmul.f32 %v2484_v19, %v339_v44  ;;  %v2210_v57 = vpack.c.bf16 %v490_v46, %v482_v45  ;;  %v496_v59 = vld [vmem:[#allocation2 + $0x2a8] sm:$0xff] }
  0x69   : > { %2197 = vmatpush1.bf16.msra.mxu1 %v2196_v61  ;;  %651 = vmatprep.mubr.f32.mxu0 %v2335_v0  ;;  %v489_v58 = vld [vmem:[#allocation2 + $0x270] sm:$0xff]  ;;  %v504_v60 = vld [vmem:[#allocation2 + $0x2e8] sm:$0xff]  ;;  %v340_v61 = vld [vmem:[%s2478_s15 + $0x38] sm:$0xff]  ;;  %v2180_v1 = vpack.c.bf16 %v487_v51, %v479_v50  ;;  %v2538_v8 = vmax.f32 %v384_v55, 0.0 }
  0x6a   : > { %812 = vmatprep.mubr.f32.mxu1 %v2335_v0  ;;  %2167 = vmatprep.subr.bf16.mxu0 %v2166_v62  ;;  %v498_v62 = vld [vmem:[#allocation2 + $0x2b8] sm:$0xff]  ;;  %v2212_v2 = vpack.c.bf16 %v489_v58, %v481_v53  ;;  %v2182_v4 = vpack.c.bf16 %v504_v60, %v496_v59  ;;  %v503_v6 = vld [vmem:[#allocation2 + $0x2e0] sm:$0xff]  ;;  %v497_v7 = vld [vmem:[#allocation2 + $0x2b0] sm:$0xff]  ;;  %v385_v9 = vadd.f32 %v2490_v29, %v362_v56 }
  0x6b   : > { %652 = vmatmul.mubr.f32.gmra.mrb[2].mxu0 %v2502_v3  ;;  %2199 = vmatprep.subr.bf16.mxu1 %v2198_v5  ;;  %v506_v63 = vld [vmem:[#allocation2 + $0x2f8] sm:$0xff]  ;;  %v495_v5 = vld [vmem:[#allocation2 + $0x2a0] sm:$0xff]  ;;  %v363_v10 = vmul.f32 %v2484_v19, %v340_v61  ;;  %v505_v12 = vld [vmem:[#allocation2 + $0x2f0] sm:$0xff] }
  0x6c   : > { %813 = vmatmul.mubr.f32.gmra.mrb[2].mxu1 %v2502_v3  ;;  %657 = vmatprep.mubr.f32.mxu0 %v2335_v0  ;;  %v2214_v11 = vpack.c.bf16 %v506_v63, %v498_v62  ;;  %v514_v16 = vld [vmem:[#allocation2 + $0x338] sm:$0xff]  ;;  %v2184_v18 = vpack.c.bf16 %v503_v6, %v495_v5  ;;  %v2216_v21 = vpack.c.bf16 %v505_v12, %v497_v7  ;;  %v519_v24 = vld [vmem:[#allocation2 + $0x360] sm:$0xff]  ;;  %v513_v25 = vld [vmem:[#allocation2 + $0x330] sm:$0xff]  ;;  %v2547_v26 = vmax.f32 %v385_v9, 0.0 }
  0x6d   : > { %818 = vmatprep.mubr.f32.mxu1 %v2335_v0  ;;  %2169 = vmatpush1.bf16.msra.mxu0 %v2168_v13  ;;  %v512_v13 = vld [vmem:[#allocation2 + $0x328] sm:$0xff]  ;;  %v522_v17 = vld [vmem:[#allocation2 + $0x378] sm:$0xff]  ;;  %v386_v27 = vadd.f32 %v2490_v29, %v363_v10  ;;  %v527_v41 = vld [vmem:[#allocation2 + $0x3a0] sm:$0xff] }
  0x6e   : > { %2201 = vmatpush1.bf16.msra.mxu1 %v2200_v14  ;;  %2171 = vmatprep.subr.bf16.mxu0 %v2170_v15  ;;  %v520_v14 = vld [vmem:[#allocation2 + $0x368] sm:$0xff]  ;;  %v341_v15 = vld [vmem:[%s2478_s15 + $0x40] sm:$0xff]  ;;  %v2218_v30 = vpack.c.bf16 %v522_v17, %v514_v16  ;;  %v530_v35 = vld [vmem:[#allocation2 + $0x3b8] sm:$0xff] }
  0x6f   : > { %658 = vmatmul.mubr.f32.gmra.mrb[4].mxu0 %v2511_v20  ;;  %2203 = vmatprep.subr.bf16.mxu1 %v2202_v23  ;;  %v2186_v22 = vpack.c.bf16 %v520_v14, %v512_v13  ;;  %v511_v23 = vld [vmem:[#allocation2 + $0x320] sm:$0xff]  ;;  %v364_v28 = vmul.f32 %v2484_v19, %v341_v15  ;;  %v342_v34 = vld [vmem:[%s2478_s15 + $0x48] sm:$0xff]  ;;  %v538_v36 = vld [vmem:[#allocation2 + $0x3f8] sm:$0xff]  ;;  %v2556_v43 = vmax.f32 %v386_v27, 0.0 }
  0x70   : > { %819 = vmatmul.mubr.f32.gmra.mrb[4].mxu1 %v2511_v20  ;;  %663 = vmatprep.mubr.f32.mxu0 %v2335_v0  ;;  %v2188_v38 = vpack.c.bf16 %v519_v24, %v511_v23  ;;  %v535_v42 = vld [vmem:[#allocation2 + $0x3e0] sm:$0xff]  ;;  %v365_v45 = vmul.f32 %v2484_v19, %v342_v34  ;;  %v2222_v46 = vpack.c.bf16 %v538_v36, %v530_v35  ;;  %v347_v7 = vld [vmem:[%s2478_s15 + $0x70] sm:$0xff]  ;;  %v348_v12 = vld [vmem:[%s2478_s15 + $0x78] sm:$0xff] }
  0x71   : > { %824 = vmatprep.mubr.f32.mxu1 %v2335_v0  ;;  %2173 = vmatpush1.bf16.msra.mxu0 %v2172_v31  ;;  %v521_v31 = vld [vmem:[#allocation2 + $0x370] sm:$0xff]  ;;  %v387_v44 = vadd.f32 %v2490_v29, %v364_v28  ;;  %v2192_v50 = vpack.c.bf16 %v535_v42, %v527_v41  ;;  %v345_v61 = vld [vmem:[%s2478_s15 + $0x60] sm:$0xff]  ;;  %v371_v15 = vmul.f32 %v2484_v19, %v348_v12 }
  0x72   : > { %2205 = vmatpush1.bf16.msra.mxu1 %v2204_v32  ;;  %2175 = vmatprep.subr.bf16.mxu0 %v2174_v33  ;;  %v528_v32 = vld [vmem:[#allocation2 + $0x3a8] sm:$0xff]  ;;  %v2220_v39 = vpack.c.bf16 %v521_v31, %v513_v25  ;;  %v388_v55 = vadd.f32 %v2490_v29, %v365_v45 }
  0x73   : > { %664 = vmatmul.mubr.f32.gmra.mrb[6].mxu0 %v2520_v37  ;;  %2207 = vmatprep.subr.bf16.mxu1 %v2206_v40  ;;  %v536_v33 = vld [vmem:[#allocation2 + $0x3e8] sm:$0xff]  ;;  %v2565_v53 = vmax.f32 %v387_v44, 0.0  ;;  %v394_v17 = vadd.f32 %v2490_v29, %v371_v15 }
  0x74   : > { %825 = vmatmul.mubr.f32.gmra.mrb[6].mxu1 %v2520_v37  ;;  %669 = vmatprep.mubr.f32.mxu0 %v2335_v0  ;;  %v2190_v40 = vpack.c.bf16 %v536_v33, %v528_v32  ;;  %v2574_v58 = vmax.f32 %v388_v55, 0.0 }
  0x75   : > { %830 = vmatprep.mubr.f32.mxu1 %v2335_v0  ;;  %2177 = vmatpush1.bf16.msra.mxu0 %v2176_v47  ;;  %v529_v47 = vld [vmem:[#allocation2 + $0x3b0] sm:$0xff] }
  0x76   : > { %2209 = vmatpush1.bf16.msra.mxu1 %v2208_v48  ;;  %2179 = vmatprep.subr.bf16.mxu0 %v2178_v49  ;;  %v537_v48 = vld [vmem:[#allocation2 + $0x3f0] sm:$0xff] }
  0x77   : > { %670 = vmatmul.mubr.f32.gmra.mrb[8].mxu0 %v2529_v54  ;;  %2211 = vmatprep.subr.bf16.mxu1 %v2210_v57  ;;  %v343_v49 = vld [vmem:[%s2478_s15 + $0x50] sm:$0xff]  ;;  %v2224_v51 = vpack.c.bf16 %v537_v48, %v529_v47  ;;  %v344_v57 = vld [vmem:[%s2478_s15 + $0x58] sm:$0xff] }
  0x78   : > { %831 = vmatmul.mubr.f32.gmra.mrb[8].mxu1 %v2529_v54  ;;  %675 = vmatprep.mubr.f32.mxu0 %v2335_v0  ;;  %v366_v56 = vmul.f32 %v2484_v19, %v343_v49  ;;  %v367_v60 = vmul.f32 %v2484_v19, %v344_v57 }
  0x79   : > { %836 = vmatprep.mubr.f32.mxu1 %v2335_v0  ;;  %2181 = vmatpush1.bf16.msra.mxu0 %v2180_v1  ;;  %v368_v1 = vmul.f32 %v2484_v19, %v345_v61 }
  0x7a   : > { %2213 = vmatpush1.bf16.msra.mxu1 %v2212_v2  ;;  %2183 = vmatprep.subr.bf16.mxu0 %v2182_v4  ;;  %v389_v59 = vadd.f32 %v2490_v29, %v366_v56  ;;  %v390_v63 = vadd.f32 %v2490_v29, %v367_v60  ;;  %v346_v2 = vld [vmem:[%s2478_s15 + $0x68] sm:$0xff] }
  0x7b   : > { %676 = vmatmul.mubr.f32.gmra.mrb[10].mxu0 %v2538_v8  ;;  %2215 = vmatprep.subr.bf16.mxu1 %v2214_v11  ;;  %v391_v5 = vadd.f32 %v2490_v29, %v368_v1  ;;  %v369_v6 = vmul.f32 %v2484_v19, %v346_v2  ;;  %v370_v11 = vmul.f32 %v2484_v19, %v347_v7  ;;  %v2625_v19 = vmax.f32 %v394_v17, 0.0 }
  0x7c   : > { %837 = vmatmul.mubr.f32.gmra.mrb[10].mxu1 %v2538_v8  ;;  %681 = vmatprep.mubr.f32.mxu0 %v2335_v0  ;;  %v2583_v62 = vmax.f32 %v389_v59, 0.0  ;;  %v2592_v4 = vmax.f32 %v390_v63, 0.0 }
  0x7d   : > { %842 = vmatprep.mubr.f32.mxu1 %v2335_v0  ;;  %2185 = vmatpush1.bf16.msra.mxu0 %v2184_v18  ;;  %v2601_v9 = vmax.f32 %v391_v5, 0.0  ;;  %v392_v10 = vadd.f32 %v2490_v29, %v369_v6  ;;  %v393_v14 = vadd.f32 %v2490_v29, %v370_v11  ;;  %v541_v29 = vlaneseq }
  0x7e   : > { %2217 = vmatpush1.bf16.msra.mxu1 %v2216_v21  ;;  %2187 = vmatprep.subr.bf16.mxu0 %v2186_v22  ;;  %v2336_v21 = vmov 1966171168  }
  0x7f   : > { %682 = vmatmul.mubr.f32.gmra.mrb[12].mxu0 %v2547_v26  ;;  %2219 = vmatprep.subr.bf16.mxu1 %v2218_v30  ;;  %v2610_v13 = vmax.f32 %v392_v10, 0.0  ;;  %v2618_v16 = vmax.f32 %v393_v14, 0.0  ;;  %v1534_v22 = vunpack.c.l.s4 %v2336_v21 }
  0x80   : > { %843 = vmatmul.mubr.f32.gmra.mrb[12].mxu1 %v2547_v26  ;;  %687 = vmatprep.mubr.f32.mxu0 %v2335_v0 }
  0x81   : > { %848 = vmatprep.mubr.f32.mxu1 %v2335_v0  ;;  %2189 = vmatpush1.bf16.msra.mxu0 %v2188_v38  ;;  %v1535_v33 = vunpack.c.0.s8 %v1534_v22 }
  0x82   : > { %2221 = vmatpush1.bf16.msra.mxu1 %v2220_v39  ;;  %2191 = vmatprep.subr.bf16.mxu0 %v2190_v40 }
  0x83   : > { %688 = vmatmul.mubr.f32.gmra.mrb[14].mxu0 %v2556_v43  ;;  %2223 = vmatprep.subr.bf16.mxu1 %v2222_v46 }
  0x84   : > { %849 = vmatmul.mubr.f32.gmra.mrb[14].mxu1 %v2556_v43  ;;  %693 = vmatprep.mubr.f32.mxu0 %v2335_v0 }
  0x85   : > { %854 = vmatprep.mubr.f32.mxu1 %v2335_v0  ;;  %2193 = vmatpush1.bf16.msra.mxu0 %v2192_v50 }
  0x86   : > { %2225 = vmatpush1.bf16.msra.mxu1 %v2224_v51 }
  0x87   : > { %694 = vmatmul.mubr.f32.gmra.mrb[16].mxu0 %v2565_v53 }
  0x88   : > { %855 = vmatmul.mubr.f32.gmra.mrb[16].mxu1 %v2565_v53  ;;  %699 = vmatprep.mubr.f32.mxu0 %v2335_v0 }
  0x89   : > { %860 = vmatprep.mubr.f32.mxu1 %v2335_v0 }
  0x8b   : > { %700 = vmatmul.mubr.f32.gmra.mrb[18].mxu0 %v2574_v58 }
  0x8c   : > { %861 = vmatmul.mubr.f32.gmra.mrb[18].mxu1 %v2574_v58  ;;  %705 = vmatprep.mubr.f32.mxu0 %v2335_v0 }
  0x8d   : > { %866 = vmatprep.mubr.f32.mxu1 %v2335_v0 }
  0x8f   : > { %706 = vmatmul.mubr.f32.gmra.mrb[20].mxu0 %v2583_v62 }
  0x90   : > { %867 = vmatmul.mubr.f32.gmra.mrb[20].mxu1 %v2583_v62  ;;  %711 = vmatprep.mubr.f32.mxu0 %v2335_v0 }
  0x91   : > { %872 = vmatprep.mubr.f32.mxu1 %v2335_v0 }
  0x93   : > { %712 = vmatmul.mubr.f32.gmra.mrb[22].mxu0 %v2592_v4 }
  0x94   : > { %873 = vmatmul.mubr.f32.gmra.mrb[22].mxu1 %v2592_v4  ;;  %717 = vmatprep.mubr.f32.mxu0 %v2335_v0 }
  0x95   : > { %878 = vmatprep.mubr.f32.mxu1 %v2335_v0 }
  0x97   : > { %718 = vmatmul.mubr.f32.gmra.mrb[24].mxu0 %v2601_v9 }
  0x98   : > { %879 = vmatmul.mubr.f32.gmra.mrb[24].mxu1 %v2601_v9  ;;  %723 = vmatprep.mubr.f32.mxu0 %v2335_v0 }
  0x99   : > { %884 = vmatprep.mubr.f32.mxu1 %v2335_v0 }
  0x9b   : > { %724 = vmatmul.mubr.f32.gmra.mrb[26].mxu0 %v2610_v13 }
  0x9c   : > { %885 = vmatmul.mubr.f32.gmra.mrb[26].mxu1 %v2610_v13  ;;  %729 = vmatprep.mubr.f32.mxu0 %v2335_v0 }
  0x9d   : > { %890 = vmatprep.mubr.f32.mxu1 %v2335_v0 }
  0x9f   : > { %730 = vmatmul.mubr.f32.gmra.mrb[28].mxu0 %v2618_v16 }
  0xa0   : > { %891 = vmatmul.mubr.f32.gmra.mrb[28].mxu1 %v2618_v16  ;;  %735 = vmatprep.mubr.f32.mxu0 %v2335_v0 }
  0xa1   : > { %896 = vmatprep.mubr.f32.mxu1 %v2335_v0 }
  0xa3   : > { %736 = vmatmul.mubr.f32.gmra.mrb[30].mxu0 %v2625_v19 }
  0xa4   : > { %897 = vmatmul.mubr.f32.gmra.mrb[30].mxu1 %v2625_v19  ;;  %967 = vmatprep.mubr.f32.mxu0 %v2335_v0 }
  0xa5   : > { %1128 = vmatprep.mubr.f32.mxu1 %v2335_v0 }
  0xa7   : > { %968 = vmatmul.mubr.f32.vlgmr.msra.gmra.mrb[32].mxu0 %v2496_v52 }
  0xa8   : > { %1129 = vmatmul.mubr.f32.vlgmr.msra.gmra.mrb[32].mxu1 %v2496_v52  ;;  %973 = vmatprep.mubr.f32.mxu0 %v2335_v0  ;;  %v542_v52 = vshrl.u32 %v541_v29, 7 }
  0xa9   : > { %1134 = vmatprep.mubr.f32.mxu1 %v2335_v0 }
  0xaa   : > { %v567_v27 = vsub.s32 6, %v542_v52  ;;  %v563_v28 = vsub.s32 5, %v542_v52  ;;  %v571_v34 = vsub.s32 7, %v542_v52  ;;  %v2725_v48 = vsub.s32 %v1535_v33, %v542_v52 }
  0xab   : > { %974 = vmatmul.mubr.f32.gmra.mrb[34].mxu0 %v2502_v3 }
  0xac   : > { %1135 = vmatmul.mubr.f32.gmra.mrb[34].mxu1 %v2502_v3  ;;  %979 = vmatprep.mubr.f32.mxu0 %v2335_v0  ;;  %v543_v3 = vsub.s32 0, %v542_v52 }
  0xad   : > { %1140 = vmatprep.mubr.f32.mxu1 %v2335_v0 }
  0xaf   : > { %980 = vmatmul.mubr.f32.gmra.mrb[36].mxu0 %v2511_v20 }
  0xb0   : > { %1141 = vmatmul.mubr.f32.gmra.mrb[36].mxu1 %v2511_v20  ;;  %985 = vmatprep.mubr.f32.mxu0 %v2335_v0  ;;  %v539_v20 = vld [vmem:[#allocation4] sm:$0xff] }
  0xb1   : > { %1146 = vmatprep.mubr.f32.mxu1 %v2335_v0  ;;  %v2697_v18 = vrot.slane %v539_v20, %v543_v3  ;;  %v2719_v42 = vrot.slane %v539_v20, %v567_v27  ;;  %v2727_v49 = vrot.slane %v539_v20, %v571_v34 }
  0xb3   : > { %986 = vmatmul.mubr.f32.gmra.mrb[38].mxu0 %v2520_v37 }
  0xb4   : > { %1147 = vmatmul.mubr.f32.gmra.mrb[38].mxu1 %v2520_v37  ;;  %991 = vmatprep.mubr.f32.mxu0 %v2335_v0  ;;  %v551_v37 = vsub.s32 2, %v542_v52 }
  0xb5   : > { %1152 = vmatprep.mubr.f32.mxu1 %v2335_v0 }
  0xb6   : > { %v2699_v23 = vrot.slane %v539_v20, %v551_v37 }
  0xb7   : > { %992 = vmatmul.mubr.f32.gmra.mrb[40].mxu0 %v2529_v54 }
  0xb8   : > { %1153 = vmatmul.mubr.f32.gmra.mrb[40].mxu1 %v2529_v54  ;;  %997 = vmatprep.mubr.f32.mxu0 %v2335_v0  ;;  %v547_v54 = vsub.s32 1, %v542_v52 }
  0xb9   : > { %1158 = vmatprep.mubr.f32.mxu1 %v2335_v0 }
  0xba   : > { %v2701_v24 = vrot.slane %v539_v20, %v547_v54 }
  0xbb   : > { %998 = vmatmul.mubr.f32.gmra.mrb[42].mxu0 %v2538_v8 }
  0xbc   : > { %1159 = vmatmul.mubr.f32.gmra.mrb[42].mxu1 %v2538_v8  ;;  %1003 = vmatprep.mubr.f32.mxu0 %v2335_v0  ;;  %v555_v8 = vsub.s32 3, %v542_v52 }
  0xbd   : > { %1164 = vmatprep.mubr.f32.mxu1 %v2335_v0 }
  0xbf   : > { %1004 = vmatmul.mubr.f32.gmra.mrb[44].mxu0 %v2547_v26 }
  0xc0   : > { %1165 = vmatmul.mubr.f32.gmra.mrb[44].mxu1 %v2547_v26  ;;  %1009 = vmatprep.mubr.f32.mxu0 %v2335_v0  ;;  %v559_v26 = vsub.s32 4, %v542_v52 }
  0xc1   : > { %1170 = vmatprep.mubr.f32.mxu1 %v2335_v0 }
  0xc2   : > { %v2717_v41 = vrot.slane %v539_v20, %v559_v26 }
  0xc3   : > { %1010 = vmatmul.mubr.f32.gmra.mrb[46].mxu0 %v2556_v43 }
  0xc4   : > { %1171 = vmatmul.mubr.f32.gmra.mrb[46].mxu1 %v2556_v43  ;;  %1015 = vmatprep.mubr.f32.mxu0 %v2335_v0  ;;  %v2721_v43 = vrot.slane %v539_v20, %v563_v28 }
  0xc5   : > { %1176 = vmatprep.mubr.f32.mxu1 %v2335_v0 }
  0xc7   : > { %1016 = vmatmul.mubr.f32.gmra.mrb[48].mxu0 %v2565_v53 }
  0xc8   : > { %1177 = vmatmul.mubr.f32.gmra.mrb[48].mxu1 %v2565_v53  ;;  %1021 = vmatprep.mubr.f32.mxu0 %v2335_v0 }
  0xc9   : > { %1182 = vmatprep.mubr.f32.mxu1 %v2335_v0 }
  0xcb   : > { %1022 = vmatmul.mubr.f32.gmra.mrb[50].mxu0 %v2574_v58 }
  0xcc   : > { %1183 = vmatmul.mubr.f32.gmra.mrb[50].mxu1 %v2574_v58  ;;  %1027 = vmatprep.mubr.f32.mxu0 %v2335_v0 }
  0xcd   : > { %1188 = vmatprep.mubr.f32.mxu1 %v2335_v0 }
  0xcf   : > { %1028 = vmatmul.mubr.f32.gmra.mrb[52].mxu0 %v2583_v62 }
  0xd0   : > { %1189 = vmatmul.mubr.f32.gmra.mrb[52].mxu1 %v2583_v62  ;;  %1033 = vmatprep.mubr.f32.mxu0 %v2335_v0 }
  0xd1   : > { %1194 = vmatprep.mubr.f32.mxu1 %v2335_v0 }
  0xd3   : > { %1034 = vmatmul.mubr.f32.gmra.mrb[54].mxu0 %v2592_v4 }
  0xd4   : > { %1195 = vmatmul.mubr.f32.gmra.mrb[54].mxu1 %v2592_v4  ;;  %1039 = vmatprep.mubr.f32.mxu0 %v2335_v0 }
  0xd5   : > { %1200 = vmatprep.mubr.f32.mxu1 %v2335_v0 }
  0xd7   : > { %1040 = vmatmul.mubr.f32.gmra.mrb[56].mxu0 %v2601_v9 }
  0xd8   : > { %1201 = vmatmul.mubr.f32.gmra.mrb[56].mxu1 %v2601_v9  ;;  %1045 = vmatprep.mubr.f32.mxu0 %v2335_v0 }
  0xd9   : > { %1206 = vmatprep.mubr.f32.mxu1 %v2335_v0 }
  0xdb   : > { %1046 = vmatmul.mubr.f32.gmra.mrb[58].mxu0 %v2610_v13 }
  0xdc   : > { %1207 = vmatmul.mubr.f32.gmra.mrb[58].mxu1 %v2610_v13  ;;  %1051 = vmatprep.mubr.f32.mxu0 %v2335_v0 }
  0xdd   : > { %1212 = vmatprep.mubr.f32.mxu1 %v2335_v0 }
  0xdf   : > { %1052 = vmatmul.mubr.f32.gmra.mrb[60].mxu0 %v2618_v16 }
  0xe0   : > { %1213 = vmatmul.mubr.f32.gmra.mrb[60].mxu1 %v2618_v16  ;;  %1057 = vmatprep.mubr.f32.mxu0 %v2335_v0 }
  0xe1   : > { %1218 = vmatprep.mubr.f32.mxu1 %v2335_v0  ;;  %v2703_v0 = vrot.slane %v539_v20, %v555_v8 }
  0xe3   : > { %1058 = vmatmul.mubr.f32.gmra.mrb[62].mxu0 %v2625_v19 }
  0xe4   : > { %1219 = vmatmul.mubr.f32.gmra.mrb[62].mxu1 %v2625_v19 }
 0x13a   : > { %v647_v25 = vpop.f32.mrb[0].mxu0 }
 0x13b   : > { %v648_v30 = vadd.f32 %v647_v25, %v2697_v18  ;;  %v808_v31 = vpop.f32.mrb[0].mxu1  ;;  %v649_v32 = vpop.f32.mrb[1].mxu0 }
 0x13c   : > { %v809_v35 = vadd.f32 %v808_v31, %v2699_v23  ;;  %v650_v36 = vadd.f32 %v649_v32, %v2701_v24  ;;  %v810_v38 = vpop.f32.mrb[1].mxu1 }
 0x13d   : > { %1225 = vst [vmem:[%s2708_s23] sm:$0xff] %v648_v30  ;;  %v811_v39 = vadd.f32 %v810_v38, %v2703_v0  ;;  %v1580_v44 = vmul.f32 %v648_v30, %v648_v30 }
 0x13e   : > { %1227 = vst [vmem:[%s2708_s23 + $0x10] sm:$0xff] %v809_v35  ;;  %1226 = vst [vmem:[%s2708_s23 + $0x8] sm:$0xff] %v650_v36  ;;  %v653_v40 = vpop.f32.mrb[2].mxu0  ;;  %v1582_v50 = vmul.f32 %v809_v35, %v809_v35  ;;  %v1581_v51 = vmul.f32 %v650_v36, %v650_v36 }
 0x13f   : > { %1228 = vst [vmem:[%s2708_s23 + $0x18] sm:$0xff] %v811_v39  ;;  %v654_v45 = vadd.f32 %v653_v40, %v2697_v18  ;;  %v814_v46 = vpop.f32.mrb[2].mxu1  ;;  %v655_v47 = vpop.f32.mrb[3].mxu0  ;;  %v1583_v57 = vmul.f32 %v811_v39, %v811_v39 }
 0x140   : > { %v815_v53 = vadd.f32 %v814_v46, %v2699_v23  ;;  %v656_v55 = vadd.f32 %v655_v47, %v2701_v24  ;;  %v816_v56 = vpop.f32.mrb[3].mxu1 }
 0x141   : > { %1233 = vst [vmem:[%s2708_s23 + $0x40] sm:$0xff] %v654_v45  ;;  %v1353_v58 = vadd.f32 %v654_v45, %v648_v30  ;;  %v1588_v59 = vmul.f32 %v654_v45, %v654_v45  ;;  %v817_v60 = vadd.f32 %v816_v56, %v2703_v0 }
 0x142   : > { %1235 = vst [vmem:[%s2708_s23 + $0x50] sm:$0xff] %v815_v53  ;;  %v1395_v61 = vadd.f32 %v815_v53, %v809_v35  ;;  %v1590_v62 = vmul.f32 %v815_v53, %v815_v53  ;;  %1234 = vst [vmem:[%s2708_s23 + $0x48] sm:$0xff] %v656_v55  ;;  %v1374_v63 = vadd.f32 %v656_v55, %v650_v36  ;;  %v659_v2 = vpop.f32.mrb[4].mxu0 }
 0x143   : > { %v1589_v1 = vmul.f32 %v656_v55, %v656_v55  ;;  %v1708_v4 = vadd.f32 %v1588_v59, %v1580_v44  ;;  %1236 = vst [vmem:[%s2708_s23 + $0x58] sm:$0xff] %v817_v60  ;;  %v1416_v5 = vadd.f32 %v817_v60, %v811_v39  ;;  %v1591_v6 = vmul.f32 %v817_v60, %v817_v60  ;;  %v820_v9 = vpop.f32.mrb[4].mxu1  ;;  %v661_v10 = vpop.f32.mrb[5].mxu0 }
 0x144   : > { %v660_v7 = vadd.f32 %v659_v2, %v2697_v18  ;;  %v1750_v11 = vadd.f32 %v1590_v62, %v1582_v50  ;;  %v821_v13 = vadd.f32 %v820_v9, %v2699_v23  ;;  %v662_v14 = vadd.f32 %v661_v10, %v2701_v24  ;;  %v822_v15 = vpop.f32.mrb[5].mxu1 }
 0x145   : > { %v1729_v12 = vadd.f32 %v1589_v1, %v1581_v51  ;;  %v1771_v16 = vadd.f32 %v1591_v6, %v1583_v57  ;;  %v823_v29 = vadd.f32 %v822_v15, %v2703_v0 }
 0x146   : > { %1241 = vst [vmem:[%s2708_s23 + $0x80] sm:$0xff] %v660_v7  ;;  %v1354_v17 = vadd.f32 %v1353_v58, %v660_v7  ;;  %v1596_v19 = vmul.f32 %v660_v7, %v660_v7  ;;  %1243 = vst [vmem:[%s2708_s23 + $0x90] sm:$0xff] %v821_v13  ;;  %v1396_v52 = vadd.f32 %v1395_v61, %v821_v13  ;;  %v665_v54 = vpop.f32.mrb[6].mxu0 }
 0x147   : > { %v1598_v3 = vmul.f32 %v821_v13, %v821_v13  ;;  %1242 = vst [vmem:[%s2708_s23 + $0x88] sm:$0xff] %v662_v14  ;;  %v1375_v20 = vadd.f32 %v1374_v63, %v662_v14  ;;  %v1597_v37 = vmul.f32 %v662_v14, %v662_v14  ;;  %1244 = vst [vmem:[%s2708_s23 + $0x98] sm:$0xff] %v823_v29  ;;  %v826_v26 = vpop.f32.mrb[6].mxu1  ;;  %v667_v27 = vpop.f32.mrb[7].mxu0 }
 0x148   : > { %v1709_v8 = vadd.f32 %v1708_v4, %v1596_v19  ;;  %v1417_v21 = vadd.f32 %v1416_v5, %v823_v29  ;;  %v1599_v22 = vmul.f32 %v823_v29, %v823_v29  ;;  %v666_v25 = vadd.f32 %v665_v54, %v2697_v18  ;;  %v828_v33 = vpop.f32.mrb[7].mxu1 }
 0x149   : > { %v1751_v28 = vadd.f32 %v1750_v11, %v1598_v3  ;;  %v1730_v30 = vadd.f32 %v1729_v12, %v1597_v37  ;;  %v827_v31 = vadd.f32 %v826_v26, %v2699_v23  ;;  %v668_v32 = vadd.f32 %v667_v27, %v2701_v24 }
 0x14a   : > { %v1772_v34 = vadd.f32 %v1771_v16, %v1599_v22  ;;  %1249 = vst [vmem:[%s2708_s23 + $0xc0] sm:$0xff] %v666_v25  ;;  %v1355_v35 = vadd.f32 %v1354_v17, %v666_v25  ;;  %v1604_v36 = vmul.f32 %v666_v25, %v666_v25  ;;  %v829_v38 = vadd.f32 %v828_v33, %v2703_v0  ;;  %v671_v46 = vpop.f32.mrb[8].mxu0 }
 0x14b   : > { %1251 = vst [vmem:[%s2708_s23 + $0xd0] sm:$0xff] %v827_v31  ;;  %v1397_v39 = vadd.f32 %v1396_v52, %v827_v31  ;;  %v1606_v40 = vmul.f32 %v827_v31, %v827_v31  ;;  %1250 = vst [vmem:[%s2708_s23 + $0xc8] sm:$0xff] %v668_v32  ;;  %v1376_v44 = vadd.f32 %v1375_v20, %v668_v32  ;;  %v832_v55 = vpop.f32.mrb[8].mxu1  ;;  %v673_v56 = vpop.f32.mrb[9].mxu0 }
 0x14c   : > { %v1605_v45 = vmul.f32 %v668_v32, %v668_v32  ;;  %v1710_v47 = vadd.f32 %v1709_v8, %v1604_v36  ;;  %1252 = vst [vmem:[%s2708_s23 + $0xd8] sm:$0xff] %v829_v38  ;;  %v1418_v50 = vadd.f32 %v1417_v21, %v829_v38  ;;  %v1607_v51 = vmul.f32 %v829_v38, %v829_v38  ;;  %v834_v61 = vpop.f32.mrb[9].mxu1 }
 0x14d   : > { %v672_v53 = vadd.f32 %v671_v46, %v2697_v18  ;;  %v1752_v57 = vadd.f32 %v1751_v28, %v1606_v40  ;;  %v833_v59 = vadd.f32 %v832_v55, %v2699_v23  ;;  %v674_v60 = vadd.f32 %v673_v56, %v2701_v24 }
 0x14e   : > { %v1731_v58 = vadd.f32 %v1730_v30, %v1605_v45  ;;  %v1773_v62 = vadd.f32 %v1772_v34, %v1607_v51  ;;  %v835_v2 = vadd.f32 %v834_v61, %v2703_v0  ;;  %v677_v9 = vpop.f32.mrb[10].mxu0 }
 0x14f   : > { %1257 = vst [vmem:[%s2708_s23 + $0x100] sm:$0xff] %v672_v53  ;;  %v1356_v63 = vadd.f32 %v1355_v35, %v672_v53  ;;  %v1612_v1 = vmul.f32 %v672_v53, %v672_v53  ;;  %1259 = vst [vmem:[%s2708_s23 + $0x110] sm:$0xff] %v833_v59  ;;  %v1398_v4 = vadd.f32 %v1397_v39, %v833_v59  ;;  %v838_v14 = vpop.f32.mrb[10].mxu1  ;;  %v679_v15 = vpop.f32.mrb[11].mxu0 }
 0x150   : > { %v1614_v5 = vmul.f32 %v833_v59, %v833_v59  ;;  %1258 = vst [vmem:[%s2708_s23 + $0x108] sm:$0xff] %v674_v60  ;;  %v1377_v6 = vadd.f32 %v1376_v44, %v674_v60  ;;  %v1613_v7 = vmul.f32 %v674_v60, %v674_v60  ;;  %1260 = vst [vmem:[%s2708_s23 + $0x118] sm:$0xff] %v835_v2  ;;  %v840_v52 = vpop.f32.mrb[11].mxu1 }
 0x151   : > { %v1711_v10 = vadd.f32 %v1710_v47, %v1612_v1  ;;  %v1419_v11 = vadd.f32 %v1418_v50, %v835_v2  ;;  %v1615_v12 = vmul.f32 %v835_v2, %v835_v2  ;;  %v678_v13 = vadd.f32 %v677_v9, %v2697_v18 }
 0x152   : > { %v1753_v16 = vadd.f32 %v1752_v57, %v1614_v5  ;;  %v1732_v17 = vadd.f32 %v1731_v58, %v1613_v7  ;;  %v839_v19 = vadd.f32 %v838_v14, %v2699_v23  ;;  %v680_v29 = vadd.f32 %v679_v15, %v2701_v24  ;;  %v683_v26 = vpop.f32.mrb[12].mxu0 }
 0x153   : > { %v1774_v3 = vadd.f32 %v1773_v62, %v1615_v12  ;;  %1265 = vst [vmem:[%s2708_s23 + $0x140] sm:$0xff] %v678_v13  ;;  %v1357_v20 = vadd.f32 %v1356_v63, %v678_v13  ;;  %v1620_v37 = vmul.f32 %v678_v13, %v678_v13  ;;  %v841_v54 = vadd.f32 %v840_v52, %v2703_v0  ;;  %v844_v32 = vpop.f32.mrb[12].mxu1  ;;  %v685_v33 = vpop.f32.mrb[13].mxu0 }
 0x154   : > { %1267 = vst [vmem:[%s2708_s23 + $0x150] sm:$0xff] %v839_v19  ;;  %v1399_v8 = vadd.f32 %v1398_v4, %v839_v19  ;;  %v1622_v21 = vmul.f32 %v839_v19, %v839_v19  ;;  %1266 = vst [vmem:[%s2708_s23 + $0x148] sm:$0xff] %v680_v29  ;;  %v1378_v22 = vadd.f32 %v1377_v6, %v680_v29  ;;  %v846_v39 = vpop.f32.mrb[13].mxu1 }
 0x155   : > { %v1621_v25 = vmul.f32 %v680_v29, %v680_v29  ;;  %v1712_v27 = vadd.f32 %v1711_v10, %v1620_v37  ;;  %1268 = vst [vmem:[%s2708_s23 + $0x158] sm:$0xff] %v841_v54  ;;  %v1420_v28 = vadd.f32 %v1419_v11, %v841_v54  ;;  %v1623_v30 = vmul.f32 %v841_v54, %v841_v54 }
 0x156   : > { %v684_v31 = vadd.f32 %v683_v26, %v2697_v18  ;;  %v1754_v34 = vadd.f32 %v1753_v16, %v1622_v21  ;;  %v845_v36 = vadd.f32 %v844_v32, %v2699_v23  ;;  %v686_v38 = vadd.f32 %v685_v33, %v2701_v24  ;;  %v689_v55 = vpop.f32.mrb[14].mxu0 }
 0x157   : > { %v1733_v35 = vadd.f32 %v1732_v17, %v1621_v25  ;;  %v1775_v40 = vadd.f32 %v1774_v3, %v1623_v30  ;;  %v847_v46 = vadd.f32 %v846_v39, %v2703_v0  ;;  %v690_v59 = vadd.f32 %v689_v55, %v2697_v18  ;;  %v850_v60 = vpop.f32.mrb[14].mxu1  ;;  %v691_v61 = vpop.f32.mrb[15].mxu0 }
 0x158   : > { %1273 = vst [vmem:[%s2708_s23 + $0x180] sm:$0xff] %v684_v31  ;;  %v1358_v44 = vadd.f32 %v1357_v20, %v684_v31  ;;  %v1628_v45 = vmul.f32 %v684_v31, %v684_v31  ;;  %1275 = vst [vmem:[%s2708_s23 + $0x190] sm:$0xff] %v845_v36  ;;  %v1400_v47 = vadd.f32 %v1399_v8, %v845_v36  ;;  %v852_v4 = vpop.f32.mrb[15].mxu1 }
 0x159   : > { %v1630_v50 = vmul.f32 %v845_v36, %v845_v36  ;;  %1274 = vst [vmem:[%s2708_s23 + $0x188] sm:$0xff] %v686_v38  ;;  %v1379_v51 = vadd.f32 %v1378_v22, %v686_v38  ;;  %v1629_v53 = vmul.f32 %v686_v38, %v686_v38  ;;  %1276 = vst [vmem:[%s2708_s23 + $0x198] sm:$0xff] %v847_v46 }
 0x15a   : > { %v1713_v56 = vadd.f32 %v1712_v27, %v1628_v45  ;;  %v1421_v57 = vadd.f32 %v1420_v28, %v847_v46  ;;  %v1631_v58 = vmul.f32 %v847_v46, %v847_v46  ;;  %v851_v1 = vadd.f32 %v850_v60, %v2699_v23  ;;  %1281 = vst [vmem:[%s2708_s23 + $0x1c0] sm:$0xff] %v690_v59  ;;  %v695_v14 = vpop.f32.mrb[16].mxu0 }
 0x15b   : > { %v1755_v62 = vadd.f32 %v1754_v34, %v1630_v50  ;;  %v1734_v63 = vadd.f32 %v1733_v35, %v1629_v53  ;;  %v692_v2 = vadd.f32 %v691_v61, %v2701_v24  ;;  %v1359_v6 = vadd.f32 %v1358_v44, %v690_v59  ;;  %v856_v29 = vpop.f32.mrb[16].mxu1  ;;  %v697_v52 = vpop.f32.mrb[17].mxu0 }
 0x15c   : > { %v1776_v5 = vadd.f32 %v1775_v40, %v1631_v58  ;;  %v1636_v7 = vmul.f32 %v690_v59, %v690_v59  ;;  %v853_v9 = vadd.f32 %v852_v4, %v2703_v0  ;;  %1283 = vst [vmem:[%s2708_s23 + $0x1d0] sm:$0xff] %v851_v1  ;;  %v1401_v10 = vadd.f32 %v1400_v47, %v851_v1  ;;  %v858_v8 = vpop.f32.mrb[17].mxu1 }
 0x15d   : > { %v1638_v11 = vmul.f32 %v851_v1, %v851_v1  ;;  %1282 = vst [vmem:[%s2708_s23 + $0x1c8] sm:$0xff] %v692_v2  ;;  %v1380_v12 = vadd.f32 %v1379_v51, %v692_v2  ;;  %v1637_v13 = vmul.f32 %v692_v2, %v692_v2  ;;  %v696_v19 = vadd.f32 %v695_v14, %v2697_v18 }
 0x15e   : > { %v1714_v15 = vadd.f32 %v1713_v56, %v1636_v7  ;;  %1284 = vst [vmem:[%s2708_s23 + $0x1d8] sm:$0xff] %v853_v9  ;;  %v1422_v16 = vadd.f32 %v1421_v57, %v853_v9  ;;  %v1639_v17 = vmul.f32 %v853_v9, %v853_v9  ;;  %v857_v37 = vadd.f32 %v856_v29, %v2699_v23  ;;  %v701_v32 = vpop.f32.mrb[18].mxu0 }
 0x15f   : > { %v1756_v3 = vadd.f32 %v1755_v62, %v1638_v11  ;;  %v1735_v20 = vadd.f32 %v1734_v63, %v1637_v13  ;;  %v698_v54 = vadd.f32 %v697_v52, %v2701_v24  ;;  %1289 = vst [vmem:[%s2708_s23 + $0x200] sm:$0xff] %v696_v19  ;;  %v1360_v22 = vadd.f32 %v1359_v6, %v696_v19  ;;  %v862_v38 = vpop.f32.mrb[18].mxu1  ;;  %v703_v39 = vpop.f32.mrb[19].mxu0 }
 0x160   : > { %v1777_v21 = vadd.f32 %v1776_v5, %v1639_v17  ;;  %v1644_v25 = vmul.f32 %v696_v19, %v696_v19  ;;  %v859_v26 = vadd.f32 %v858_v8, %v2703_v0  ;;  %1291 = vst [vmem:[%s2708_s23 + $0x210] sm:$0xff] %v857_v37  ;;  %v1402_v27 = vadd.f32 %v1401_v10, %v857_v37  ;;  %v864_v47 = vpop.f32.mrb[19].mxu1 }
 0x161   : > { %v1646_v28 = vmul.f32 %v857_v37, %v857_v37  ;;  %1290 = vst [vmem:[%s2708_s23 + $0x208] sm:$0xff] %v698_v54  ;;  %v1381_v30 = vadd.f32 %v1380_v12, %v698_v54  ;;  %v1645_v31 = vmul.f32 %v698_v54, %v698_v54  ;;  %v702_v36 = vadd.f32 %v701_v32, %v2697_v18 }
 0x162   : > { %v1715_v33 = vadd.f32 %v1714_v15, %v1644_v25  ;;  %1292 = vst [vmem:[%s2708_s23 + $0x218] sm:$0xff] %v859_v26  ;;  %v1423_v34 = vadd.f32 %v1422_v16, %v859_v26  ;;  %v1647_v35 = vmul.f32 %v859_v26, %v859_v26  ;;  %v863_v45 = vadd.f32 %v862_v38, %v2699_v23  ;;  %v707_v60 = vpop.f32.mrb[20].mxu0 }
 0x163   : > { %v1757_v40 = vadd.f32 %v1756_v3, %v1646_v28  ;;  %v1736_v44 = vadd.f32 %v1735_v20, %v1645_v31  ;;  %v704_v46 = vadd.f32 %v703_v39, %v2701_v24  ;;  %1297 = vst [vmem:[%s2708_s23 + $0x240] sm:$0xff] %v702_v36  ;;  %v1361_v51 = vadd.f32 %v1360_v22, %v702_v36  ;;  %v868_v2 = vpop.f32.mrb[20].mxu1  ;;  %v709_v4 = vpop.f32.mrb[21].mxu0 }
 0x164   : > { %v1778_v50 = vadd.f32 %v1777_v21, %v1647_v35  ;;  %v1652_v53 = vmul.f32 %v702_v36, %v702_v36  ;;  %v865_v55 = vadd.f32 %v864_v47, %v2703_v0  ;;  %1299 = vst [vmem:[%s2708_s23 + $0x250] sm:$0xff] %v863_v45  ;;  %v1403_v56 = vadd.f32 %v1402_v27, %v863_v45  ;;  %v870_v10 = vpop.f32.mrb[21].mxu1 }
 0x165   : > { %v1654_v57 = vmul.f32 %v863_v45, %v863_v45  ;;  %1298 = vst [vmem:[%s2708_s23 + $0x248] sm:$0xff] %v704_v46  ;;  %v1382_v58 = vadd.f32 %v1381_v30, %v704_v46  ;;  %v1653_v59 = vmul.f32 %v704_v46, %v704_v46  ;;  %v708_v1 = vadd.f32 %v707_v60, %v2697_v18 }
 0x166   : > { %v1716_v61 = vadd.f32 %v1715_v33, %v1652_v53  ;;  %1300 = vst [vmem:[%s2708_s23 + $0x258] sm:$0xff] %v865_v55  ;;  %v1424_v62 = vadd.f32 %v1423_v34, %v865_v55  ;;  %v1655_v63 = vmul.f32 %v865_v55, %v865_v55  ;;  %v869_v7 = vadd.f32 %v868_v2, %v2699_v23  ;;  %v713_v29 = vpop.f32.mrb[22].mxu0 }
 0x167   : > { %v1758_v5 = vadd.f32 %v1757_v40, %v1654_v57  ;;  %v1737_v6 = vadd.f32 %v1736_v44, %v1653_v59  ;;  %v710_v9 = vadd.f32 %v709_v4, %v2701_v24  ;;  %1305 = vst [vmem:[%s2708_s23 + $0x280] sm:$0xff] %v708_v1  ;;  %v1362_v12 = vadd.f32 %v1361_v51, %v708_v1  ;;  %v874_v54 = vpop.f32.mrb[22].mxu1  ;;  %v715_v8 = vpop.f32.mrb[23].mxu0 }
 0x168   : > { %v1779_v11 = vadd.f32 %v1778_v50, %v1655_v63  ;;  %v1660_v13 = vmul.f32 %v708_v1, %v708_v1  ;;  %v871_v14 = vadd.f32 %v870_v10, %v2703_v0  ;;  %1307 = vst [vmem:[%s2708_s23 + $0x290] sm:$0xff] %v869_v7  ;;  %v1404_v15 = vadd.f32 %v1403_v56, %v869_v7  ;;  %v876_v27 = vpop.f32.mrb[23].mxu1 }
 0x169   : > { %v1662_v16 = vmul.f32 %v869_v7, %v869_v7  ;;  %1306 = vst [vmem:[%s2708_s23 + $0x288] sm:$0xff] %v710_v9  ;;  %v1383_v17 = vadd.f32 %v1382_v58, %v710_v9  ;;  %v1661_v19 = vmul.f32 %v710_v9, %v710_v9  ;;  %v714_v37 = vadd.f32 %v713_v29, %v2697_v18 }
 0x16a   : > { %v1717_v52 = vadd.f32 %v1716_v61, %v1660_v13  ;;  %1308 = vst [vmem:[%s2708_s23 + $0x298] sm:$0xff] %v871_v14  ;;  %v1425_v3 = vadd.f32 %v1424_v62, %v871_v14  ;;  %v1663_v20 = vmul.f32 %v871_v14, %v871_v14  ;;  %v875_v25 = vadd.f32 %v874_v54, %v2699_v23  ;;  %v719_v38 = vpop.f32.mrb[24].mxu0 }
 0x16b   : > { %v1759_v21 = vadd.f32 %v1758_v5, %v1662_v16  ;;  %v1738_v22 = vadd.f32 %v1737_v6, %v1661_v19  ;;  %v716_v26 = vadd.f32 %v715_v8, %v2701_v24  ;;  %1313 = vst [vmem:[%s2708_s23 + $0x2c0] sm:$0xff] %v714_v37  ;;  %v1363_v30 = vadd.f32 %v1362_v12, %v714_v37  ;;  %v880_v46 = vpop.f32.mrb[24].mxu1  ;;  %v721_v47 = vpop.f32.mrb[25].mxu0 }
 0x16c   : > { %v1780_v28 = vadd.f32 %v1779_v11, %v1663_v20  ;;  %v1668_v31 = vmul.f32 %v714_v37, %v714_v37  ;;  %v877_v32 = vadd.f32 %v876_v27, %v2703_v0  ;;  %1315 = vst [vmem:[%s2708_s23 + $0x2d0] sm:$0xff] %v875_v25  ;;  %v1405_v33 = vadd.f32 %v1404_v15, %v875_v25  ;;  %v882_v56 = vpop.f32.mrb[25].mxu1 }
 0x16d   : > { %v1670_v34 = vmul.f32 %v875_v25, %v875_v25  ;;  %1314 = vst [vmem:[%s2708_s23 + $0x2c8] sm:$0xff] %v716_v26  ;;  %v1384_v35 = vadd.f32 %v1383_v17, %v716_v26  ;;  %v1669_v36 = vmul.f32 %v716_v26, %v716_v26  ;;  %v720_v45 = vadd.f32 %v719_v38, %v2697_v18 }
 0x16e   : > { %v1718_v39 = vadd.f32 %v1717_v52, %v1668_v31  ;;  %1316 = vst [vmem:[%s2708_s23 + $0x2d8] sm:$0xff] %v877_v32  ;;  %v1426_v40 = vadd.f32 %v1425_v3, %v877_v32  ;;  %v1671_v44 = vmul.f32 %v877_v32, %v877_v32  ;;  %v881_v53 = vadd.f32 %v880_v46, %v2699_v23  ;;  %v725_v2 = vpop.f32.mrb[26].mxu0 }
 0x16f   : > { %v1760_v50 = vadd.f32 %v1759_v21, %v1670_v34  ;;  %v1739_v51 = vadd.f32 %v1738_v22, %v1669_v36  ;;  %v722_v55 = vadd.f32 %v721_v47, %v2701_v24  ;;  %1321 = vst [vmem:[%s2708_s23 + $0x300] sm:$0xff] %v720_v45  ;;  %v1364_v58 = vadd.f32 %v1363_v30, %v720_v45  ;;  %v886_v9 = vpop.f32.mrb[26].mxu1  ;;  %v727_v10 = vpop.f32.mrb[27].mxu0 }
 0x170   : > { %v1781_v57 = vadd.f32 %v1780_v28, %v1671_v44  ;;  %v1676_v59 = vmul.f32 %v720_v45, %v720_v45  ;;  %v883_v60 = vadd.f32 %v882_v56, %v2703_v0  ;;  %1323 = vst [vmem:[%s2708_s23 + $0x310] sm:$0xff] %v881_v53  ;;  %v1406_v61 = vadd.f32 %v1405_v33, %v881_v53  ;;  %v888_v15 = vpop.f32.mrb[27].mxu1 }
 0x171   : > { %v1678_v62 = vmul.f32 %v881_v53, %v881_v53  ;;  %1322 = vst [vmem:[%s2708_s23 + $0x308] sm:$0xff] %v722_v55  ;;  %v1385_v63 = vadd.f32 %v1384_v35, %v722_v55  ;;  %v1677_v1 = vmul.f32 %v722_v55, %v722_v55  ;;  %v726_v7 = vadd.f32 %v725_v2, %v2697_v18 }
 0x172   : > { %v1719_v4 = vadd.f32 %v1718_v39, %v1676_v59  ;;  %1324 = vst [vmem:[%s2708_s23 + $0x318] sm:$0xff] %v883_v60  ;;  %v1427_v5 = vadd.f32 %v1426_v40, %v883_v60  ;;  %v1679_v6 = vmul.f32 %v883_v60, %v883_v60  ;;  %v887_v13 = vadd.f32 %v886_v9, %v2699_v23  ;;  %v731_v54 = vpop.f32.mrb[28].mxu0 }
 0x173   : > { %v1761_v11 = vadd.f32 %v1760_v50, %v1678_v62  ;;  %v1740_v12 = vadd.f32 %v1739_v51, %v1677_v1  ;;  %v728_v14 = vadd.f32 %v727_v10, %v2701_v24  ;;  %1329 = vst [vmem:[%s2708_s23 + $0x340] sm:$0xff] %v726_v7  ;;  %v1365_v17 = vadd.f32 %v1364_v58, %v726_v7  ;;  %v892_v26 = vpop.f32.mrb[28].mxu1  ;;  %v733_v27 = vpop.f32.mrb[29].mxu0 }
 0x174   : > { %v1782_v16 = vadd.f32 %v1781_v57, %v1679_v6  ;;  %v1684_v19 = vmul.f32 %v726_v7, %v726_v7  ;;  %v889_v29 = vadd.f32 %v888_v15, %v2703_v0  ;;  %1331 = vst [vmem:[%s2708_s23 + $0x350] sm:$0xff] %v887_v13  ;;  %v1407_v52 = vadd.f32 %v1406_v61, %v887_v13  ;;  %v894_v33 = vpop.f32.mrb[29].mxu1 }
 0x175   : > { %v1686_v3 = vmul.f32 %v887_v13, %v887_v13  ;;  %1330 = vst [vmem:[%s2708_s23 + $0x348] sm:$0xff] %v728_v14  ;;  %v1386_v20 = vadd.f32 %v1385_v63, %v728_v14  ;;  %v1685_v37 = vmul.f32 %v728_v14, %v728_v14  ;;  %v732_v25 = vadd.f32 %v731_v54, %v2697_v18 }
 0x176   : > { %v1720_v8 = vadd.f32 %v1719_v4, %v1684_v19  ;;  %1332 = vst [vmem:[%s2708_s23 + $0x358] sm:$0xff] %v889_v29  ;;  %v1428_v21 = vadd.f32 %v1427_v5, %v889_v29  ;;  %v1687_v22 = vmul.f32 %v889_v29, %v889_v29  ;;  %v893_v31 = vadd.f32 %v892_v26, %v2699_v23  ;;  %v737_v46 = vpop.f32.mrb[30].mxu0 }
 0x177   : > { %v1762_v28 = vadd.f32 %v1761_v11, %v1686_v3  ;;  %v1741_v30 = vadd.f32 %v1740_v12, %v1685_v37  ;;  %v734_v32 = vadd.f32 %v733_v27, %v2701_v24  ;;  %1337 = vst [vmem:[%s2708_s23 + $0x380] sm:$0xff] %v732_v25  ;;  %v1366_v35 = vadd.f32 %v1365_v17, %v732_v25  ;;  %v898_v55 = vpop.f32.mrb[30].mxu1  ;;  %v739_v56 = vpop.f32.mrb[31].mxu0 }
 0x178   : > { %v1783_v34 = vadd.f32 %v1782_v16, %v1687_v22  ;;  %v1692_v36 = vmul.f32 %v732_v25, %v732_v25  ;;  %v895_v38 = vadd.f32 %v894_v33, %v2703_v0  ;;  %1339 = vst [vmem:[%s2708_s23 + $0x390] sm:$0xff] %v893_v31  ;;  %v1408_v39 = vadd.f32 %v1407_v52, %v893_v31  ;;  %v900_v61 = vpop.f32.mrb[31].mxu1 }
 0x179   : > { %v1694_v40 = vmul.f32 %v893_v31, %v893_v31  ;;  %1338 = vst [vmem:[%s2708_s23 + $0x388] sm:$0xff] %v734_v32  ;;  %v1387_v44 = vadd.f32 %v1386_v20, %v734_v32  ;;  %v1693_v45 = vmul.f32 %v734_v32, %v734_v32  ;;  %v738_v53 = vadd.f32 %v737_v46, %v2697_v18 }
 0x17a   : > { %v1721_v47 = vadd.f32 %v1720_v8, %v1692_v36  ;;  %1340 = vst [vmem:[%s2708_s23 + $0x398] sm:$0xff] %v895_v38  ;;  %v1429_v50 = vadd.f32 %v1428_v21, %v895_v38  ;;  %v1695_v51 = vmul.f32 %v895_v38, %v895_v38  ;;  %v899_v59 = vadd.f32 %v898_v55, %v2699_v23  ;;  %v2847_v7 = vpop.f32.mrb[32].mxu0 }
 0x17b   : > { %v1763_v57 = vadd.f32 %v1762_v28, %v1694_v40  ;;  %v1742_v58 = vadd.f32 %v1741_v30, %v1693_v45  ;;  %v740_v60 = vadd.f32 %v739_v56, %v2701_v24  ;;  %1345 = vst [vmem:[%s2708_s23 + $0x3c0] sm:$0xff] %v738_v53  ;;  %v1367_v63 = vadd.f32 %v1366_v35, %v738_v53  ;;  %v2850_v11 = vpop.f32.mrb[32].mxu1  ;;  %v2852_v12 = vpop.f32.mrb[33].mxu0 }
 0x17c   : > { %v1784_v62 = vadd.f32 %v1783_v34, %v1695_v51  ;;  %v1700_v1 = vmul.f32 %v738_v53, %v738_v53  ;;  %v901_v2 = vadd.f32 %v900_v61, %v2703_v0  ;;  %1347 = vst [vmem:[%s2708_s23 + $0x3d0] sm:$0xff] %v899_v59  ;;  %v1409_v4 = vadd.f32 %v1408_v39, %v899_v59  ;;  %v2854_v16 = vpop.f32.mrb[33].mxu1 }
 0x17d   : > { %v1702_v18 = vmul.f32 %v899_v59, %v899_v59  ;;  %1346 = vst [vmem:[%s2708_s23 + $0x3c8] sm:$0xff] %v740_v60  ;;  %v1388_v5 = vadd.f32 %v1387_v44, %v740_v60  ;;  %v1701_v6 = vmul.f32 %v740_v60, %v740_v60  ;;  %v1368_v9 = vrot.slane %v1367_v63, 4 }
 0x17e   : > { %v1722_v23 = vadd.f32 %v1721_v47, %v1700_v1  ;;  %1348 = vst [vmem:[%s2708_s23 + $0x3d8] sm:$0xff] %v901_v2  ;;  %v1430_v24 = vadd.f32 %v1429_v50, %v901_v2  ;;  %v1703_v10 = vmul.f32 %v901_v2, %v901_v2  ;;  %v1410_v13 = vrot.slane %v1409_v4, 4  ;;  %v2856_v8 = vpop.f32.mrb[34].mxu0 }
 0x17f   : > { %v1764_v14 = vadd.f32 %v1763_v57, %v1702_v18  ;;  %v1389_v0 = vrot.slane %v1388_v5, 4  ;;  %v1743_v15 = vadd.f32 %v1742_v58, %v1701_v6  ;;  %v1369_v17 = vadd.f32 %v1368_v9, %v1367_v63  ;;  %v2858_v27 = vpop.f32.mrb[34].mxu1  ;;  %v2860_v28 = vpop.f32.mrb[35].mxu0 }
 0x180   : > { %v1723_v19 = vrot.slane %v1722_v23, 4  ;;  %v1431_v29 = vrot.slane %v1430_v24, 4  ;;  %v1785_v52 = vadd.f32 %v1784_v62, %v1703_v10  ;;  %v1411_v3 = vadd.f32 %v1410_v13, %v1409_v4  ;;  %v2862_v34 = vpop.f32.mrb[35].mxu1 }
 0x181   : > { %v1765_v20 = vrot.slane %v1764_v14, 4  ;;  %v1390_v37 = vadd.f32 %v1389_v0, %v1388_v5  ;;  %v1744_v54 = vrot.slane %v1743_v15, 4  ;;  %v1370_v21 = vrot.slane %v1369_v17, 2 }
 0x182   : > { %v1724_v22 = vadd.f32 %v1723_v19, %v1722_v23  ;;  %v1432_v25 = vadd.f32 %v1431_v29, %v1430_v24  ;;  %v1786_v26 = vrot.slane %v1785_v52, 4  ;;  %v1412_v30 = vrot.slane %v1411_v3, 2  ;;  %v2864_v47 = vpop.f32.mrb[36].mxu0 }
 0x183   : > { %v1766_v31 = vadd.f32 %v1765_v20, %v1764_v14  ;;  %v1391_v32 = vrot.slane %v1390_v37, 2  ;;  %v1745_v33 = vadd.f32 %v1744_v54, %v1743_v15  ;;  %v1371_v35 = vadd.f32 %v1370_v21, %v1369_v17  ;;  %v2866_v56 = vpop.f32.mrb[36].mxu1  ;;  %v2868_v57 = vpop.f32.mrb[37].mxu0 }
 0x184   : > { %v1725_v36 = vrot.slane %v1724_v22, 2  ;;  %v1433_v38 = vrot.slane %v1432_v25, 2  ;;  %v1787_v39 = vadd.f32 %v1786_v26, %v1785_v52  ;;  %v1413_v40 = vadd.f32 %v1412_v30, %v1411_v3  ;;  %v2870_v62 = vpop.f32.mrb[37].mxu1 }
 0x185   : > { %v1767_v44 = vrot.slane %v1766_v31, 2  ;;  %v1392_v45 = vadd.f32 %v1391_v32, %v1390_v37  ;;  %v1746_v46 = vrot.slane %v1745_v33, 2  ;;  %v1372_v50 = vrot.slane %v1371_v35, 1 }
 0x186   : > { %v1726_v51 = vadd.f32 %v1725_v36, %v1724_v22  ;;  %v1434_v53 = vadd.f32 %v1433_v38, %v1432_v25  ;;  %v1788_v55 = vrot.slane %v1787_v39, 2  ;;  %v1414_v58 = vrot.slane %v1413_v40, 1  ;;  %v2872_v23 = vpop.f32.mrb[38].mxu0 }
 0x187   : > { %v1768_v59 = vadd.f32 %v1767_v44, %v1766_v31  ;;  %v1393_v60 = vrot.slane %v1392_v45, 1  ;;  %v1747_v61 = vadd.f32 %v1746_v46, %v1745_v33  ;;  %v1373_v63 = vadd.f32 %v1372_v50, %v1371_v35  ;;  %v2876_v0 = vpop.f32.mrb[38].mxu1  ;;  %v2878_v15 = vpop.f32.mrb[39].mxu0 }
 0x188   : > { %v1727_v1 = vrot.slane %v1726_v51, 1  ;;  %v1435_v2 = vrot.slane %v1434_v53, 1  ;;  %v1789_v4 = vadd.f32 %v1788_v55, %v1787_v39  ;;  %v1415_v18 = vadd.f32 %v1414_v58, %v1413_v40  ;;  %v2882_v3 = vpop.f32.mrb[39].mxu1 }
 0x189   : > { %v1769_v5 = vrot.slane %v1768_v59, 1  ;;  %v1394_v6 = vadd.f32 %v1393_v60, %v1392_v45  ;;  %v1748_v9 = vrot.slane %v1747_v61, 1  ;;  %v970_v14 = vadd.f32 %v2847_v7, %v2717_v41 }
 0x18a   : > { %v1728_v24 = vadd.f32 %v1727_v1, %v1726_v51  ;;  %v1436_v10 = vadd.f32 %v1435_v2, %v1434_v53  ;;  %v1790_v13 = vrot.slane %v1789_v4, 1  ;;  %v1131_v52 = vadd.f32 %v2850_v11, %v2719_v42  ;;  %v2893_v26 = vpop.f32.mrb[40].mxu0 }
 0x18b   : > { %v1770_v17 = vadd.f32 %v1769_v5, %v1768_v59  ;;  %v1529_v19 = vcombine.low %v1373_v63, %v1394_v6  ;;  %v1749_v29 = vadd.f32 %v1748_v9, %v1747_v61  ;;  %1229 = vst [vmem:[%s2708_s23 + $0x20] sm:$0xff] %v970_v14  ;;  %v972_v54 = vadd.f32 %v2852_v12, %v2721_v43  ;;  %v2901_v32 = vpop.f32.mrb[40].mxu1  ;;  %v2903_v33 = vpop.f32.mrb[41].mxu0 }
 0x18c   : > { %v1530_v20 = vcombine.low %v1415_v18, %v1436_v10  ;;  %v1791_v37 = vadd.f32 %v1790_v13, %v1789_v4  ;;  %v1584_v22 = vmul.f32 %v970_v14, %v970_v14  ;;  %1231 = vst [vmem:[%s2708_s23 + $0x30] sm:$0xff] %v1131_v52  ;;  %v1133_v25 = vadd.f32 %v2854_v16, %v2727_v49  ;;  %v2913_v39 = vpop.f32.mrb[41].mxu1 }
 0x18d   : > { %v2888_v7 = vrot.slane %v1529_v19, %v2725_v48  ;;  %v1884_v21 = vcombine.low %v1728_v24, %v1749_v29  ;;  %v1586_v31 = vmul.f32 %v1131_v52, %v1131_v52  ;;  %1230 = vst [vmem:[%s2708_s23 + $0x28] sm:$0xff] %v972_v54  ;;  %v976_v12 = vadd.f32 %v2856_v8, %v2717_v41 }
 0x18e   : > { %v2896_v11 = vrot.slane %v1530_v20, %v2725_v48  ;;  %v1885_v30 = vcombine.low %v1770_v17, %v1791_v37  ;;  %v1585_v35 = vmul.f32 %v972_v54, %v972_v54  ;;  %1232 = vst [vmem:[%s2708_s23 + $0x38] sm:$0xff] %v1133_v25  ;;  %v1137_v36 = vadd.f32 %v2858_v27, %v2719_v42  ;;  %v2923_v53 = vpop.f32.mrb[42].mxu0 }
 0x18f   : > { %v2906_v16 = vrot.slane %v1884_v21, %v2725_v48  ;;  %v978_v38 = vadd.f32 %v2860_v28, %v2721_v43  ;;  %1237 = vst [vmem:[%s2708_s23 + $0x60] sm:$0xff] %v976_v12  ;;  %v1437_v44 = vadd.f32 %v976_v12, %v970_v14  ;;  %v1592_v45 = vmul.f32 %v976_v12, %v976_v12  ;;  %v2929_v59 = vpop.f32.mrb[42].mxu1  ;;  %v2931_v60 = vpop.f32.mrb[43].mxu0 }
 0x190   : > { %v1561_v8 = vcombine.low %v2888_v7, %v2896_v11  ;;  %v2918_v40 = vrot.slane %v1885_v30, %v2725_v48  ;;  %1239 = vst [vmem:[%s2708_s23 + $0x70] sm:$0xff] %v1137_v36  ;;  %v1479_v46 = vadd.f32 %v1137_v36, %v1131_v52  ;;  %v1594_v50 = vmul.f32 %v1137_v36, %v1137_v36  ;;  %v2937_v4 = vpop.f32.mrb[43].mxu1 }
 0x191   : > { %1238 = vst [vmem:[%s2708_s23 + $0x68] sm:$0xff] %v978_v38  ;;  %v1458_v27 = vadd.f32 %v978_v38, %v972_v54  ;;  %v1593_v51 = vmul.f32 %v978_v38, %v978_v38  ;;  %v1792_v55 = vadd.f32 %v1592_v45, %v1584_v22  ;;  %v1139_v58 = vadd.f32 %v2862_v34, %v2727_v49 }
 0x192   : > { %v1916_v28 = vcombine.low %v2906_v16, %v2918_v40  ;;  %v1834_v61 = vadd.f32 %v1594_v50, %v1586_v31  ;;  %v982_v1 = vadd.f32 %v2864_v47, %v2717_v41  ;;  %v1143_v2 = vadd.f32 %v2866_v56, %v2719_v42  ;;  %v2944_v13 = vpop.f32.mrb[44].mxu0 }
 0x193   : > { %v1813_v63 = vadd.f32 %v1593_v51, %v1585_v35  ;;  %v1587_v18 = vmul.f32 %v1133_v25, %v1133_v25  ;;  %1240 = vst [vmem:[%s2708_s23 + $0x78] sm:$0xff] %v1139_v58  ;;  %v1500_v5 = vadd.f32 %v1139_v58, %v1133_v25  ;;  %v1595_v34 = vmul.f32 %v1139_v58, %v1139_v58  ;;  %v2949_v29 = vpop.f32.mrb[44].mxu1 }
 0x194   : > { %v984_v6 = vadd.f32 %v2868_v57, %v2721_v43  ;;  %1245 = vst [vmem:[%s2708_s23 + $0xa0] sm:$0xff] %v982_v1  ;;  %v1438_v9 = vadd.f32 %v1437_v44, %v982_v1  ;;  %v1600_v24 = vmul.f32 %v982_v1, %v982_v1  ;;  %1247 = vst [vmem:[%s2708_s23 + $0xb0] sm:$0xff] %v1143_v2  ;;  %v2951_v57 = vpop.f32.mrb[45].mxu0  ;;  %v2957_v21 = vpop.f32.mrb[45].mxu1 }
 0x195   : > { %v1480_v10 = vadd.f32 %v1479_v46, %v1143_v2  ;;  %v1602_v47 = vmul.f32 %v1143_v2, %v1143_v2  ;;  %v1855_v14 = vadd.f32 %v1595_v34, %v1587_v18  ;;  %v1145_v19 = vadd.f32 %v2870_v62, %v2727_v49 }
 0x196   : > { %1246 = vst [vmem:[%s2708_s23 + $0xa8] sm:$0xff] %v984_v6  ;;  %v1459_v56 = vadd.f32 %v1458_v27, %v984_v6  ;;  %v1601_v17 = vmul.f32 %v984_v6, %v984_v6  ;;  %v1793_v52 = vadd.f32 %v1792_v55, %v1600_v24  ;;  %v988_v37 = vadd.f32 %v2872_v23, %v2717_v41  ;;  %v2964_v36 = vpop.f32.mrb[46].mxu0 }
 0x197   : > { %v1835_v20 = vadd.f32 %v1834_v61, %v1602_v47  ;;  %v1149_v54 = vadd.f32 %v2876_v0, %v2719_v42  ;;  %1248 = vst [vmem:[%s2708_s23 + $0xb8] sm:$0xff] %v1145_v19  ;;  %v1501_v25 = vadd.f32 %v1500_v5, %v1145_v19  ;;  %v1603_v62 = vmul.f32 %v1145_v19, %v1145_v19  ;;  %v2969_v46 = vpop.f32.mrb[46].mxu1 }
 0x198   : > { %v1814_v22 = vadd.f32 %v1813_v63, %v1601_v17  ;;  %v990_v30 = vadd.f32 %v2878_v15, %v2721_v43  ;;  %1253 = vst [vmem:[%s2708_s23 + $0xe0] sm:$0xff] %v988_v37  ;;  %v1439_v31 = vadd.f32 %v1438_v9, %v988_v37  ;;  %v1608_v12 = vmul.f32 %v988_v37, %v988_v37  ;;  %v2971_v15 = vpop.f32.mrb[47].mxu0  ;;  %v2977_v58 = vpop.f32.mrb[47].mxu1 }
 0x199   : > { %1255 = vst [vmem:[%s2708_s23 + $0xf0] sm:$0xff] %v1149_v54  ;;  %v1481_v35 = vadd.f32 %v1480_v10, %v1149_v54  ;;  %v1610_v23 = vmul.f32 %v1149_v54, %v1149_v54  ;;  %v1856_v38 = vadd.f32 %v1855_v14, %v1603_v62  ;;  %v1151_v45 = vadd.f32 %v2882_v3, %v2727_v49 }
 0x19a   : > { %1254 = vst [vmem:[%s2708_s23 + $0xe8] sm:$0xff] %v990_v30  ;;  %v1460_v0 = vadd.f32 %v1459_v56, %v990_v30  ;;  %v1609_v44 = vmul.f32 %v990_v30, %v990_v30  ;;  %v1794_v50 = vadd.f32 %v1793_v52, %v1608_v12  ;;  %v994_v51 = vadd.f32 %v2893_v26, %v2717_v41  ;;  %v2984_v34 = vpop.f32.mrb[48].mxu0 }
 0x19b   : > { %v1836_v27 = vadd.f32 %v1835_v20, %v1610_v23  ;;  %v1155_v55 = vadd.f32 %v2901_v32, %v2719_v42  ;;  %1256 = vst [vmem:[%s2708_s23 + $0xf8] sm:$0xff] %v1151_v45  ;;  %v1502_v63 = vadd.f32 %v1501_v25, %v1151_v45  ;;  %v1611_v3 = vmul.f32 %v1151_v45, %v1151_v45  ;;  %v2989_v10 = vpop.f32.mrb[48].mxu1 }
 0x19c   : > { %v1815_v61 = vadd.f32 %v1814_v22, %v1609_v44  ;;  %v996_v1 = vadd.f32 %v2903_v33, %v2721_v43  ;;  %1261 = vst [vmem:[%s2708_s23 + $0x120] sm:$0xff] %v994_v51  ;;  %v1440_v2 = vadd.f32 %v1439_v31, %v994_v51  ;;  %v1616_v18 = vmul.f32 %v994_v51, %v994_v51  ;;  %v2991_v33 = vpop.f32.mrb[49].mxu0  ;;  %v2997_v19 = vpop.f32.mrb[49].mxu1 }
 0x19d   : > { %1263 = vst [vmem:[%s2708_s23 + $0x130] sm:$0xff] %v1155_v55  ;;  %v1482_v5 = vadd.f32 %v1481_v35, %v1155_v55  ;;  %v1618_v26 = vmul.f32 %v1155_v55, %v1155_v55  ;;  %v1857_v6 = vadd.f32 %v1856_v38, %v1611_v3  ;;  %v1157_v24 = vadd.f32 %v2913_v39, %v2727_v49 }
 0x19e   : > { %1262 = vst [vmem:[%s2708_s23 + $0x128] sm:$0xff] %v996_v1  ;;  %v1461_v32 = vadd.f32 %v1460_v0, %v996_v1  ;;  %v1617_v9 = vmul.f32 %v996_v1, %v996_v1  ;;  %v1795_v47 = vadd.f32 %v1794_v50, %v1616_v18  ;;  %v1000_v56 = vadd.f32 %v2923_v53, %v2717_v41  ;;  %v3004_v62 = vpop.f32.mrb[50].mxu0 }
 0x19f   : > { %v1837_v14 = vadd.f32 %v1836_v27, %v1618_v26  ;;  %v1161_v17 = vadd.f32 %v2929_v59, %v2719_v42  ;;  %1264 = vst [vmem:[%s2708_s23 + $0x138] sm:$0xff] %v1157_v24  ;;  %v1503_v20 = vadd.f32 %v1502_v63, %v1157_v24  ;;  %v1619_v39 = vmul.f32 %v1157_v24, %v1157_v24  ;;  %v3009_v35 = vpop.f32.mrb[50].mxu1 }
 0x1a0   : > { %v1816_v52 = vadd.f32 %v1815_v61, %v1617_v9  ;;  %v1002_v37 = vadd.f32 %v2931_v60, %v2721_v43  ;;  %1269 = vst [vmem:[%s2708_s23 + $0x160] sm:$0xff] %v1000_v56  ;;  %v1441_v54 = vadd.f32 %v1440_v2, %v1000_v56  ;;  %v1624_v22 = vmul.f32 %v1000_v56, %v1000_v56  ;;  %v3011_v60 = vpop.f32.mrb[51].mxu0  ;;  %v3017_v45 = vpop.f32.mrb[51].mxu1 }
 0x1a1   : > { %1271 = vst [vmem:[%s2708_s23 + $0x170] sm:$0xff] %v1161_v17  ;;  %v1483_v25 = vadd.f32 %v1482_v5, %v1161_v17  ;;  %v1626_v53 = vmul.f32 %v1161_v17, %v1161_v17  ;;  %v1858_v30 = vadd.f32 %v1857_v6, %v1619_v39  ;;  %v1163_v12 = vadd.f32 %v2937_v4, %v2727_v49 }
 0x1a2   : > { %1270 = vst [vmem:[%s2708_s23 + $0x168] sm:$0xff] %v1002_v37  ;;  %v1462_v59 = vadd.f32 %v1461_v32, %v1002_v37  ;;  %v1625_v31 = vmul.f32 %v1002_v37, %v1002_v37  ;;  %v1796_v23 = vadd.f32 %v1795_v47, %v1624_v22  ;;  %v1006_v0 = vadd.f32 %v2944_v13, %v2717_v41  ;;  %v3024_v3 = vpop.f32.mrb[52].mxu0 }
 0x1a3   : > { %v1838_v38 = vadd.f32 %v1837_v14, %v1626_v53  ;;  %v1167_v44 = vadd.f32 %v2949_v29, %v2719_v42  ;;  %1272 = vst [vmem:[%s2708_s23 + $0x178] sm:$0xff] %v1163_v12  ;;  %v1504_v27 = vadd.f32 %v1503_v20, %v1163_v12  ;;  %v1627_v4 = vmul.f32 %v1163_v12, %v1163_v12  ;;  %v3029_v5 = vpop.f32.mrb[52].mxu1 }
 0x1a4   : > { %v1817_v50 = vadd.f32 %v1816_v52, %v1625_v31  ;;  %v1008_v51 = vadd.f32 %v2951_v57, %v2721_v43  ;;  %1277 = vst [vmem:[%s2708_s23 + $0x1a0] sm:$0xff] %v1006_v0  ;;  %v1442_v55 = vadd.f32 %v1441_v54, %v1006_v0  ;;  %v1632_v61 = vmul.f32 %v1006_v0, %v1006_v0  ;;  %v3031_v57 = vpop.f32.mrb[53].mxu0  ;;  %v3037_v24 = vpop.f32.mrb[53].mxu1 }
 0x1a5   : > { %1279 = vst [vmem:[%s2708_s23 + $0x1b0] sm:$0xff] %v1167_v44  ;;  %v1484_v63 = vadd.f32 %v1483_v25, %v1167_v44  ;;  %v1634_v13 = vmul.f32 %v1167_v44, %v1167_v44  ;;  %v1859_v1 = vadd.f32 %v1858_v30, %v1627_v4  ;;  %v1169_v18 = vadd.f32 %v2957_v21, %v2727_v49 }
 0x1a6   : > { %1278 = vst [vmem:[%s2708_s23 + $0x1a8] sm:$0xff] %v1008_v51  ;;  %v1463_v29 = vadd.f32 %v1462_v59, %v1008_v51  ;;  %v1633_v2 = vmul.f32 %v1008_v51, %v1008_v51  ;;  %v1797_v26 = vadd.f32 %v1796_v23, %v1632_v61  ;;  %v1012_v32 = vadd.f32 %v2964_v36, %v2717_v41  ;;  %v3044_v39 = vpop.f32.mrb[54].mxu0 }
 0x1a7   : > { %v1839_v6 = vadd.f32 %v1838_v38, %v1634_v13  ;;  %v1173_v9 = vadd.f32 %v2969_v46, %v2719_v42  ;;  %1280 = vst [vmem:[%s2708_s23 + $0x1b8] sm:$0xff] %v1169_v18  ;;  %v1505_v14 = vadd.f32 %v1504_v27, %v1169_v18  ;;  %v1635_v21 = vmul.f32 %v1169_v18, %v1169_v18  ;;  %v3049_v25 = vpop.f32.mrb[54].mxu1 }
 0x1a8   : > { %v1818_v47 = vadd.f32 %v1817_v50, %v1633_v2  ;;  %v1014_v56 = vadd.f32 %v2971_v15, %v2721_v43  ;;  %1285 = vst [vmem:[%s2708_s23 + $0x1e0] sm:$0xff] %v1012_v32  ;;  %v1443_v17 = vadd.f32 %v1442_v55, %v1012_v32  ;;  %v1640_v52 = vmul.f32 %v1012_v32, %v1012_v32  ;;  %v3051_v15 = vpop.f32.mrb[55].mxu0  ;;  %v3057_v12 = vpop.f32.mrb[55].mxu1 }
 0x1a9   : > { %1287 = vst [vmem:[%s2708_s23 + $0x1f0] sm:$0xff] %v1173_v9  ;;  %v1485_v20 = vadd.f32 %v1484_v63, %v1173_v9  ;;  %v1642_v36 = vmul.f32 %v1173_v9, %v1173_v9  ;;  %v1860_v37 = vadd.f32 %v1859_v1, %v1635_v21  ;;  %v1175_v22 = vadd.f32 %v2977_v58, %v2727_v49 }
 0x1aa   : > { %1286 = vst [vmem:[%s2708_s23 + $0x1e8] sm:$0xff] %v1014_v56  ;;  %v1464_v46 = vadd.f32 %v1463_v29, %v1014_v56  ;;  %v1641_v54 = vmul.f32 %v1014_v56, %v1014_v56  ;;  %v1798_v53 = vadd.f32 %v1797_v26, %v1640_v52  ;;  %v1018_v59 = vadd.f32 %v2984_v34, %v2717_v41  ;;  %v3064_v4 = vpop.f32.mrb[56].mxu0 }
 0x1ab   : > { %v1840_v30 = vadd.f32 %v1839_v6, %v1642_v36  ;;  %v1179_v31 = vadd.f32 %v2989_v10, %v2719_v42  ;;  %1288 = vst [vmem:[%s2708_s23 + $0x1f8] sm:$0xff] %v1175_v22  ;;  %v1506_v38 = vadd.f32 %v1505_v14, %v1175_v22  ;;  %v1643_v58 = vmul.f32 %v1175_v22, %v1175_v22  ;;  %v3069_v63 = vpop.f32.mrb[56].mxu1 }
 0x1ac   : > { %v1819_v23 = vadd.f32 %v1818_v47, %v1641_v54  ;;  %v1020_v0 = vadd.f32 %v2991_v33, %v2721_v43  ;;  %1293 = vst [vmem:[%s2708_s23 + $0x220] sm:$0xff] %v1018_v59  ;;  %v1444_v44 = vadd.f32 %v1443_v17, %v1018_v59  ;;  %v1648_v50 = vmul.f32 %v1018_v59, %v1018_v59  ;;  %v3071_v33 = vpop.f32.mrb[57].mxu0  ;;  %v3077_v18 = vpop.f32.mrb[57].mxu1 }
 0x1ad   : > { %1295 = vst [vmem:[%s2708_s23 + $0x230] sm:$0xff] %v1179_v31  ;;  %v1486_v27 = vadd.f32 %v1485_v20, %v1179_v31  ;;  %v1650_v34 = vmul.f32 %v1179_v31, %v1179_v31  ;;  %v1861_v51 = vadd.f32 %v1860_v37, %v1643_v58  ;;  %v1181_v61 = vadd.f32 %v2997_v19, %v2727_v49 }
 0x1ae   : > { %1294 = vst [vmem:[%s2708_s23 + $0x228] sm:$0xff] %v1020_v0  ;;  %v1465_v10 = vadd.f32 %v1464_v46, %v1020_v0  ;;  %v1649_v55 = vmul.f32 %v1020_v0, %v1020_v0  ;;  %v1799_v13 = vadd.f32 %v1798_v53, %v1648_v50  ;;  %v1024_v29 = vadd.f32 %v3004_v62, %v2717_v41  ;;  %v3084_v21 = vpop.f32.mrb[58].mxu0 }
 0x1af   : > { %v1841_v1 = vadd.f32 %v1840_v30, %v1650_v34  ;;  %v1185_v2 = vadd.f32 %v3009_v35, %v2719_v42  ;;  %1296 = vst [vmem:[%s2708_s23 + $0x238] sm:$0xff] %v1181_v61  ;;  %v1507_v6 = vadd.f32 %v1506_v38, %v1181_v61  ;;  %v1651_v19 = vmul.f32 %v1181_v61, %v1181_v61  ;;  %v3089_v20 = vpop.f32.mrb[58].mxu1 }
 0x1b0   : > { %v1820_v26 = vadd.f32 %v1819_v23, %v1649_v55  ;;  %v1026_v32 = vadd.f32 %v3011_v60, %v2721_v43  ;;  %1301 = vst [vmem:[%s2708_s23 + $0x260] sm:$0xff] %v1024_v29  ;;  %v1445_v9 = vadd.f32 %v1444_v44, %v1024_v29  ;;  %v1656_v47 = vmul.f32 %v1024_v29, %v1024_v29  ;;  %v3091_v60 = vpop.f32.mrb[59].mxu0  ;;  %v3097_v22 = vpop.f32.mrb[59].mxu1 }
 0x1b1   : > { %1303 = vst [vmem:[%s2708_s23 + $0x270] sm:$0xff] %v1185_v2  ;;  %v1487_v14 = vadd.f32 %v1486_v27, %v1185_v2  ;;  %v1658_v62 = vmul.f32 %v1185_v2, %v1185_v2  ;;  %v1862_v56 = vadd.f32 %v1861_v51, %v1651_v19  ;;  %v1187_v52 = vadd.f32 %v3017_v45, %v2727_v49 }
 0x1b2   : > { %1302 = vst [vmem:[%s2708_s23 + $0x268] sm:$0xff] %v1026_v32  ;;  %v1466_v35 = vadd.f32 %v1465_v10, %v1026_v32  ;;  %v1657_v17 = vmul.f32 %v1026_v32, %v1026_v32  ;;  %v1800_v36 = vadd.f32 %v1799_v13, %v1656_v47  ;;  %v1030_v46 = vadd.f32 %v3024_v3, %v2717_v41  ;;  %v3104_v58 = vpop.f32.mrb[60].mxu0 }
 0x1b3   : > { %v1842_v37 = vadd.f32 %v1841_v1, %v1658_v62  ;;  %v1191_v54 = vadd.f32 %v3029_v5, %v2719_v42  ;;  %1304 = vst [vmem:[%s2708_s23 + $0x278] sm:$0xff] %v1187_v52  ;;  %v1508_v30 = vadd.f32 %v1507_v6, %v1187_v52  ;;  %v1659_v45 = vmul.f32 %v1187_v52, %v1187_v52  ;;  %v3109_v27 = vpop.f32.mrb[60].mxu1 }
 0x1b4   : > { %v1821_v53 = vadd.f32 %v1820_v26, %v1657_v17  ;;  %v1032_v59 = vadd.f32 %v3031_v57, %v2721_v43  ;;  %1309 = vst [vmem:[%s2708_s23 + $0x2a0] sm:$0xff] %v1030_v46  ;;  %v1446_v31 = vadd.f32 %v1445_v9, %v1030_v46  ;;  %v1664_v23 = vmul.f32 %v1030_v46, %v1030_v46  ;;  %v3111_v57 = vpop.f32.mrb[61].mxu0  ;;  %v3117_v61 = vpop.f32.mrb[61].mxu1 }
 0x1b5   : > { %1311 = vst [vmem:[%s2708_s23 + $0x2b0] sm:$0xff] %v1191_v54  ;;  %v1488_v38 = vadd.f32 %v1487_v14, %v1191_v54  ;;  %v1666_v3 = vmul.f32 %v1191_v54, %v1191_v54  ;;  %v1863_v0 = vadd.f32 %v1862_v56, %v1659_v45  ;;  %v1193_v50 = vadd.f32 %v3037_v24, %v2727_v49 }
 0x1b6   : > { %1310 = vst [vmem:[%s2708_s23 + $0x2a8] sm:$0xff] %v1032_v59  ;;  %v1467_v5 = vadd.f32 %v1466_v35, %v1032_v59  ;;  %v1665_v44 = vmul.f32 %v1032_v59, %v1032_v59  ;;  %v1801_v34 = vadd.f32 %v1800_v36, %v1664_v23  ;;  %v1036_v10 = vadd.f32 %v3044_v39, %v2717_v41  ;;  %v3124_v19 = vpop.f32.mrb[62].mxu0 }
 0x1b7   : > { %v1843_v51 = vadd.f32 %v1842_v37, %v1666_v3  ;;  %v1197_v55 = vadd.f32 %v3049_v25, %v2719_v42  ;;  %1312 = vst [vmem:[%s2708_s23 + $0x2b8] sm:$0xff] %v1193_v50  ;;  %v1509_v1 = vadd.f32 %v1508_v30, %v1193_v50  ;;  %v1667_v24 = vmul.f32 %v1193_v50, %v1193_v50  ;;  %v3129_v14 = vpop.f32.mrb[62].mxu1 }
 0x1b8   : > { %v1822_v13 = vadd.f32 %v1821_v53, %v1665_v44  ;;  %v1038_v29 = vadd.f32 %v3051_v15, %v2721_v43  ;;  %1317 = vst [vmem:[%s2708_s23 + $0x2e0] sm:$0xff] %v1036_v10  ;;  %v1447_v2 = vadd.f32 %v1446_v31, %v1036_v10  ;;  %v1672_v26 = vmul.f32 %v1036_v10, %v1036_v10  ;;  %v3131_v15 = vpop.f32.mrb[63].mxu0  ;;  %v3137_v52 = vpop.f32.mrb[63].mxu1 }
 0x1b9   : > { %1319 = vst [vmem:[%s2708_s23 + $0x2f0] sm:$0xff] %v1197_v55  ;;  %v1489_v6 = vadd.f32 %v1488_v38, %v1197_v55  ;;  %v1674_v39 = vmul.f32 %v1197_v55, %v1197_v55  ;;  %v1864_v32 = vadd.f32 %v1863_v0, %v1667_v24  ;;  %v1199_v47 = vadd.f32 %v3057_v12, %v2727_v49 }
 0x1ba   : > { %1318 = vst [vmem:[%s2708_s23 + $0x2e8] sm:$0xff] %v1038_v29  ;;  %v1468_v25 = vadd.f32 %v1467_v5, %v1038_v29  ;;  %v1673_v9 = vmul.f32 %v1038_v29, %v1038_v29  ;;  %v1802_v62 = vadd.f32 %v1801_v34, %v1672_v26  ;;  %v1042_v35 = vadd.f32 %v3064_v4, %v2717_v41 }
 0x1bb   : > { %v1844_v56 = vadd.f32 %v1843_v51, %v1674_v39  ;;  %v1203_v17 = vadd.f32 %v3069_v63, %v2719_v42  ;;  %1320 = vst [vmem:[%s2708_s23 + $0x2f8] sm:$0xff] %v1199_v47  ;;  %v1510_v37 = vadd.f32 %v1509_v1, %v1199_v47  ;;  %v1675_v12 = vmul.f32 %v1199_v47, %v1199_v47 }
 0x1bc   : > { %v1823_v36 = vadd.f32 %v1822_v13, %v1673_v9  ;;  %v1044_v46 = vadd.f32 %v3071_v33, %v2721_v43  ;;  %1325 = vst [vmem:[%s2708_s23 + $0x320] sm:$0xff] %v1042_v35  ;;  %v1448_v54 = vadd.f32 %v1447_v2, %v1042_v35  ;;  %v1680_v53 = vmul.f32 %v1042_v35, %v1042_v35 }
 0x1bd   : > { %1327 = vst [vmem:[%s2708_s23 + $0x330] sm:$0xff] %v1203_v17  ;;  %v1490_v30 = vadd.f32 %v1489_v6, %v1203_v17  ;;  %v1682_v4 = vmul.f32 %v1203_v17, %v1203_v17  ;;  %v1865_v45 = vadd.f32 %v1864_v32, %v1675_v12  ;;  %v1205_v31 = vadd.f32 %v3077_v18, %v2727_v49 }
 0x1be   : > { %1326 = vst [vmem:[%s2708_s23 + $0x328] sm:$0xff] %v1044_v46  ;;  %v1469_v63 = vadd.f32 %v1468_v25, %v1044_v46  ;;  %v1681_v59 = vmul.f32 %v1044_v46, %v1044_v46  ;;  %v1803_v23 = vadd.f32 %v1802_v62, %v1680_v53  ;;  %v1048_v33 = vadd.f32 %v3084_v21, %v2717_v41 }
 0x1bf   : > { %v1845_v38 = vadd.f32 %v1844_v56, %v1682_v4  ;;  %v1209_v3 = vadd.f32 %v3089_v20, %v2719_v42  ;;  %1328 = vst [vmem:[%s2708_s23 + $0x338] sm:$0xff] %v1205_v31  ;;  %v1511_v5 = vadd.f32 %v1510_v37, %v1205_v31  ;;  %v1683_v44 = vmul.f32 %v1205_v31, %v1205_v31 }
 0x1c0   : > { %v1824_v0 = vadd.f32 %v1823_v36, %v1681_v59  ;;  %v1050_v50 = vadd.f32 %v3091_v60, %v2721_v43  ;;  %1333 = vst [vmem:[%s2708_s23 + $0x360] sm:$0xff] %v1048_v33  ;;  %v1449_v34 = vadd.f32 %v1448_v54, %v1048_v33  ;;  %v1688_v18 = vmul.f32 %v1048_v33, %v1048_v33 }
 0x1c1   : > { %1335 = vst [vmem:[%s2708_s23 + $0x370] sm:$0xff] %v1209_v3  ;;  %v1491_v51 = vadd.f32 %v1490_v30, %v1209_v3  ;;  %v1690_v10 = vmul.f32 %v1209_v3, %v1209_v3  ;;  %v1866_v55 = vadd.f32 %v1865_v45, %v1683_v44  ;;  %v1211_v13 = vadd.f32 %v3097_v22, %v2727_v49 }
 0x1c2   : > { %1334 = vst [vmem:[%s2708_s23 + $0x368] sm:$0xff] %v1050_v50  ;;  %v1470_v21 = vadd.f32 %v1469_v63, %v1050_v50  ;;  %v1689_v20 = vmul.f32 %v1050_v50, %v1050_v50  ;;  %v1804_v1 = vadd.f32 %v1803_v23, %v1688_v18  ;;  %v1054_v60 = vadd.f32 %v3104_v58, %v2717_v41 }
 0x1c3   : > { %v1846_v24 = vadd.f32 %v1845_v38, %v1690_v10  ;;  %v1215_v29 = vadd.f32 %v3109_v27, %v2719_v42  ;;  %1336 = vst [vmem:[%s2708_s23 + $0x378] sm:$0xff] %v1211_v13  ;;  %v1512_v26 = vadd.f32 %v1511_v5, %v1211_v13  ;;  %v1691_v6 = vmul.f32 %v1211_v13, %v1211_v13 }
 0x1c4   : > { %v1825_v2 = vadd.f32 %v1824_v0, %v1689_v20  ;;  %v1056_v39 = vadd.f32 %v3111_v57, %v2721_v43  ;;  %1341 = vst [vmem:[%s2708_s23 + $0x3a0] sm:$0xff] %v1054_v60  ;;  %v1450_v32 = vadd.f32 %v1449_v34, %v1054_v60  ;;  %v1696_v22 = vmul.f32 %v1054_v60, %v1054_v60 }
 0x1c5   : > { %1343 = vst [vmem:[%s2708_s23 + $0x3b0] sm:$0xff] %v1215_v29  ;;  %v1492_v25 = vadd.f32 %v1491_v51, %v1215_v29  ;;  %v1698_v9 = vmul.f32 %v1215_v29, %v1215_v29  ;;  %v1867_v47 = vadd.f32 %v1866_v55, %v1691_v6  ;;  %v1217_v62 = vadd.f32 %v3117_v61, %v2727_v49 }
 0x1c6   : > { %1342 = vst [vmem:[%s2708_s23 + $0x3a8] sm:$0xff] %v1056_v39  ;;  %v1471_v58 = vadd.f32 %v1470_v21, %v1056_v39  ;;  %v1697_v27 = vmul.f32 %v1056_v39, %v1056_v39  ;;  %v1805_v56 = vadd.f32 %v1804_v1, %v1696_v22  ;;  %v1060_v57 = vadd.f32 %v3124_v19, %v2717_v41 }
 0x1c7   : > { %v1847_v35 = vadd.f32 %v1846_v24, %v1698_v9  ;;  %v1221_v17 = vadd.f32 %v3129_v14, %v2719_v42  ;;  %1344 = vst [vmem:[%s2708_s23 + $0x3b8] sm:$0xff] %v1217_v62  ;;  %v1513_v37 = vadd.f32 %v1512_v26, %v1217_v62  ;;  %v1699_v12 = vmul.f32 %v1217_v62, %v1217_v62 }
 0x1c8   : > { %v1826_v36 = vadd.f32 %v1825_v2, %v1697_v27  ;;  %v1062_v46 = vadd.f32 %v3131_v15, %v2721_v43  ;;  %1349 = vst [vmem:[%s2708_s23 + $0x3e0] sm:$0xff] %v1060_v57  ;;  %v1451_v54 = vadd.f32 %v1450_v32, %v1060_v57  ;;  %v1704_v61 = vmul.f32 %v1060_v57, %v1060_v57 }
 0x1c9   : > { %1351 = vst [vmem:[%s2708_s23 + $0x3f0] sm:$0xff] %v1221_v17  ;;  %v1493_v53 = vadd.f32 %v1492_v25, %v1221_v17  ;;  %v1706_v30 = vmul.f32 %v1221_v17, %v1221_v17  ;;  %v1868_v4 = vadd.f32 %v1867_v47, %v1699_v12  ;;  %v1223_v42 = vadd.f32 %v3137_v52, %v2727_v49 }
 0x1ca   : > { %1350 = vst [vmem:[%s2708_s23 + $0x3e8] sm:$0xff] %v1062_v46  ;;  %v1472_v41 = vadd.f32 %v1471_v58, %v1062_v46  ;;  %v1705_v19 = vmul.f32 %v1062_v46, %v1062_v46  ;;  %v1452_v14 = vrot.slane %v1451_v54, 4  ;;  %v1806_v45 = vadd.f32 %v1805_v56, %v1704_v61 }
 0x1cb   : > { %v1494_v63 = vrot.slane %v1493_v53, 4  ;;  %v1848_v59 = vadd.f32 %v1847_v35, %v1706_v30  ;;  %1352 = vst [vmem:[%s2708_s23 + $0x3f8] sm:$0xff] %v1223_v42  ;;  %v1514_v15 = vadd.f32 %v1513_v37, %v1223_v42  ;;  %v1707_v23 = vmul.f32 %v1223_v42, %v1223_v42 }
 0x1cc   : > { %v1473_v31 = vrot.slane %v1472_v41, 4  ;;  %v1827_v43 = vadd.f32 %v1826_v36, %v1705_v19  ;;  %v1453_v38 = vadd.f32 %v1452_v14, %v1451_v54  ;;  %v1807_v33 = vrot.slane %v1806_v45, 4 }
 0x1cd   : > { %v1495_v3 = vadd.f32 %v1494_v63, %v1493_v53  ;;  %v1849_v0 = vrot.slane %v1848_v59, 4  ;;  %v1515_v50 = vrot.slane %v1514_v15, 4  ;;  %v1869_v34 = vadd.f32 %v1868_v4, %v1707_v23 }
 0x1ce   : > { %v1474_v5 = vadd.f32 %v1473_v31, %v1472_v41  ;;  %v1828_v44 = vrot.slane %v1827_v43, 4  ;;  %v1454_v18 = vrot.slane %v1453_v38, 2  ;;  %v1808_v51 = vadd.f32 %v1807_v33, %v1806_v45 }
 0x1cf   : > { %v1496_v49 = vrot.slane %v1495_v3, 2  ;;  %v1850_v52 = vadd.f32 %v1849_v0, %v1848_v59  ;;  %v1516_v21 = vadd.f32 %v1515_v50, %v1514_v15  ;;  %v1870_v20 = vrot.slane %v1869_v34, 4 }
 0x1d0   : > { %v1475_v10 = vrot.slane %v1474_v5, 2  ;;  %v1829_v55 = vadd.f32 %v1828_v44, %v1827_v43  ;;  %v1455_v13 = vadd.f32 %v1454_v18, %v1453_v38  ;;  %v1809_v1 = vrot.slane %v1808_v51, 2 }
 0x1d1   : > { %v1497_v24 = vadd.f32 %v1496_v49, %v1495_v3  ;;  %v1851_v60 = vrot.slane %v1850_v52, 2  ;;  %v1517_v26 = vrot.slane %v1516_v21, 2  ;;  %v1871_v6 = vadd.f32 %v1870_v20, %v1869_v34 }
 0x1d2   : > { %v1476_v29 = vadd.f32 %v1475_v10, %v1474_v5  ;;  %v1830_v2 = vrot.slane %v1829_v55, 2  ;;  %v1456_v39 = vrot.slane %v1455_v13, 1  ;;  %v1810_v32 = vadd.f32 %v1809_v1, %v1808_v51 }
 0x1d3   : > { %v1498_v22 = vrot.slane %v1497_v24, 1  ;;  %v1852_v25 = vadd.f32 %v1851_v60, %v1850_v52  ;;  %v1518_v58 = vadd.f32 %v1517_v26, %v1516_v21  ;;  %v1872_v27 = vrot.slane %v1871_v6, 2 }
 0x1d4   : > { %v1477_v9 = vrot.slane %v1476_v29, 1  ;;  %v1831_v47 = vadd.f32 %v1830_v2, %v1829_v55  ;;  %v1457_v62 = vadd.f32 %v1456_v39, %v1455_v13  ;;  %v1811_v56 = vrot.slane %v1810_v32, 1 }
 0x1d5   : > { %v1499_v35 = vadd.f32 %v1498_v22, %v1497_v24  ;;  %v1853_v57 = vrot.slane %v1852_v25, 1  ;;  %v1519_v37 = vrot.slane %v1518_v58, 1  ;;  %v1873_v12 = vadd.f32 %v1872_v27, %v1871_v6 }
 0x1d6   : > { %v1478_v17 = vadd.f32 %v1477_v9, %v1476_v29  ;;  %v1832_v36 = vrot.slane %v1831_v47, 1  ;;  %v1812_v46 = vadd.f32 %v1811_v56, %v1810_v32  ;;  %v1569_v15 = vrot.slane %v1561_v8, %v2725_v48 }
 0x1d7   : > { %v1854_v54 = vadd.f32 %v1853_v57, %v1852_v25  ;;  %v1520_v30 = vadd.f32 %v1519_v37, %v1518_v58  ;;  %v1874_v4 = vrot.slane %v1873_v12, 1  ;;  %v1924_v33 = vrot.slane %v1916_v28, %v2725_v48 }
 0x1d8   : > { %v1531_v61 = vcombine.low %v1457_v62, %v1478_v17  ;;  %v1833_v53 = vadd.f32 %v1832_v36, %v1831_v47 }
 0x1d9   : > { %v1532_v42 = vcombine.low %v1499_v35, %v1520_v30  ;;  %v1875_v14 = vadd.f32 %v1874_v4, %v1873_v12 }
 0x1da   : > { %v1553_v41 = vrot.slane %v1531_v61, %v2725_v48  ;;  %v1886_v19 = vcombine.low %v1812_v46, %v1833_v53 }
 0x1db   : > { %v1560_v63 = vrot.slane %v1532_v42, %v2725_v48  ;;  %v1887_v59 = vcombine.low %v1854_v54, %v1875_v14 }
 0x1dc   : > { %v1908_v45 = vrot.slane %v1886_v19, %v2725_v48 }
 0x1dd   : > { %v1562_v31 = vcombine.low %v1553_v41, %v1560_v63  ;;  %v1915_v43 = vrot.slane %v1887_v59, %v2725_v48 }
 0x1df   : > { %v1576_v23 = vrot.slane %v1562_v31, %v2725_v48  ;;  %v1917_v38 = vcombine.low %v1908_v45, %v1915_v43 }
 0x1e1   : > { %v1577_v3 = vcombine.low %v1569_v15, %v1576_v23  ;;  %v1931_v0 = vrot.slane %v1917_v38, %v2725_v48 }
 0x1e3   : > { %1579 = vst [vmem:[%s328_s10] sm:$0xff] %v1577_v3  ;;  %v1932_v7 = vcombine.low %v1924_v33, %v1931_v0 }
 0x1e5   : > { %1934 = vst [vmem:[%s332_s11] sm:$0xff] %v1932_v7 }
 0x1e6 PF: > { %s20_s24 = sadd.s32 1, %s2329_s24  }
 0x1e7   : > { %p17_p10 = scmp.ge.s32.totalorder %s20_s24, 6  }
 0x1e9   :  { %19 = sbr.rel (!%p17_p10) target bundleno = 2 (0x2), region = 103 }
 0x1f0   :  { %1987 = vsyncpa [#allocation3], 1 }
 0x1f1   :  { %1989 = vsyncpa [#allocation3 + $0x1], 1 }
 0x1f2   :  { %1990 = vsyncpa [#allocation5], 1 }

// kernel: t_net_forward.7
= control target key start
LH: loop header
LB: loop body
LE: loop exit
PB: predicated region body
PF: predicated region fallthrough
CT: control target
= control target key end

     0   :  { %s1277_s12 = smov 0   ;;  %s1279_s13 = smov 0   ;;  %s2567_s0 = inlined_call_operand.vmem [shape: f32[512,1024], index: 0, kind: input, shape index: {}]   ;;  %s2568_s1 = inlined_call_operand.vmem [shape: f32[1,1024], index: 1, kind: input, shape index: {}]   ;;  %s2569_s2 = inlined_call_operand.vmem [shape: f32[1,1024], index: 2, kind: input, shape index: {}]   ;;  %s2570_s3 = inlined_call_operand.vmem [shape: f32[2,1,1024], index: 3, kind: output, shape index: {}]  }
   0x1   :  { %s1281_s14 = smov 0   ;;  %s1283_s15 = smov 0  }
   0x2   :  { %s1285_s16 = smov 0  }
   0x3 LB: > { %s22_s17 = sadd.s32 1, %s1245_s14  ;;  %s25_s18 = sadd.s32 1, %s1249_s15  ;;  %s1253_s16 = sphi %s1285_s16, %s13_s16   ;;  %s1249_s15 = sphi %s1283_s15, %s2929_s15   ;;  %s1245_s14 = sphi %s1281_s14, %s2928_s14   ;;  %s1241_s13 = sphi %s1279_s13, %s2927_s13   ;;  %s1237_s12 = sphi %s1277_s12, %s2926_s12  }
   0x4   : > { %p23_p0 = scmp.ge.s32.totalorder %s22_s17, 2  ;;  %p1162_p1 = scmp.ge.s32.totalorder %s1253_s16, 1 }
   0x5   : > { %p159_p2 = scmp.lt.s32.totalorder %s1253_s16, 5 }
   0x6   : > { %s2931_s17 = smov (%p23_p0, %s22_s17), 0  ;;  %s2933_s18 = smov (!%p23_p0, %s25_s18), %s1249_s15 }
   0x7   : > { %p160_p3 = pnand %p1162_p1, %p159_p2  ;;  %p27_p4 = scmp.ge.s32.totalorder %s2933_s18, 2 }
   0x9   : > { %s2935_s18 = smov (%p27_p4, %s2933_s18), 0  ;;  %163 = sbr.rel (%p160_p3) target bundleno = 240 (0xf0), region = 32 }
  0x10   : > { %s1163_s19 = sshll.u32 %s1241_s13, 1  ;;  %p196_p5 = scmp.lt.s32.totalorder %s1241_s13, 1  ;;  %v330_v0 = vlaneseq  ;;  %v328_v2 = vld [vmem:[%s2568_s1] sm:$0xff] }
  0x11   : > { %s186_s20 = sadd.s32 %s1237_s12, %s1163_s19  ;;  %v498_v12 = vld [vmem:[%s2569_s2] sm:$0xff]  ;;  %p1168_p7 = scmp.ne.s32.totalorder %s1237_s12, 0 }
  0x12   : > { %s1164_s21 = sshll.u32 %s186_s20, 4  ;;  %v1310_v1 = vshrl.u32 %v330_v0, 7  ;;  %s2937_s13 = smov (!%p196_p5, %s1241_s13), 1 }
  0x13   : > { %p188_p6 = scmp.lt.s32.totalorder %s1164_s21, 63  ;;  %s1167_s24 = sshll.u32 %s2937_s13, 3 }
  0x14   : > { %2599 = vst [vmem:[#allocation2_spill] sm:$0xff] %v1310_v1  ;;  %v332_v3 = vsub.s32 0, %v1310_v1  ;;  %v336_v4 = vsub.s32 1, %v1310_v1  ;;  %v340_v5 = vsub.s32 2, %v1310_v1  ;;  %v344_v6 = vsub.s32 3, %v1310_v1  ;;  %s1331_s30 = scalar_lea.vmem %s2570_s3, %s1167_s24 }
  0x15   : > { %s2939_s21 = smov (!%p188_p6, %s1164_s21), 63  ;;  %v348_v7 = vsub.s32 4, %v1310_v1  ;;  %v352_v8 = vsub.s32 5, %v1310_v1  ;;  %v356_v9 = vsub.s32 6, %v1310_v1  ;;  %v360_v10 = vsub.s32 7, %v1310_v1 }
  0x16   : > { %v1323_v11 = vrot.slane %v328_v2, %v332_v3  ;;  %s1172_s27 = sshll.u32 %s2939_s21, 6  ;;  %v1338_v13 = vrot.slane %v328_v2, %v336_v4  ;;  %v1340_v14 = vrot.slane %v328_v2, %v340_v5  ;;  %v1342_v15 = vrot.slane %v328_v2, %v344_v6 }
  0x17   : > { %s1336_s6 = scalar_lea.vmem %s2567_s0, %s1172_s27  ;;  %v1344_v16 = vrot.slane %v328_v2, %v348_v7  ;;  %v1349_v20 = vrot.slane %v328_v2, %v352_v8  ;;  %v1351_v21 = vrot.slane %v328_v2, %v356_v9  ;;  %v1353_v22 = vrot.slane %v328_v2, %v360_v10 }
  0x18   : > { %v200_v17 = vld [vmem:[%s1336_s6] sm:$0xff]  ;;  %v201_v18 = vld [vmem:[%s1336_s6 + $0x8] sm:$0xff]  ;;  %v202_v19 = vld [vmem:[%s1336_s6 + $0x10] sm:$0xff]  ;;  %v1355_v23 = vrot.slane %v498_v12, %v332_v3  ;;  %v1361_v28 = vrot.slane %v498_v12, %v336_v4  ;;  %v1363_v29 = vrot.slane %v498_v12, %v340_v5  ;;  %v1365_v30 = vrot.slane %v498_v12, %v344_v6 }
  0x19   : > { %v203_v24 = vld [vmem:[%s1336_s6 + $0x18] sm:$0xff]  ;;  %v204_v25 = vld [vmem:[%s1336_s6 + $0x20] sm:$0xff]  ;;  %v205_v26 = vld [vmem:[%s1336_s6 + $0x28] sm:$0xff]  ;;  %v370_v27 = vmul.f32 %v1323_v11, %v200_v17  ;;  %v371_v34 = vmul.f32 %v1338_v13, %v201_v18  ;;  %v1371_v35 = vrot.slane %v498_v12, %v348_v7  ;;  %v1373_v36 = vrot.slane %v498_v12, %v352_v8 }
  0x1a   : > { %2600 = vst [vmem:[#allocation3_spill] sm:$0xff] %v1355_v23  ;;  %v206_v31 = vld [vmem:[%s1336_s6 + $0x30] sm:$0xff]  ;;  %v207_v32 = vld [vmem:[%s1336_s6 + $0x38] sm:$0xff]  ;;  %v208_v33 = vld [vmem:[%s1336_s6 + $0x40] sm:$0xff]  ;;  %v1375_v37 = vrot.slane %v498_v12, %v356_v9  ;;  %v372_v41 = vmul.f32 %v1340_v14, %v202_v19  ;;  %v373_v42 = vmul.f32 %v1342_v15, %v203_v24  ;;  %v374_v43 = vmul.f32 %v1344_v16, %v204_v25 }
  0x1b   : > { %v209_v38 = vld [vmem:[%s1336_s6 + $0x48] sm:$0xff]  ;;  %v210_v39 = vld [vmem:[%s1336_s6 + $0x50] sm:$0xff]  ;;  %v211_v40 = vld [vmem:[%s1336_s6 + $0x58] sm:$0xff]  ;;  %v1383_v44 = vrot.slane %v498_v12, %v360_v10  ;;  %v375_v48 = vmul.f32 %v1349_v20, %v205_v26  ;;  %v376_v49 = vmul.f32 %v1351_v21, %v206_v31  ;;  %v377_v50 = vmul.f32 %v1353_v22, %v207_v32 }
  0x1c   : > { %v212_v45 = vld [vmem:[%s1336_s6 + $0x60] sm:$0xff]  ;;  %v213_v46 = vld [vmem:[%s1336_s6 + $0x68] sm:$0xff]  ;;  %v214_v47 = vld [vmem:[%s1336_s6 + $0x70] sm:$0xff]  ;;  %v1392_v51 = vmul.f32 %v1323_v11, %v208_v33  ;;  %v1398_v55 = vmul.f32 %v1338_v13, %v209_v38  ;;  %v1401_v56 = vmul.f32 %v1340_v14, %v210_v39  ;;  %v1404_v57 = vmul.f32 %v1342_v15, %v211_v40 }
  0x1d   : > { %v215_v52 = vld [vmem:[%s1336_s6 + $0x78] sm:$0xff]  ;;  %v216_v53 = vld [vmem:[%s1336_s6 + $0x80] sm:$0xff]  ;;  %v217_v54 = vld [vmem:[%s1336_s6 + $0x88] sm:$0xff]  ;;  %v1407_v58 = vadd.f32 %v1355_v23, %v370_v27  ;;  %v1413_v62 = vmul.f32 %v1344_v16, %v212_v45  ;;  %v1416_v63 = vmul.f32 %v1349_v20, %v213_v46  ;;  %v1419_v0 = vmul.f32 %v1351_v21, %v214_v47 }
  0x1e   : > { %v218_v59 = vld [vmem:[%s1336_s6 + $0x90] sm:$0xff]  ;;  %v219_v60 = vld [vmem:[%s1336_s6 + $0x98] sm:$0xff]  ;;  %v220_v61 = vld [vmem:[%s1336_s6 + $0xa0] sm:$0xff]  ;;  %v1422_v2 = vadd.f32 %v1361_v28, %v371_v34  ;;  %v1428_v6 = vmul.f32 %v1353_v22, %v215_v52  ;;  %v1431_v7 = vmul.f32 %v1323_v11, %v216_v53  ;;  %v1434_v8 = vmul.f32 %v1338_v13, %v217_v54 }
  0x1f   : > { %2601 = vst [vmem:[#allocation4_spill] sm:$0xff] %v1407_v58  ;;  %v221_v3 = vld [vmem:[%s1336_s6 + $0xa8] sm:$0xff]  ;;  %v222_v4 = vld [vmem:[%s1336_s6 + $0xb0] sm:$0xff]  ;;  %v223_v5 = vld [vmem:[%s1336_s6 + $0xb8] sm:$0xff]  ;;  %v1437_v9 = vadd.f32 %v1363_v29, %v372_v41  ;;  %v1443_v18 = vmul.f32 %v1340_v14, %v218_v59  ;;  %v1446_v19 = vmul.f32 %v1342_v15, %v219_v60  ;;  %v1449_v24 = vmul.f32 %v1344_v16, %v220_v61 }
  0x20   : > { %2602 = vst [vmem:[#allocation5_spill] sm:$0xff] %v1422_v2  ;;  %v224_v10 = vld [vmem:[%s1336_s6 + $0xc0] sm:$0xff]  ;;  %v225_v12 = vld [vmem:[%s1336_s6 + $0xc8] sm:$0xff]  ;;  %v226_v17 = vld [vmem:[%s1336_s6 + $0xd0] sm:$0xff]  ;;  %v1452_v25 = vadd.f32 %v1365_v30, %v373_v42  ;;  %v1458_v32 = vmul.f32 %v1349_v20, %v221_v3  ;;  %v1461_v33 = vmul.f32 %v1351_v21, %v222_v4  ;;  %v1464_v34 = vmul.f32 %v1353_v22, %v223_v5 }
  0x21   : > { %2603 = vst [vmem:[#allocation6_spill] sm:$0xff] %v1437_v9  ;;  %v227_v26 = vld [vmem:[%s1336_s6 + $0xd8] sm:$0xff]  ;;  %v228_v27 = vld [vmem:[%s1336_s6 + $0xe0] sm:$0xff]  ;;  %v229_v31 = vld [vmem:[%s1336_s6 + $0xe8] sm:$0xff]  ;;  %v1467_v38 = vadd.f32 %v1371_v35, %v374_v43  ;;  %v1473_v42 = vmul.f32 %v1323_v11, %v224_v10  ;;  %v1476_v45 = vmul.f32 %v1338_v13, %v225_v12  ;;  %v1479_v46 = vmul.f32 %v1340_v14, %v226_v17 }
  0x22   : > { %2604 = vst [vmem:[#allocation7_spill] sm:$0xff] %v1452_v25  ;;  %v230_v39 = vld [vmem:[%s1336_s6 + $0xf0] sm:$0xff]  ;;  %v231_v40 = vld [vmem:[%s1336_s6 + $0xf8] sm:$0xff]  ;;  %v232_v41 = vld [vmem:[%s1336_s6 + $0x100] sm:$0xff]  ;;  %v1482_v47 = vadd.f32 %v1373_v36, %v375_v48  ;;  %v1488_v54 = vmul.f32 %v1342_v15, %v227_v26  ;;  %v1491_v59 = vmul.f32 %v1344_v16, %v228_v27  ;;  %v1494_v60 = vmul.f32 %v1349_v20, %v229_v31 }
  0x23   : > { %2605 = vst [vmem:[#allocation8_spill] sm:$0xff] %v1467_v38  ;;  %v233_v43 = vld [vmem:[%s1336_s6 + $0x108] sm:$0xff]  ;;  %v234_v52 = vld [vmem:[%s1336_s6 + $0x110] sm:$0xff]  ;;  %v235_v53 = vld [vmem:[%s1336_s6 + $0x118] sm:$0xff]  ;;  %v1497_v61 = vadd.f32 %v1375_v37, %v376_v49  ;;  %v1503_v5 = vmul.f32 %v1351_v21, %v230_v39  ;;  %v1506_v10 = vmul.f32 %v1353_v22, %v231_v40  ;;  %v1509_v12 = vmul.f32 %v1323_v11, %v232_v41 }
  0x24   : > { %2606 = vst [vmem:[#allocation9_spill] sm:$0xff] %v1482_v47  ;;  %v236_v48 = vld [vmem:[%s1336_s6 + $0x120] sm:$0xff]  ;;  %v237_v3 = vld [vmem:[%s1336_s6 + $0x128] sm:$0xff]  ;;  %v238_v4 = vld [vmem:[%s1336_s6 + $0x130] sm:$0xff]  ;;  %v1512_v17 = vadd.f32 %v1383_v44, %v377_v50  ;;  %v1518_v31 = vmul.f32 %v1338_v13, %v233_v43  ;;  %v1521_v39 = vmul.f32 %v1340_v14, %v234_v52  ;;  %v1524_v40 = vmul.f32 %v1342_v15, %v235_v53 }
  0x25   : > { %2607 = vst [vmem:[#allocation10_spill] sm:$0xff] %v1497_v61  ;;  %v239_v49 = vld [vmem:[%s1336_s6 + $0x138] sm:$0xff]  ;;  %v240_v26 = vld [vmem:[%s1336_s6 + $0x140] sm:$0xff]  ;;  %v241_v27 = vld [vmem:[%s1336_s6 + $0x148] sm:$0xff]  ;;  %v1528_v41 = vadd.f32 %v1355_v23, %v1392_v51  ;;  %v1534_v61 = vmul.f32 %v1344_v16, %v236_v48  ;;  %v1537_v43 = vmul.f32 %v1349_v20, %v237_v3  ;;  %v1540_v52 = vmul.f32 %v1351_v21, %v238_v4 }
  0x26   : > { %2608 = vst [vmem:[#allocation11_spill] sm:$0xff] %v1512_v17  ;;  %v242_v50 = vld [vmem:[%s1336_s6 + $0x150] sm:$0xff]  ;;  %v243_v1 = vld [vmem:[%s1336_s6 + $0x158] sm:$0xff]  ;;  %v244_v17 = vld [vmem:[%s1336_s6 + $0x160] sm:$0xff]  ;;  %v1544_v53 = vadd.f32 %v1361_v28, %v1398_v55  ;;  %v1550_v38 = vmul.f32 %v1353_v22, %v239_v49  ;;  %v1553_v48 = vmul.f32 %v1323_v11, %v240_v26  ;;  %v1556_v3 = vmul.f32 %v1338_v13, %v241_v27 }
  0x27   : > { %2609 = vst [vmem:[#allocation12_spill] sm:$0xff] %v1528_v41  ;;  %v245_v51 = vld [vmem:[%s1336_s6 + $0x168] sm:$0xff]  ;;  %v246_v41 = vld [vmem:[%s1336_s6 + $0x170] sm:$0xff]  ;;  %v247_v47 = vld [vmem:[%s1336_s6 + $0x178] sm:$0xff]  ;;  %v1560_v4 = vadd.f32 %v1363_v29, %v1401_v56  ;;  %v1566_v9 = vmul.f32 %v1340_v14, %v242_v50  ;;  %v1569_v49 = vmul.f32 %v1342_v15, %v243_v1  ;;  %v1572_v26 = vmul.f32 %v1344_v16, %v244_v17 }
  0x28   : > { %2610 = vst [vmem:[#allocation13_spill] sm:$0xff] %v1544_v53  ;;  %v248_v55 = vld [vmem:[%s1336_s6 + $0x180] sm:$0xff]  ;;  %v249_v53 = vld [vmem:[%s1336_s6 + $0x188] sm:$0xff]  ;;  %v250_v25 = vld [vmem:[%s1336_s6 + $0x190] sm:$0xff]  ;;  %v1576_v27 = vadd.f32 %v1365_v30, %v1404_v57  ;;  %v1582_v58 = vmul.f32 %v1349_v20, %v245_v51  ;;  %v1585_v50 = vmul.f32 %v1351_v21, %v246_v41  ;;  %v1588_v1 = vmul.f32 %v1353_v22, %v247_v47 }
  0x29   : > { %2611 = vst [vmem:[#allocation14_spill] sm:$0xff] %v1560_v4  ;;  %2612 = vst [vmem:[#allocation15_spill] sm:$0xff] %v1569_v49  ;;  %v251_v56 = vld [vmem:[%s1336_s6 + $0x198] sm:$0xff]  ;;  %v252_v4 = vld [vmem:[%s1336_s6 + $0x1a0] sm:$0xff]  ;;  %v1592_v17 = vadd.f32 %v1371_v35, %v1413_v62  ;;  %v1598_v49 = vmul.f32 %v1323_v11, %v248_v55  ;;  %v1601_v51 = vmul.f32 %v1338_v13, %v249_v53 }
  0x2a   : > { %2613 = vst [vmem:[#allocation16_spill] sm:$0xff] %v1572_v26  ;;  %2614 = vst [vmem:[#allocation17_spill] sm:$0xff] %v1576_v27  ;;  %v253_v2 = vld [vmem:[%s1336_s6 + $0x1a8] sm:$0xff]  ;;  %v254_v57 = vld [vmem:[%s1336_s6 + $0x1b0] sm:$0xff]  ;;  %v1604_v41 = vmul.f32 %v1340_v14, %v250_v25  ;;  %v1608_v47 = vadd.f32 %v1373_v36, %v1416_v63  ;;  %v1617_v55 = vmul.f32 %v1344_v16, %v252_v4 }
  0x2b   : > { %2615 = vst [vmem:[#allocation18_spill] sm:$0xff] %v1585_v50  ;;  %2616 = vst [vmem:[#allocation19_spill] sm:$0xff] %v1588_v1  ;;  %v255_v27 = vld [vmem:[%s1336_s6 + $0x1b8] sm:$0xff]  ;;  %v256_v26 = vld [vmem:[%s1336_s6 + $0x1c0] sm:$0xff]  ;;  %v1614_v50 = vmul.f32 %v1342_v15, %v251_v56  ;;  %v1620_v53 = vmul.f32 %v1349_v20, %v253_v2  ;;  %v1624_v25 = vadd.f32 %v1375_v37, %v1419_v0 }
  0x2c   : > { %2617 = vst [vmem:[#allocation20_spill] sm:$0xff] %v1592_v17  ;;  %2618 = vst [vmem:[#allocation21_spill] sm:$0xff] %v1601_v51  ;;  %v257_v62 = vld [vmem:[%s1336_s6 + $0x1c8] sm:$0xff]  ;;  %v258_v17 = vld [vmem:[%s1336_s6 + $0x1d0] sm:$0xff]  ;;  %v1630_v51 = vmul.f32 %v1351_v21, %v254_v57  ;;  %v1633_v56 = vmul.f32 %v1353_v22, %v255_v27  ;;  %v1636_v4 = vmul.f32 %v1323_v11, %v256_v26 }
  0x2d   : > { %2619 = vst [vmem:[#allocation22_spill] sm:$0xff] %v1604_v41  ;;  %2620 = vst [vmem:[#allocation23_spill] sm:$0xff] %v1608_v47  ;;  %v259_v1 = vld [vmem:[%s1336_s6 + $0x1d8] sm:$0xff]  ;;  %v260_v63 = vld [vmem:[%s1336_s6 + $0x1e0] sm:$0xff]  ;;  %v1640_v2 = vadd.f32 %v1383_v44, %v1428_v6  ;;  %v1649_v57 = vmul.f32 %v1340_v14, %v258_v17  ;;  %v1656_v26 = vadd.f32 %v1355_v23, %v1431_v7 }
  0x2e   : > { %2621 = vst [vmem:[#allocation24_spill] sm:$0xff] %v1617_v55  ;;  %2622 = vst [vmem:[#allocation25_spill] sm:$0xff] %v1620_v53  ;;  %v261_v47 = vld [vmem:[%s1336_s6 + $0x1e8] sm:$0xff]  ;;  %v262_v41 = vld [vmem:[%s1336_s6 + $0x1f0] sm:$0xff]  ;;  %v1646_v55 = vmul.f32 %v1338_v13, %v257_v62  ;;  %v1652_v27 = vmul.f32 %v1342_v15, %v259_v1  ;;  %v1672_v1 = vadd.f32 %v1361_v28, %v1434_v8 }
  0x2f   : > { %2623 = vst [vmem:[#allocation26_spill] sm:$0xff] %v1624_v25  ;;  %2624 = vst [vmem:[#allocation27_spill] sm:$0xff] %v1633_v56  ;;  %v263_v0 = vld [vmem:[%s1336_s6 + $0x1f8] sm:$0xff]  ;;  %v264_v25 = vld [vmem:[%s1336_s6 + $0x200] sm:$0xff]  ;;  %v1662_v56 = vmul.f32 %v1344_v16, %v260_v63  ;;  %v1665_v62 = vmul.f32 %v1349_v20, %v261_v47  ;;  %v1668_v17 = vmul.f32 %v1351_v21, %v262_v41 }
  0x30   : > { %2625 = vst [vmem:[#allocation28_spill] sm:$0xff] %v1636_v4  ;;  %2626 = vst [vmem:[#allocation29_spill] sm:$0xff] %v1640_v2  ;;  %v265_v53 = vld [vmem:[%s1336_s6 + $0x208] sm:$0xff]  ;;  %v266_v6 = vld [vmem:[%s1336_s6 + $0x210] sm:$0xff]  ;;  %v1681_v63 = vmul.f32 %v1323_v11, %v264_v25  ;;  %v1688_v41 = vadd.f32 %v1363_v29, %v1443_v18 }
  0x31   : > { %2627 = vst [vmem:[#allocation30_spill] sm:$0xff] %v1649_v57  ;;  %2628 = vst [vmem:[#allocation31_spill] sm:$0xff] %v1652_v27  ;;  %v267_v2 = vld [vmem:[%s1336_s6 + $0x218] sm:$0xff]  ;;  %v268_v4 = vld [vmem:[%s1336_s6 + $0x220] sm:$0xff]  ;;  %v1678_v57 = vmul.f32 %v1353_v22, %v263_v0  ;;  %v1684_v47 = vmul.f32 %v1338_v13, %v265_v53  ;;  %v1704_v53 = vadd.f32 %v1365_v30, %v1446_v19 }
  0x32   : > { %2629 = vst [vmem:[#allocation32_spill] sm:$0xff] %v1656_v26  ;;  %2630 = vst [vmem:[#allocation33_spill] sm:$0xff] %v1665_v62  ;;  %v269_v7 = vld [vmem:[%s1336_s6 + $0x228] sm:$0xff]  ;;  %v270_v26 = vld [vmem:[%s1336_s6 + $0x230] sm:$0xff]  ;;  %v1694_v62 = vmul.f32 %v1340_v14, %v266_v6  ;;  %v1697_v0 = vmul.f32 %v1342_v15, %v267_v2  ;;  %v1700_v25 = vmul.f32 %v1344_v16, %v268_v4 }
  0x33   : > { %2631 = vst [vmem:[#allocation34_spill] sm:$0xff] %v1668_v17  ;;  %2632 = vst [vmem:[#allocation35_spill] sm:$0xff] %v1672_v1  ;;  %v271_v27 = vld [vmem:[%s1336_s6 + $0x238] sm:$0xff]  ;;  %v272_v8 = vld [vmem:[%s1336_s6 + $0x240] sm:$0xff]  ;;  %v1713_v6 = vmul.f32 %v1351_v21, %v270_v26  ;;  %v1720_v4 = vadd.f32 %v1371_v35, %v1449_v24 }
  0x34   : > { %2633 = vst [vmem:[#allocation36_spill] sm:$0xff] %v1681_v63  ;;  %2634 = vst [vmem:[#allocation37_spill] sm:$0xff] %v1684_v47  ;;  %v273_v1 = vld [vmem:[%s1336_s6 + $0x248] sm:$0xff]  ;;  %v274_v17 = vld [vmem:[%s1336_s6 + $0x250] sm:$0xff]  ;;  %v1710_v63 = vmul.f32 %v1349_v20, %v269_v7  ;;  %v1716_v2 = vmul.f32 %v1353_v22, %v271_v27  ;;  %v1736_v27 = vadd.f32 %v1373_v36, %v1458_v32 }
  0x35   : > { %2635 = vst [vmem:[#allocation38_spill] sm:$0xff] %v1688_v41  ;;  %2636 = vst [vmem:[#allocation39_spill] sm:$0xff] %v1697_v0  ;;  %v275_v18 = vld [vmem:[%s1336_s6 + $0x258] sm:$0xff]  ;;  %v276_v41 = vld [vmem:[%s1336_s6 + $0x260] sm:$0xff]  ;;  %v1726_v0 = vmul.f32 %v1323_v11, %v272_v8  ;;  %v1729_v7 = vmul.f32 %v1338_v13, %v273_v1  ;;  %v1732_v26 = vmul.f32 %v1340_v14, %v274_v17 }
  0x36   : > { %2637 = vst [vmem:[#allocation40_spill] sm:$0xff] %v1700_v25  ;;  %2638 = vst [vmem:[#allocation41_spill] sm:$0xff] %v1704_v53  ;;  %v277_v47 = vld [vmem:[%s1336_s6 + $0x268] sm:$0xff]  ;;  %v278_v19 = vld [vmem:[%s1336_s6 + $0x270] sm:$0xff]  ;;  %v1745_v8 = vmul.f32 %v1344_v16, %v276_v41  ;;  %v1752_v17 = vadd.f32 %v1375_v37, %v1461_v33 }
  0x37   : > { %2639 = vst [vmem:[#allocation42_spill] sm:$0xff] %v1713_v6  ;;  %2640 = vst [vmem:[#allocation43_spill] sm:$0xff] %v1716_v2  ;;  %v279_v53 = vld [vmem:[%s1336_s6 + $0x278] sm:$0xff]  ;;  %v280_v25 = vld [vmem:[%s1336_s6 + $0x280] sm:$0xff]  ;;  %v1742_v6 = vmul.f32 %v1342_v15, %v275_v18  ;;  %v1748_v1 = vmul.f32 %v1349_v20, %v277_v47  ;;  %v1768_v47 = vadd.f32 %v1383_v44, %v1464_v34 }
  0x38   : > { %2641 = vst [vmem:[#allocation44_spill] sm:$0xff] %v1720_v4  ;;  %2642 = vst [vmem:[#allocation45_spill] sm:$0xff] %v1729_v7  ;;  %v281_v24 = vld [vmem:[%s1336_s6 + $0x288] sm:$0xff]  ;;  %v282_v4 = vld [vmem:[%s1336_s6 + $0x290] sm:$0xff]  ;;  %v1758_v7 = vmul.f32 %v1351_v21, %v278_v19  ;;  %v1761_v18 = vmul.f32 %v1353_v22, %v279_v53  ;;  %v1764_v41 = vmul.f32 %v1323_v11, %v280_v25 }
  0x39   : > { %2643 = vst [vmem:[#allocation46_spill] sm:$0xff] %v1732_v26  ;;  %2644 = vst [vmem:[#allocation47_spill] sm:$0xff] %v1736_v27  ;;  %v283_v2 = vld [vmem:[%s1336_s6 + $0x298] sm:$0xff]  ;;  %v284_v32 = vld [vmem:[%s1336_s6 + $0x2a0] sm:$0xff]  ;;  %v1777_v19 = vmul.f32 %v1340_v14, %v282_v4  ;;  %v1784_v25 = vadd.f32 %v1355_v23, %v1473_v42 }
  0x3a   : > { %2645 = vst [vmem:[#allocation48_spill] sm:$0xff] %v1745_v8  ;;  %2646 = vst [vmem:[#allocation49_spill] sm:$0xff] %v1748_v1  ;;  %v285_v27 = vld [vmem:[%s1336_s6 + $0x2a8] sm:$0xff]  ;;  %v286_v26 = vld [vmem:[%s1336_s6 + $0x2b0] sm:$0xff]  ;;  %v1774_v8 = vmul.f32 %v1338_v13, %v281_v24  ;;  %v1780_v53 = vmul.f32 %v1342_v15, %v283_v2  ;;  %v1800_v2 = vadd.f32 %v1361_v28, %v1476_v45 }
  0x3b   : > { %2647 = vst [vmem:[#allocation50_spill] sm:$0xff] %v1752_v17  ;;  %2648 = vst [vmem:[#allocation51_spill] sm:$0xff] %v1761_v18  ;;  %v287_v33 = vld [vmem:[%s1336_s6 + $0x2b8] sm:$0xff]  ;;  %v288_v17 = vld [vmem:[%s1336_s6 + $0x2c0] sm:$0xff]  ;;  %v1790_v18 = vmul.f32 %v1344_v16, %v284_v32  ;;  %v1793_v24 = vmul.f32 %v1349_v20, %v285_v27  ;;  %v1796_v4 = vmul.f32 %v1351_v21, %v286_v26 }
  0x3c   : > { %2649 = vst [vmem:[#allocation52_spill] sm:$0xff] %v1764_v41  ;;  %2650 = vst [vmem:[#allocation53_spill] sm:$0xff] %v1768_v47  ;;  %v289_v1 = vld [vmem:[%s1336_s6 + $0x2c8] sm:$0xff]  ;;  %v290_v34 = vld [vmem:[%s1336_s6 + $0x2d0] sm:$0xff]  ;;  %v1809_v32 = vmul.f32 %v1323_v11, %v288_v17  ;;  %v1816_v26 = vadd.f32 %v1363_v29, %v1479_v46 }
  0x3d   : > { %2651 = vst [vmem:[#allocation54_spill] sm:$0xff] %v1777_v19  ;;  %2652 = vst [vmem:[#allocation55_spill] sm:$0xff] %v1780_v53  ;;  %v291_v47 = vld [vmem:[%s1336_s6 + $0x2d8] sm:$0xff]  ;;  %v292_v41 = vld [vmem:[%s1336_s6 + $0x2e0] sm:$0xff]  ;;  %v1806_v19 = vmul.f32 %v1353_v22, %v287_v33  ;;  %v1812_v27 = vmul.f32 %v1338_v13, %v289_v1  ;;  %v1832_v1 = vadd.f32 %v1365_v30, %v1488_v54 }
  0x3e   : > { %2653 = vst [vmem:[#allocation56_spill] sm:$0xff] %v1784_v25  ;;  %2654 = vst [vmem:[#allocation57_spill] sm:$0xff] %v1793_v24  ;;  %v293_v42 = vld [vmem:[%s1336_s6 + $0x2e8] sm:$0xff]  ;;  %v294_v25 = vld [vmem:[%s1336_s6 + $0x2f0] sm:$0xff]  ;;  %v1822_v24 = vmul.f32 %v1340_v14, %v290_v34  ;;  %v1825_v33 = vmul.f32 %v1342_v15, %v291_v47  ;;  %v1828_v17 = vmul.f32 %v1344_v16, %v292_v41 }
  0x3f   : > { %2655 = vst [vmem:[#allocation58_spill] sm:$0xff] %v1796_v4  ;;  %2656 = vst [vmem:[#allocation59_spill] sm:$0xff] %v1800_v2  ;;  %v295_v53 = vld [vmem:[%s1336_s6 + $0x2f8] sm:$0xff]  ;;  %v296_v45 = vld [vmem:[%s1336_s6 + $0x300] sm:$0xff]  ;;  %v1841_v34 = vmul.f32 %v1351_v21, %v294_v25  ;;  %v1848_v41 = vadd.f32 %v1371_v35, %v1491_v59 }
  0x40   : > { %2657 = vst [vmem:[#allocation60_spill] sm:$0xff] %v1809_v32  ;;  %2658 = vst [vmem:[#allocation61_spill] sm:$0xff] %v1812_v27  ;;  %v297_v2 = vld [vmem:[%s1336_s6 + $0x308] sm:$0xff]  ;;  %v298_v4 = vld [vmem:[%s1336_s6 + $0x310] sm:$0xff]  ;;  %v1838_v32 = vmul.f32 %v1349_v20, %v293_v42  ;;  %v1844_v47 = vmul.f32 %v1353_v22, %v295_v53  ;;  %v1864_v53 = vadd.f32 %v1373_v36, %v1494_v60 }
  0x41   : > { %2659 = vst [vmem:[#allocation62_spill] sm:$0xff] %v1816_v26  ;;  %2660 = vst [vmem:[#allocation63_spill] sm:$0xff] %v1825_v33  ;;  %v299_v46 = vld [vmem:[%s1336_s6 + $0x318] sm:$0xff]  ;;  %v300_v26 = vld [vmem:[%s1336_s6 + $0x320] sm:$0xff]  ;;  %v1854_v33 = vmul.f32 %v1323_v11, %v296_v45  ;;  %v1857_v42 = vmul.f32 %v1338_v13, %v297_v2  ;;  %v1860_v25 = vmul.f32 %v1340_v14, %v298_v4 }
  0x42   : > { %2661 = vst [vmem:[#allocation64_spill] sm:$0xff] %v1828_v17  ;;  %2662 = vst [vmem:[#allocation65_spill] sm:$0xff] %v1832_v1  ;;  %v301_v27 = vld [vmem:[%s1336_s6 + $0x328] sm:$0xff]  ;;  %v302_v54 = vld [vmem:[%s1336_s6 + $0x330] sm:$0xff]  ;;  %v1873_v45 = vmul.f32 %v1344_v16, %v300_v26  ;;  %v1880_v4 = vadd.f32 %v1375_v37, %v1503_v5 }
  0x43   : > { %2663 = vst [vmem:[#allocation66_spill] sm:$0xff] %v1841_v34  ;;  %2664 = vst [vmem:[#allocation67_spill] sm:$0xff] %v1844_v47  ;;  %v303_v1 = vld [vmem:[%s1336_s6 + $0x338] sm:$0xff]  ;;  %v304_v17 = vld [vmem:[%s1336_s6 + $0x340] sm:$0xff]  ;;  %v1870_v34 = vmul.f32 %v1342_v15, %v299_v46  ;;  %v1876_v2 = vmul.f32 %v1349_v20, %v301_v27  ;;  %v1896_v27 = vadd.f32 %v1383_v44, %v1506_v10 }
  0x44   : > { %2665 = vst [vmem:[#allocation68_spill] sm:$0xff] %v1848_v41  ;;  %2666 = vst [vmem:[#allocation69_spill] sm:$0xff] %v1857_v42  ;;  %v305_v59 = vld [vmem:[%s1336_s6 + $0x348] sm:$0xff]  ;;  %v306_v41 = vld [vmem:[%s1336_s6 + $0x350] sm:$0xff]  ;;  %v1886_v42 = vmul.f32 %v1351_v21, %v302_v54  ;;  %v1889_v46 = vmul.f32 %v1353_v22, %v303_v1  ;;  %v1892_v26 = vmul.f32 %v1323_v11, %v304_v17 }
  0x45   : > { %2667 = vst [vmem:[#allocation70_spill] sm:$0xff] %v1860_v25  ;;  %2668 = vst [vmem:[#allocation71_spill] sm:$0xff] %v1864_v53  ;;  %v307_v47 = vld [vmem:[%s1336_s6 + $0x358] sm:$0xff]  ;;  %v308_v60 = vld [vmem:[%s1336_s6 + $0x360] sm:$0xff]  ;;  %v1905_v54 = vmul.f32 %v1340_v14, %v306_v41  ;;  %v1912_v17 = vadd.f32 %v1355_v23, %v1509_v12 }
  0x46   : > { %2669 = vst [vmem:[#allocation72_spill] sm:$0xff] %v1873_v45  ;;  %2670 = vst [vmem:[#allocation73_spill] sm:$0xff] %v1876_v2  ;;  %v309_v53 = vld [vmem:[%s1336_s6 + $0x368] sm:$0xff]  ;;  %v310_v25 = vld [vmem:[%s1336_s6 + $0x370] sm:$0xff]  ;;  %v1902_v45 = vmul.f32 %v1338_v13, %v305_v59  ;;  %v1908_v1 = vmul.f32 %v1342_v15, %v307_v47  ;;  %v1928_v47 = vadd.f32 %v1361_v28, %v1518_v31 }
  0x47   : > { %2671 = vst [vmem:[#allocation74_spill] sm:$0xff] %v1880_v4  ;;  %2672 = vst [vmem:[#allocation75_spill] sm:$0xff] %v1889_v46  ;;  %v311_v5 = vld [vmem:[%s1336_s6 + $0x378] sm:$0xff]  ;;  %v312_v4 = vld [vmem:[%s1336_s6 + $0x380] sm:$0xff]  ;;  %v1918_v46 = vmul.f32 %v1344_v16, %v308_v60  ;;  %v1921_v59 = vmul.f32 %v1349_v20, %v309_v53  ;;  %v1924_v41 = vmul.f32 %v1351_v21, %v310_v25 }
  0x48   : > { %2673 = vst [vmem:[#allocation76_spill] sm:$0xff] %v1892_v26  ;;  %2674 = vst [vmem:[#allocation77_spill] sm:$0xff] %v1896_v27  ;;  %v313_v2 = vld [vmem:[%s1336_s6 + $0x388] sm:$0xff]  ;;  %v314_v10 = vld [vmem:[%s1336_s6 + $0x390] sm:$0xff]  ;;  %v1937_v60 = vmul.f32 %v1323_v11, %v312_v4  ;;  %v1944_v25 = vadd.f32 %v1363_v29, %v1521_v39 }
  0x49   : > { %2675 = vst [vmem:[#allocation78_spill] sm:$0xff] %v1905_v54  ;;  %2676 = vst [vmem:[#allocation79_spill] sm:$0xff] %v1908_v1  ;;  %v315_v27 = vld [vmem:[%s1336_s6 + $0x398] sm:$0xff]  ;;  %v316_v26 = vld [vmem:[%s1336_s6 + $0x3a0] sm:$0xff]  ;;  %v1934_v54 = vmul.f32 %v1353_v22, %v311_v5  ;;  %v1940_v53 = vmul.f32 %v1338_v13, %v313_v2  ;;  %v1960_v2 = vadd.f32 %v1365_v30, %v1524_v40 }
  0x4a   : > { %2677 = vst [vmem:[#allocation80_spill] sm:$0xff] %v1912_v17  ;;  %2678 = vst [vmem:[#allocation81_spill] sm:$0xff] %v1921_v59  ;;  %v317_v12 = vld [vmem:[%s1336_s6 + $0x3a8] sm:$0xff]  ;;  %v318_v17 = vld [vmem:[%s1336_s6 + $0x3b0] sm:$0xff]  ;;  %v1950_v59 = vmul.f32 %v1340_v14, %v314_v10  ;;  %v1953_v5 = vmul.f32 %v1342_v15, %v315_v27  ;;  %v1956_v4 = vmul.f32 %v1344_v16, %v316_v26 }
  0x4b   : > { %2679 = vst [vmem:[#allocation82_spill] sm:$0xff] %v1924_v41  ;;  %2680 = vst [vmem:[#allocation83_spill] sm:$0xff] %v1928_v47  ;;  %v319_v1 = vld [vmem:[%s1336_s6 + $0x3b8] sm:$0xff]  ;;  %v320_v31 = vld [vmem:[%s1336_s6 + $0x3c0] sm:$0xff]  ;;  %v1976_v26 = vadd.f32 %v1371_v35, %v1534_v61 }
  0x4c   : > { %2681 = vst [vmem:[#allocation84_spill] sm:$0xff] %v1934_v54  ;;  %2682 = vst [vmem:[#allocation85_spill] sm:$0xff] %v1937_v60  ;;  %v321_v47 = vld [vmem:[%s1336_s6 + $0x3c8] sm:$0xff]  ;;  %v322_v41 = vld [vmem:[%s1336_s6 + $0x3d0] sm:$0xff]  ;;  %v1966_v60 = vmul.f32 %v1349_v20, %v317_v12  ;;  %v1969_v54 = vmul.f32 %v1351_v21, %v318_v17  ;;  %v1972_v10 = vmul.f32 %v1353_v22, %v319_v1 }
  0x4d   : > { %2683 = vst [vmem:[#allocation86_spill] sm:$0xff] %v1940_v53  ;;  %2684 = vst [vmem:[#allocation87_spill] sm:$0xff] %v1944_v25  ;;  %v323_v53 = vld [vmem:[%s1336_s6 + $0x3d8] sm:$0xff]  ;;  %v324_v39 = vld [vmem:[%s1336_s6 + $0x3e0] sm:$0xff]  ;;  %v1981_v40 = vmul.f32 %v1323_v11, %v320_v31  ;;  %v1987_v12 = vmul.f32 %v1340_v14, %v322_v41  ;;  %v1991_v17 = vadd.f32 %v1373_v36, %v1537_v43 }
  0x4e   : > { %2685 = vst [vmem:[#allocation88_spill] sm:$0xff] %v1956_v4  ;;  %2686 = vst [vmem:[#allocation89_spill] sm:$0xff] %v1960_v2  ;;  %v325_v25 = vld [vmem:[%s1336_s6 + $0x3e8] sm:$0xff]  ;;  %v326_v27 = vld [vmem:[%s1336_s6 + $0x3f0] sm:$0xff]  ;;  %v1984_v2 = vmul.f32 %v1338_v13, %v321_v47  ;;  %v1994_v1 = vmul.f32 %v1342_v15, %v323_v53  ;;  %v1997_v61 = vmul.f32 %v1344_v16, %v324_v39 }
  0x4f   : > { %2687 = vst [vmem:[#allocation90_spill] sm:$0xff] %v1976_v26  ;;  %v327_v4 = vld [vmem:[%s1336_s6 + $0x3f8] sm:$0xff]  ;;  %2688 = vst [vmem:[#allocation91_spill] sm:$0xff] %v1981_v40  ;;  %v2000_v26 = vmul.f32 %v1349_v20, %v325_v25  ;;  %v2004_v11 = vadd.f32 %v1375_v37, %v1540_v52  ;;  %v2007_v13 = vmul.f32 %v1351_v21, %v326_v27  ;;  %v2690_v21 = vld [vmem:[#allocation15_spill] sm:$0xff] }
  0x50   : > { %v2010_v14 = vmul.f32 %v1353_v22, %v327_v4  ;;  %v2014_v15 = vadd.f32 %v1383_v44, %v1550_v38  ;;  %v2018_v16 = vadd.f32 %v1355_v23, %v1553_v48  ;;  %v2022_v20 = vadd.f32 %v1361_v28, %v1556_v3  ;;  %v2691_v52 = vld [vmem:[#allocation16_spill] sm:$0xff]  ;;  %v2692_v41 = vld [vmem:[#allocation18_spill] sm:$0xff]  ;;  %v2693_v47 = vld [vmem:[#allocation19_spill] sm:$0xff] }
  0x51   : > { %v2026_v43 = vadd.f32 %v1363_v29, %v1566_v9  ;;  %v2030_v22 = vadd.f32 %v1365_v30, %v2690_v21  ;;  %v2034_v38 = vadd.f32 %v1371_v35, %v2691_v52  ;;  %v2038_v48 = vadd.f32 %v1373_v36, %v1582_v58  ;;  %v2695_v25 = vld [vmem:[#allocation21_spill] sm:$0xff]  ;;  %v2696_v4 = vld [vmem:[#allocation22_spill] sm:$0xff]  ;;  %v2697_v27 = vld [vmem:[#allocation24_spill] sm:$0xff] }
  0x52   : > { %2689 = vst [vmem:[#allocation92_spill] sm:$0xff] %v2018_v16  ;;  %v2042_v3 = vadd.f32 %v1375_v37, %v2692_v41  ;;  %v2046_v9 = vadd.f32 %v1383_v44, %v2693_v47  ;;  %v2050_v53 = vadd.f32 %v1355_v23, %v1598_v49  ;;  %v2054_v31 = vadd.f32 %v1361_v28, %v2695_v25  ;;  %v2698_v52 = vld [vmem:[#allocation25_spill] sm:$0xff]  ;;  %v2699_v47 = vld [vmem:[#allocation27_spill] sm:$0xff]  ;;  %v2702_v40 = vld [vmem:[#allocation30_spill] sm:$0xff] }
  0x53   : > { %v2058_v58 = vadd.f32 %v1363_v29, %v2696_v4  ;;  %v2062_v39 = vadd.f32 %v1365_v30, %v1614_v50  ;;  %v2066_v21 = vadd.f32 %v1371_v35, %v2697_v27  ;;  %v2070_v49 = vadd.f32 %v1373_v36, %v2698_v52  ;;  %v2700_v4 = vld [vmem:[#allocation28_spill] sm:$0xff]  ;;  %v2706_v16 = vld [vmem:[#allocation33_spill] sm:$0xff] }
  0x54   : > { %2694 = vst [vmem:[#allocation15_spill] sm:$0xff] %v2050_v53  ;;  %v2074_v41 = vadd.f32 %v1375_v37, %v1630_v51  ;;  %v2078_v25 = vadd.f32 %v1383_v44, %v2699_v47  ;;  %v2082_v50 = vadd.f32 %v1355_v23, %v2700_v4  ;;  %v2086_v27 = vadd.f32 %v1361_v28, %v1646_v55  ;;  %v2704_v53 = vld [vmem:[#allocation31_spill] sm:$0xff] }
  0x55   : > { %v2090_v52 = vadd.f32 %v1363_v29, %v2702_v40  ;;  %v2094_v51 = vadd.f32 %v1365_v30, %v2704_v53  ;;  %v2098_v47 = vadd.f32 %v1371_v35, %v1662_v56  ;;  %v2102_v4 = vadd.f32 %v1373_v36, %v2706_v16 }
  0x56   : > { %2701 = vst [vmem:[#allocation16_spill] sm:$0xff] %v2082_v50  ;;  %v2708_v50 = vld [vmem:[#allocation34_spill] sm:$0xff]  ;;  %v2110_v40 = vadd.f32 %v1383_v44, %v1678_v57  ;;  %v2122_v16 = vadd.f32 %v1363_v29, %v1694_v62 }
  0x57   : > { %2703 = vst [vmem:[#allocation18_spill] sm:$0xff] %v2090_v52  ;;  %2705 = vst [vmem:[#allocation19_spill] sm:$0xff] %v2094_v51  ;;  %v2106_v55 = vadd.f32 %v1375_v37, %v2708_v50  ;;  %v2710_v52 = vld [vmem:[#allocation36_spill] sm:$0xff]  ;;  %v2712_v51 = vld [vmem:[#allocation37_spill] sm:$0xff] }
  0x58   : > { %2707 = vst [vmem:[#allocation21_spill] sm:$0xff] %v2102_v4  ;;  %v2114_v53 = vadd.f32 %v1355_v23, %v2710_v52  ;;  %v2118_v56 = vadd.f32 %v1361_v28, %v2712_v51  ;;  %v2714_v4 = vld [vmem:[#allocation39_spill] sm:$0xff]  ;;  %v2134_v52 = vadd.f32 %v1373_v36, %v1710_v63 }
  0x59   : > { %2709 = vst [vmem:[#allocation22_spill] sm:$0xff] %v2106_v55  ;;  %v2126_v50 = vadd.f32 %v1365_v30, %v2714_v4  ;;  %v2716_v55 = vld [vmem:[#allocation40_spill] sm:$0xff]  ;;  %v2146_v4 = vadd.f32 %v1355_v23, %v1726_v0 }
  0x5a   : > { %2711 = vst [vmem:[#allocation24_spill] sm:$0xff] %v2114_v53  ;;  %2713 = vst [vmem:[#allocation25_spill] sm:$0xff] %v2118_v56  ;;  %v2130_v57 = vadd.f32 %v1371_v35, %v2716_v55  ;;  %v2718_v53 = vld [vmem:[#allocation42_spill] sm:$0xff]  ;;  %v2720_v56 = vld [vmem:[#allocation43_spill] sm:$0xff] }
  0x5b   : > { %2715 = vst [vmem:[#allocation27_spill] sm:$0xff] %v2126_v50  ;;  %v2138_v51 = vadd.f32 %v1375_v37, %v2718_v53  ;;  %v2142_v62 = vadd.f32 %v1383_v44, %v2720_v56  ;;  %2722 = vst [vmem:[#allocation33_spill] sm:$0xff] %v2146_v4  ;;  %v2723_v50 = vld [vmem:[#allocation45_spill] sm:$0xff]  ;;  %v2158_v53 = vadd.f32 %v1365_v30, %v1742_v6  ;;  %v2730_v4 = vld [vmem:[#allocation51_spill] sm:$0xff] }
  0x5c   : > { %2717 = vst [vmem:[#allocation28_spill] sm:$0xff] %v2130_v57  ;;  %v2150_v55 = vadd.f32 %v1361_v28, %v2723_v50  ;;  %v2724_v57 = vld [vmem:[#allocation46_spill] sm:$0xff]  ;;  %v2170_v50 = vadd.f32 %v1375_v37, %v1758_v7 }
  0x5d   : > { %2719 = vst [vmem:[#allocation30_spill] sm:$0xff] %v2138_v51  ;;  %2721 = vst [vmem:[#allocation31_spill] sm:$0xff] %v2142_v62  ;;  %v2154_v63 = vadd.f32 %v1363_v29, %v2724_v57  ;;  %v2726_v51 = vld [vmem:[#allocation48_spill] sm:$0xff]  ;;  %v2728_v62 = vld [vmem:[#allocation49_spill] sm:$0xff]  ;;  %v2174_v57 = vadd.f32 %v1383_v44, %v2730_v4  ;;  %v2194_v4 = vadd.f32 %v1371_v35, %v1790_v18 }
  0x5e   : > { %v2162_v56 = vadd.f32 %v1371_v35, %v2726_v51  ;;  %v2166_v0 = vadd.f32 %v1373_v36, %v2728_v62  ;;  %v2182_v51 = vadd.f32 %v1361_v28, %v1774_v8 }
  0x5f   : > { %2725 = vst [vmem:[#allocation34_spill] sm:$0xff] %v2154_v63  ;;  %2731 = vst [vmem:[#allocation39_spill] sm:$0xff] %v2174_v57  ;;  %v2732_v63 = vld [vmem:[#allocation52_spill] sm:$0xff]  ;;  %v2738_v57 = vld [vmem:[#allocation57_spill] sm:$0xff] }
  0x60   : > { %2727 = vst [vmem:[#allocation36_spill] sm:$0xff] %v2162_v56  ;;  %2729 = vst [vmem:[#allocation37_spill] sm:$0xff] %v2166_v0  ;;  %v2178_v6 = vadd.f32 %v1355_v23, %v2732_v63  ;;  %v2734_v56 = vld [vmem:[#allocation54_spill] sm:$0xff]  ;;  %v2736_v0 = vld [vmem:[#allocation55_spill] sm:$0xff]  ;;  %v2198_v63 = vadd.f32 %v1373_v36, %v2738_v57  ;;  %v2218_v57 = vadd.f32 %v1363_v29, %v1822_v24 }
  0x61   : > { %v2186_v62 = vadd.f32 %v1363_v29, %v2734_v56  ;;  %v2190_v7 = vadd.f32 %v1365_v30, %v2736_v0  ;;  %v2206_v56 = vadd.f32 %v1383_v44, %v1806_v19 }
  0x62   : > { %2733 = vst [vmem:[#allocation40_spill] sm:$0xff] %v2178_v6  ;;  %2739 = vst [vmem:[#allocation45_spill] sm:$0xff] %v2198_v63  ;;  %v2740_v6 = vld [vmem:[#allocation58_spill] sm:$0xff]  ;;  %v2746_v63 = vld [vmem:[#allocation63_spill] sm:$0xff] }
  0x63   : > { %2735 = vst [vmem:[#allocation42_spill] sm:$0xff] %v2186_v62  ;;  %2737 = vst [vmem:[#allocation43_spill] sm:$0xff] %v2190_v7  ;;  %v2202_v8 = vadd.f32 %v1375_v37, %v2740_v6  ;;  %v2742_v62 = vld [vmem:[#allocation60_spill] sm:$0xff]  ;;  %v2744_v7 = vld [vmem:[#allocation61_spill] sm:$0xff]  ;;  %v2222_v6 = vadd.f32 %v1365_v30, %v2746_v63  ;;  %v2242_v63 = vadd.f32 %v1355_v23, %v1854_v33 }
  0x64   : > { %v2210_v0 = vadd.f32 %v1355_v23, %v2742_v62  ;;  %v2214_v18 = vadd.f32 %v1361_v28, %v2744_v7  ;;  %v2230_v62 = vadd.f32 %v1373_v36, %v1838_v32 }
  0x65   : > { %2741 = vst [vmem:[#allocation46_spill] sm:$0xff] %v2202_v8  ;;  %2747 = vst [vmem:[#allocation51_spill] sm:$0xff] %v2222_v6  ;;  %v2748_v8 = vld [vmem:[#allocation64_spill] sm:$0xff]  ;;  %v2755_v6 = vld [vmem:[#allocation69_spill] sm:$0xff] }
  0x66   : > { %2743 = vst [vmem:[#allocation48_spill] sm:$0xff] %v2210_v0  ;;  %2745 = vst [vmem:[#allocation49_spill] sm:$0xff] %v2214_v18  ;;  %v2226_v19 = vadd.f32 %v1371_v35, %v2748_v8  ;;  %v2750_v0 = vld [vmem:[#allocation66_spill] sm:$0xff]  ;;  %v2752_v18 = vld [vmem:[#allocation67_spill] sm:$0xff]  ;;  %v2246_v8 = vadd.f32 %v1361_v28, %v2755_v6  ;;  %v2266_v6 = vadd.f32 %v1375_v37, %v1886_v42 }
  0x67   : > { %v2234_v7 = vadd.f32 %v1375_v37, %v2750_v0  ;;  %v2238_v24 = vadd.f32 %v1383_v44, %v2752_v18  ;;  %2754 = vst [vmem:[#allocation57_spill] sm:$0xff] %v2242_v63  ;;  %v2254_v0 = vadd.f32 %v1365_v30, %v1870_v34  ;;  %v2764_v63 = vld [vmem:[#allocation75_spill] sm:$0xff] }
  0x68   : > { %2749 = vst [vmem:[#allocation52_spill] sm:$0xff] %v2226_v19  ;;  %v2756_v19 = vld [vmem:[#allocation70_spill] sm:$0xff]  ;;  %2763 = vst [vmem:[#allocation64_spill] sm:$0xff] %v2266_v6 }
  0x69   : > { %2751 = vst [vmem:[#allocation54_spill] sm:$0xff] %v2234_v7  ;;  %2753 = vst [vmem:[#allocation55_spill] sm:$0xff] %v2238_v24  ;;  %v2250_v32 = vadd.f32 %v1363_v29, %v2756_v19  ;;  %v2759_v7 = vld [vmem:[#allocation72_spill] sm:$0xff]  ;;  %v2761_v24 = vld [vmem:[#allocation73_spill] sm:$0xff]  ;;  %v2270_v19 = vadd.f32 %v1383_v44, %v2764_v63  ;;  %v2290_v63 = vadd.f32 %v1371_v35, %v1918_v46 }
  0x6a   : > { %2758 = vst [vmem:[#allocation60_spill] sm:$0xff] %v2254_v0  ;;  %v2258_v18 = vadd.f32 %v1371_v35, %v2759_v7  ;;  %v2262_v33 = vadd.f32 %v1373_v36, %v2761_v24  ;;  %v2278_v7 = vadd.f32 %v1361_v28, %v1902_v45 }
  0x6b   : > { %2757 = vst [vmem:[#allocation58_spill] sm:$0xff] %v2250_v32  ;;  %2765 = vst [vmem:[#allocation66_spill] sm:$0xff] %v2270_v19  ;;  %v2766_v32 = vld [vmem:[#allocation76_spill] sm:$0xff]  ;;  %v2774_v19 = vld [vmem:[#allocation81_spill] sm:$0xff] }
  0x6c   : > { %2760 = vst [vmem:[#allocation61_spill] sm:$0xff] %v2258_v18  ;;  %2762 = vst [vmem:[#allocation63_spill] sm:$0xff] %v2262_v33  ;;  %v2274_v34 = vadd.f32 %v1355_v23, %v2766_v32  ;;  %v2769_v18 = vld [vmem:[#allocation78_spill] sm:$0xff]  ;;  %v2771_v33 = vld [vmem:[#allocation79_spill] sm:$0xff]  ;;  %v2294_v32 = vadd.f32 %v1373_v36, %v2774_v19  ;;  %v2314_v19 = vadd.f32 %v1363_v29, %v1950_v59 }
  0x6d   : > { %2768 = vst [vmem:[#allocation69_spill] sm:$0xff] %v2278_v7  ;;  %v2282_v24 = vadd.f32 %v1363_v29, %v2769_v18  ;;  %v2286_v42 = vadd.f32 %v1365_v30, %v2771_v33  ;;  %2773 = vst [vmem:[#allocation73_spill] sm:$0xff] %v2290_v63  ;;  %v2778_v7 = vld [vmem:[#allocation84_spill] sm:$0xff]  ;;  %v2334_v59 = vadd.f32 %v1383_v44, %v1972_v10 }
  0x6e   : > { %2767 = vst [vmem:[#allocation67_spill] sm:$0xff] %v2274_v34  ;;  %2775 = vst [vmem:[#allocation75_spill] sm:$0xff] %v2294_v32  ;;  %v2776_v34 = vld [vmem:[#allocation82_spill] sm:$0xff]  ;;  %v2302_v18 = vadd.f32 %v1383_v44, %v2778_v7  ;;  %v2354_v10 = vadd.f32 %v1373_v36, %v2000_v26 }
  0x6f   : > { %2770 = vst [vmem:[#allocation70_spill] sm:$0xff] %v2282_v24  ;;  %2772 = vst [vmem:[#allocation72_spill] sm:$0xff] %v2286_v42  ;;  %v2298_v45 = vadd.f32 %v1375_v37, %v2776_v34  ;;  %v2780_v24 = vld [vmem:[#allocation85_spill] sm:$0xff]  ;;  %v2782_v42 = vld [vmem:[#allocation86_spill] sm:$0xff]  ;;  %v2318_v34 = vadd.f32 %v1365_v30, %v1953_v5  ;;  %v2338_v5 = vadd.f32 %v1361_v28, %v1984_v2 }
  0x70   : > { %2779 = vst [vmem:[#allocation78_spill] sm:$0xff] %v2302_v18  ;;  %v2306_v33 = vadd.f32 %v1355_v23, %v2780_v24  ;;  %v2310_v46 = vadd.f32 %v1361_v28, %v2782_v42  ;;  %2784 = vst [vmem:[#allocation82_spill] sm:$0xff] %v2314_v19  ;;  %v2326_v24 = vadd.f32 %v1373_v36, %v1966_v60  ;;  %v2814_v36 = vld [vmem:[#allocation44_spill] sm:$0xff]  ;;  %v2820_v2 = vld [vmem:[#allocation62_spill] sm:$0xff] }
  0x71   : > { %2777 = vst [vmem:[#allocation76_spill] sm:$0xff] %v2298_v45  ;;  %2785 = vst [vmem:[#allocation84_spill] sm:$0xff] %v2318_v34  ;;  %v2786_v45 = vld [vmem:[#allocation88_spill] sm:$0xff]  ;;  %v2330_v42 = vadd.f32 %v1375_v37, %v1969_v54  ;;  %v2346_v60 = vadd.f32 %v1365_v30, %v1994_v1  ;;  %v2350_v54 = vadd.f32 %v1371_v35, %v1997_v61  ;;  %v694_v23 = vmax.f32 %v2820_v2, 0.0  ;;  %v2821_v30 = vld [vmem:[#allocation65_spill] sm:$0xff] }
  0x72   : > { %2781 = vst [vmem:[#allocation79_spill] sm:$0xff] %v2306_v33  ;;  %2783 = vst [vmem:[#allocation81_spill] sm:$0xff] %v2310_v46  ;;  %v2322_v7 = vadd.f32 %v1371_v35, %v2786_v45  ;;  %v2342_v45 = vadd.f32 %v1363_v29, %v1987_v12  ;;  %v2358_v28 = vadd.f32 %v1375_v37, %v2007_v13  ;;  %v2811_v33 = vld [vmem:[#allocation35_spill] sm:$0xff]  ;;  %v2812_v35 = vld [vmem:[#allocation38_spill] sm:$0xff] }
  0x73   : > { %2788 = vst [vmem:[#allocation86_spill] sm:$0xff] %v2326_v24  ;;  %2789 = vst [vmem:[#allocation88_spill] sm:$0xff] %v2330_v42  ;;  %v2362_v29 = vadd.f32 %v1383_v44, %v2010_v14  ;;  %v685_v61 = vmax.f32 %v2811_v33, 0.0  ;;  %v2818_v44 = vld [vmem:[#allocation53_spill] sm:$0xff]  ;;  %v695_v33 = vmax.f32 %v2821_v30, 0.0  ;;  %v2823_v42 = vld [vmem:[#allocation71_spill] sm:$0xff] }
  0x74   : > { %2787 = vst [vmem:[#allocation85_spill] sm:$0xff] %v2322_v7  ;;  %2790 = vst [vmem:[#allocation93_spill] sm:$0xff] %v2334_v59  ;;  %v691_v12 = vmax.f32 %v2818_v44, 0.0  ;;  %v2822_v59 = vld [vmem:[#allocation68_spill] sm:$0xff]  ;;  %v2824_v24 = vld [vmem:[#allocation26_spill] sm:$0xff] }
  0x75   : > { %2791 = vst [vmem:[#allocation94_spill] sm:$0xff] %v2338_v5  ;;  %2792 = vst [vmem:[#allocation95_spill] sm:$0xff] %v2342_v45  ;;  %v688_v45 = vmax.f32 %v2814_v36, 0.0  ;;  %v682_v36 = vmax.f32 %v2824_v24, 0.0  ;;  %v2826_v5 = vld [vmem:[#allocation77_spill] sm:$0xff]  ;;  %v2827_v2 = vld [vmem:[#allocation83_spill] sm:$0xff] }
  0x76   : > { %2793 = vst [vmem:[#allocation96_spill] sm:$0xff] %v2346_v60  ;;  %2794 = vst [vmem:[#allocation97_spill] sm:$0xff] %v2350_v54  ;;  %v686_v60 = vmax.f32 %v2812_v35, 0.0  ;;  %v2813_v54 = vld [vmem:[#allocation41_spill] sm:$0xff]  ;;  %v696_v35 = vmax.f32 %v2822_v59, 0.0  ;;  %v699_v37 = vmax.f32 %v2826_v5, 0.0 }
  0x77   : > { %2795 = vst [vmem:[#allocation98_spill] sm:$0xff] %v2354_v10  ;;  %2796 = vst [vmem:[#allocation99_spill] sm:$0xff] %v2358_v28  ;;  %v687_v26 = vmax.f32 %v2813_v54, 0.0  ;;  %v2815_v10 = vld [vmem:[#allocation47_spill] sm:$0xff]  ;;  %v2817_v28 = vld [vmem:[#allocation50_spill] sm:$0xff]  ;;  %v697_v54 = vmax.f32 %v2823_v42, 0.0 }
  0x78   : > { %2797 = vst [vmem:[#allocation100_spill] sm:$0xff] %v2362_v29  ;;  %v689_v13 = vmax.f32 %v2815_v10, 0.0  ;;  %v690_v14 = vmax.f32 %v2817_v28, 0.0  ;;  %v2819_v29 = vld [vmem:[#allocation59_spill] sm:$0xff]  ;;  %v2825_v10 = vld [vmem:[#allocation74_spill] sm:$0xff]  ;;  %v839_v28 = vmax.f32 %v694_v23, %v686_v60  ;;  %v881_v44 = vmax.f32 %v696_v35, %v688_v45  ;;  %v2829_v59 = vld [vmem:[#allocation89_spill] sm:$0xff] }
  0x79   : > { %v693_v1 = vmax.f32 %v2819_v29, 0.0  ;;  %v698_v34 = vmax.f32 %v2825_v10, 0.0  ;;  %v860_v19 = vmax.f32 %v695_v33, %v687_v26  ;;  %v944_v18 = vmax.f32 %v699_v37, %v691_v12  ;;  %v2828_v30 = vld [vmem:[#allocation87_spill] sm:$0xff]  ;;  %v2830_v42 = vld [vmem:[#allocation90_spill] sm:$0xff]  ;;  %v2831_v10 = vld [vmem:[#allocation29_spill] sm:$0xff] }
  0x7a   : > { %v902_v46 = vmax.f32 %v697_v54, %v689_v13  ;;  %v701_v32 = vmax.f32 %v2827_v2, 0.0  ;;  %v702_v63 = vmax.f32 %v2828_v30, 0.0  ;;  %v703_v6 = vmax.f32 %v2829_v59, 0.0 }
  0x7b   : > { %v818_v7 = vmax.f32 %v693_v1, %v685_v61  ;;  %v923_v29 = vmax.f32 %v698_v34, %v690_v14  ;;  %v704_v0 = vmax.f32 %v2830_v42, 0.0  ;;  %v705_v1 = vmax.f32 %v1991_v17, 0.0 }
  0x7c   : > { %v706_v61 = vmax.f32 %v2004_v11, 0.0  ;;  %v683_v5 = vmax.f32 %v2831_v10, 0.0  ;;  %v840_v60 = vmax.f32 %v839_v28, %v702_v63  ;;  %v707_v45 = vmax.f32 %v2014_v15, 0.0  ;;  %v2832_v15 = vld [vmem:[#allocation32_spill] sm:$0xff] }
  0x7d   : > { %v819_v23 = vmax.f32 %v818_v7, %v701_v32  ;;  %v861_v34 = vmax.f32 %v860_v19, %v703_v6  ;;  %v882_v12 = vmax.f32 %v881_v44, %v704_v0  ;;  %v903_v26 = vmax.f32 %v902_v46, %v705_v1 }
  0x7e   : > { %v924_v37 = vmax.f32 %v923_v29, %v706_v61  ;;  %v945_v13 = vmax.f32 %v944_v18, %v707_v45  ;;  %v709_v14 = vmax.f32 %v2022_v20, 0.0  ;;  %v710_v33 = vmax.f32 %v2026_v43, 0.0 }
  0x7f   : > { %v711_v35 = vmax.f32 %v2030_v22, 0.0  ;;  %v712_v17 = vmax.f32 %v2034_v38, 0.0  ;;  %v713_v11 = vmax.f32 %v2038_v48, 0.0  ;;  %v714_v32 = vmax.f32 %v2042_v3, 0.0  ;;  %v2833_v3 = vld [vmem:[#allocation56_spill] sm:$0xff] }
  0x80   : > { %v715_v63 = vmax.f32 %v2046_v9, 0.0  ;;  %v684_v6 = vmax.f32 %v2832_v15, 0.0  ;;  %v820_v0 = vmax.f32 %v819_v23, %v709_v14  ;;  %v841_v46 = vmax.f32 %v840_v60, %v710_v33 }
  0x81   : > { %v862_v19 = vmax.f32 %v861_v34, %v711_v35  ;;  %v883_v18 = vmax.f32 %v882_v12, %v712_v17  ;;  %v904_v7 = vmax.f32 %v903_v26, %v713_v11  ;;  %v925_v20 = vmax.f32 %v924_v37, %v714_v32  ;;  %v2838_v26 = vld [vmem:[#allocation22_spill] sm:$0xff]  ;;  %v2839_v32 = vld [vmem:[#allocation25_spill] sm:$0xff] }
  0x82   : > { %v946_v54 = vmax.f32 %v945_v13, %v715_v63  ;;  %v717_v43 = vmax.f32 %v2054_v31, 0.0  ;;  %v718_v22 = vmax.f32 %v2058_v58, 0.0  ;;  %v719_v38 = vmax.f32 %v2062_v39, 0.0  ;;  %v2834_v39 = vld [vmem:[#allocation18_spill] sm:$0xff] }
  0x83   : > { %v720_v48 = vmax.f32 %v2066_v21, 0.0  ;;  %v692_v28 = vmax.f32 %v2833_v3, 0.0  ;;  %v721_v9 = vmax.f32 %v2070_v49, 0.0  ;;  %v722_v44 = vmax.f32 %v2074_v41, 0.0  ;;  %v2835_v21 = vld [vmem:[#allocation19_spill] sm:$0xff]  ;;  %v2836_v49 = vld [vmem:[#allocation21_spill] sm:$0xff] }
  0x84   : > { %v723_v29 = vmax.f32 %v2078_v25, 0.0  ;;  %v821_v2 = vmax.f32 %v820_v0, %v717_v43  ;;  %v842_v30 = vmax.f32 %v841_v46, %v718_v22  ;;  %v863_v59 = vmax.f32 %v862_v19, %v719_v38  ;;  %v2837_v41 = vld [vmem:[#allocation80_spill] sm:$0xff] }
  0x85   : > { %v884_v42 = vmax.f32 %v883_v18, %v720_v48  ;;  %v905_v1 = vmax.f32 %v904_v7, %v721_v9  ;;  %v926_v31 = vmax.f32 %v925_v20, %v722_v44  ;;  %v725_v58 = vmax.f32 %v2086_v27, 0.0  ;;  %v2841_v19 = vld [vmem:[#allocation28_spill] sm:$0xff]  ;;  %v2842_v20 = vld [vmem:[#allocation30_spill] sm:$0xff]  ;;  %v2844_v48 = vld [vmem:[#allocation31_spill] sm:$0xff] }
  0x86   : > { %v947_v61 = vmax.f32 %v946_v54, %v723_v29  ;;  %v726_v23 = vmax.f32 %v2834_v39, 0.0  ;;  %v727_v60 = vmax.f32 %v2835_v21, 0.0  ;;  %v728_v45 = vmax.f32 %v2098_v47, 0.0  ;;  %v2840_v47 = vld [vmem:[#allocation27_spill] sm:$0xff]  ;;  %v2843_v43 = vld [vmem:[#allocation92_spill] sm:$0xff] }
  0x87   : > { %v729_v34 = vmax.f32 %v2836_v49, 0.0  ;;  %v700_v12 = vmax.f32 %v2837_v41, 0.0  ;;  %v822_v25 = vmax.f32 %v821_v2, %v725_v58  ;;  %v730_v37 = vmax.f32 %v2838_v26, 0.0  ;;  %v2847_v58 = vld [vmem:[#allocation37_spill] sm:$0xff]  ;;  %v2848_v21 = vld [vmem:[#allocation39_spill] sm:$0xff] }
  0x88   : > { %v731_v13 = vmax.f32 %v2110_v40, 0.0  ;;  %v843_v14 = vmax.f32 %v842_v30, %v726_v23  ;;  %v864_v33 = vmax.f32 %v863_v59, %v727_v60  ;;  %v885_v35 = vmax.f32 %v884_v42, %v728_v45  ;;  %v2845_v42 = vld [vmem:[#allocation34_spill] sm:$0xff]  ;;  %v2849_v45 = vld [vmem:[#allocation15_spill] sm:$0xff] }
  0x89   : > { %v906_v17 = vmax.f32 %v905_v1, %v729_v34  ;;  %v927_v27 = vmax.f32 %v926_v31, %v730_v37  ;;  %v733_v63 = vmax.f32 %v2839_v32, 0.0  ;;  %v734_v0 = vmax.f32 %v2122_v16, 0.0 }
  0x8a   : > { %v948_v11 = vmax.f32 %v947_v61, %v731_v13  ;;  %v735_v46 = vmax.f32 %v2840_v47, 0.0  ;;  %v736_v18 = vmax.f32 %v2841_v19, 0.0  ;;  %v737_v7 = vmax.f32 %v2134_v52, 0.0  ;;  %v2846_v52 = vld [vmem:[#allocation36_spill] sm:$0xff]  ;;  %v2854_v47 = vld [vmem:[#allocation46_spill] sm:$0xff] }
  0x8b   : > { %v738_v54 = vmax.f32 %v2842_v20, 0.0  ;;  %v708_v40 = vmax.f32 %v2843_v43, 0.0  ;;  %v823_v22 = vmax.f32 %v822_v25, %v733_v63  ;;  %v844_v38 = vmax.f32 %v843_v14, %v734_v0  ;;  %v2853_v63 = vld [vmem:[#allocation45_spill] sm:$0xff] }
  0x8c   : > { %v739_v9 = vmax.f32 %v2844_v48, 0.0  ;;  %v865_v44 = vmax.f32 %v864_v33, %v735_v46  ;;  %v886_v29 = vmax.f32 %v885_v35, %v736_v18  ;;  %v907_v2 = vmax.f32 %v906_v17, %v737_v7  ;;  %v2851_v17 = vld [vmem:[#allocation43_spill] sm:$0xff]  ;;  %v2855_v48 = vld [vmem:[#allocation49_spill] sm:$0xff] }
  0x8d   : > { %v928_v30 = vmax.f32 %v927_v27, %v738_v54  ;;  %v741_v16 = vmax.f32 %v2150_v55, 0.0  ;;  %v742_v1 = vmax.f32 %v2845_v42, 0.0  ;;  %v743_v31 = vmax.f32 %v2158_v53, 0.0  ;;  %v2850_v53 = vld [vmem:[#allocation42_spill] sm:$0xff] }
  0x8e   : > { %v949_v59 = vmax.f32 %v948_v11, %v739_v9  ;;  %v744_v61 = vmax.f32 %v2846_v52, 0.0  ;;  %v745_v39 = vmax.f32 %v2847_v58, 0.0  ;;  %v746_v23 = vmax.f32 %v2170_v50, 0.0  ;;  %v2852_v50 = vld [vmem:[#allocation16_spill] sm:$0xff]  ;;  %v2860_v52 = vld [vmem:[#allocation55_spill] sm:$0xff] }
  0x8f   : > { %v747_v60 = vmax.f32 %v2848_v21, 0.0  ;;  %v716_v49 = vmax.f32 %v2849_v45, 0.0  ;;  %v824_v34 = vmax.f32 %v823_v22, %v741_v16  ;;  %v845_v25 = vmax.f32 %v844_v38, %v742_v1  ;;  %v2858_v16 = vld [vmem:[#allocation24_spill] sm:$0xff]  ;;  %v2859_v1 = vld [vmem:[#allocation54_spill] sm:$0xff] }
  0x90   : > { %v866_v26 = vmax.f32 %v865_v44, %v743_v31  ;;  %v887_v37 = vmax.f32 %v886_v29, %v744_v61  ;;  %v908_v13 = vmax.f32 %v907_v2, %v745_v39  ;;  %v929_v55 = vmax.f32 %v928_v30, %v746_v23  ;;  %v2857_v2 = vld [vmem:[#allocation52_spill] sm:$0xff] }
  0x91   : > { %v950_v14 = vmax.f32 %v949_v59, %v747_v60  ;;  %v749_v33 = vmax.f32 %v2182_v51, 0.0  ;;  %v750_v35 = vmax.f32 %v2850_v53, 0.0  ;;  %v751_v27 = vmax.f32 %v2851_v17, 0.0  ;;  %v2865_v53 = vld [vmem:[#allocation64_spill] sm:$0xff]  ;;  %v2866_v17 = vld [vmem:[#allocation33_spill] sm:$0xff] }
  0x92   : > { %v752_v11 = vmax.f32 %v2194_v4, 0.0  ;;  %v724_v32 = vmax.f32 %v2852_v50, 0.0  ;;  %v753_v0 = vmax.f32 %v2853_v63, 0.0  ;;  %v754_v46 = vmax.f32 %v2854_v47, 0.0  ;;  %v2856_v4 = vld [vmem:[#allocation51_spill] sm:$0xff] }
  0x93   : > { %v755_v19 = vmax.f32 %v2206_v56, 0.0  ;;  %v825_v18 = vmax.f32 %v824_v34, %v749_v33  ;;  %v846_v7 = vmax.f32 %v845_v25, %v750_v35  ;;  %v867_v20 = vmax.f32 %v866_v26, %v751_v27  ;;  %v2861_v25 = vld [vmem:[#allocation58_spill] sm:$0xff] }
  0x94   : > { %v888_v54 = vmax.f32 %v887_v37, %v752_v11  ;;  %v909_v22 = vmax.f32 %v908_v13, %v753_v0  ;;  %v930_v51 = vmax.f32 %v929_v55, %v754_v46  ;;  %v757_v9 = vmax.f32 %v2855_v48, 0.0  ;;  %v2862_v37 = vld [vmem:[#allocation60_spill] sm:$0xff]  ;;  %v2867_v0 = vld [vmem:[#allocation66_spill] sm:$0xff] }
  0x95   : > { %v951_v38 = vmax.f32 %v950_v14, %v755_v19  ;;  %v758_v44 = vmax.f32 %v2218_v57, 0.0  ;;  %v759_v29 = vmax.f32 %v2856_v4, 0.0  ;;  %v760_v30 = vmax.f32 %v2857_v2, 0.0  ;;  %v2864_v14 = vld [vmem:[#allocation63_spill] sm:$0xff]  ;;  %v2873_v2 = vld [vmem:[#allocation76_spill] sm:$0xff] }
  0x96   : > { %v761_v59 = vmax.f32 %v2230_v62, 0.0  ;;  %v732_v42 = vmax.f32 %v2858_v16, 0.0  ;;  %v826_v56 = vmax.f32 %v825_v18, %v757_v9  ;;  %v762_v31 = vmax.f32 %v2859_v1, 0.0  ;;  %v2863_v62 = vld [vmem:[#allocation61_spill] sm:$0xff]  ;;  %v2872_v4 = vld [vmem:[#allocation75_spill] sm:$0xff]  ;;  %v2875_v1 = vld [vmem:[#allocation40_spill] sm:$0xff] }
  0x97   : > { %v763_v61 = vmax.f32 %v2860_v52, 0.0  ;;  %v847_v58 = vmax.f32 %v846_v7, %v758_v44  ;;  %v868_v39 = vmax.f32 %v867_v20, %v759_v29  ;;  %v889_v23 = vmax.f32 %v888_v54, %v760_v30  ;;  %v2868_v20 = vld [vmem:[#allocation69_spill] sm:$0xff] }
  0x98   : > { %v910_v21 = vmax.f32 %v909_v22, %v761_v59  ;;  %v931_v60 = vmax.f32 %v930_v51, %v762_v31  ;;  %v765_v57 = vmax.f32 %v2246_v8, 0.0  ;;  %v766_v26 = vmax.f32 %v2861_v25, 0.0  ;;  %v2869_v22 = vld [vmem:[#allocation70_spill] sm:$0xff]  ;;  %v2871_v9 = vld [vmem:[#allocation73_spill] sm:$0xff] }
  0x99   : > { %v952_v34 = vmax.f32 %v951_v38, %v763_v61  ;;  %v767_v13 = vmax.f32 %v2862_v37, 0.0  ;;  %v768_v55 = vmax.f32 %v2863_v62, 0.0  ;;  %v769_v33 = vmax.f32 %v2864_v14, 0.0  ;;  %v2870_v38 = vld [vmem:[#allocation72_spill] sm:$0xff]  ;;  %v2874_v59 = vld [vmem:[#allocation78_spill] sm:$0xff]  ;;  %v2879_v62 = vld [vmem:[#allocation85_spill] sm:$0xff] }
  0x9a   : > { %v770_v35 = vmax.f32 %v2865_v53, 0.0  ;;  %v740_v27 = vmax.f32 %v2866_v17, 0.0  ;;  %v827_v11 = vmax.f32 %v826_v56, %v765_v57  ;;  %v848_v63 = vmax.f32 %v847_v58, %v766_v26  ;;  %v2877_v25 = vld [vmem:[#allocation82_spill] sm:$0xff]  ;;  %v2878_v37 = vld [vmem:[#allocation84_spill] sm:$0xff] }
  0x9b   : > { %v771_v47 = vmax.f32 %v2867_v0, 0.0  ;;  %v869_v46 = vmax.f32 %v868_v39, %v767_v13  ;;  %v890_v19 = vmax.f32 %v889_v23, %v768_v55  ;;  %v911_v18 = vmax.f32 %v910_v21, %v769_v33  ;;  %v2880_v14 = vld [vmem:[#allocation48_spill] sm:$0xff]  ;;  %v2881_v53 = vld [vmem:[#allocation86_spill] sm:$0xff] }
  0x9c   : > { %v932_v8 = vmax.f32 %v931_v60, %v770_v35  ;;  %v773_v54 = vmax.f32 %v2868_v20, 0.0  ;;  %v774_v51 = vmax.f32 %v2869_v22, 0.0  ;;  %v775_v48 = vmax.f32 %v2870_v38, 0.0  ;;  %v2882_v0 = vld [vmem:[#allocation88_spill] sm:$0xff]  ;;  %v2884_v22 = vld [vmem:[#allocation94_spill] sm:$0xff]  ;;  %v2885_v38 = vld [vmem:[#allocation95_spill] sm:$0xff] }
  0x9d   : > { %v953_v7 = vmax.f32 %v952_v34, %v771_v47  ;;  %v776_v44 = vmax.f32 %v2871_v9, 0.0  ;;  %v777_v29 = vmax.f32 %v2872_v4, 0.0  ;;  %v778_v30 = vmax.f32 %v2873_v2, 0.0  ;;  %v2876_v34 = vld [vmem:[#allocation81_spill] sm:$0xff]  ;;  %v2886_v9 = vld [vmem:[#allocation96_spill] sm:$0xff]  ;;  %v2888_v2 = vld [vmem:[#allocation98_spill] sm:$0xff] }
  0x9e   : > { %v779_v56 = vmax.f32 %v2874_v59, 0.0  ;;  %v748_v31 = vmax.f32 %v2875_v1, 0.0  ;;  %v828_v52 = vmax.f32 %v827_v11, %v773_v54  ;;  %v849_v61 = vmax.f32 %v848_v63, %v774_v51  ;;  %v2883_v63 = vld [vmem:[#allocation93_spill] sm:$0xff] }
  0x9f   : > { %v870_v58 = vmax.f32 %v869_v46, %v775_v48  ;;  %v891_v39 = vmax.f32 %v890_v19, %v776_v44  ;;  %v912_v23 = vmax.f32 %v911_v18, %v777_v29  ;;  %v933_v21 = vmax.f32 %v932_v8, %v778_v30  ;;  %v2887_v4 = vld [vmem:[#allocation97_spill] sm:$0xff] }
  0xa0   : > { %v954_v60 = vmax.f32 %v953_v7, %v779_v56  ;;  %v781_v57 = vmax.f32 %v2876_v34, 0.0  ;;  %v782_v26 = vmax.f32 %v2877_v25, 0.0  ;;  %v783_v13 = vmax.f32 %v2878_v37, 0.0  ;;  %v2889_v56 = vld [vmem:[#allocation99_spill] sm:$0xff] }
  0xa1   : > { %v784_v55 = vmax.f32 %v2879_v62, 0.0  ;;  %v756_v33 = vmax.f32 %v2880_v14, 0.0  ;;  %v785_v35 = vmax.f32 %v2881_v53, 0.0  ;;  %v786_v11 = vmax.f32 %v2882_v0, 0.0  ;;  %v2895_v53 = vld [vmem:[#allocation13_spill] sm:$0xff] }
  0xa2   : > { %v787_v47 = vmax.f32 %v2883_v63, 0.0  ;;  %v829_v46 = vmax.f32 %v828_v52, %v781_v57  ;;  %v850_v19 = vmax.f32 %v849_v61, %v782_v26  ;;  %v871_v18 = vmax.f32 %v870_v58, %v783_v13  ;;  %v2890_v52 = vld [vmem:[#allocation100_spill] sm:$0xff]  ;;  %v2897_v0 = vld [vmem:[#allocation5_spill] sm:$0xff] }
  0xa3   : > { %v892_v8 = vmax.f32 %v891_v39, %v784_v55  ;;  %v913_v7 = vmax.f32 %v912_v23, %v785_v35  ;;  %v934_v20 = vmax.f32 %v933_v21, %v786_v11  ;;  %v789_v51 = vmax.f32 %v2884_v22, 0.0  ;;  %v2891_v58 = vld [vmem:[#allocation12_spill] sm:$0xff]  ;;  %v2901_v22 = vld [vmem:[#allocation6_spill] sm:$0xff] }
  0xa4   : > { %v955_v54 = vmax.f32 %v954_v60, %v787_v47  ;;  %v790_v48 = vmax.f32 %v2885_v38, 0.0  ;;  %v791_v44 = vmax.f32 %v2886_v9, 0.0  ;;  %v792_v29 = vmax.f32 %v2887_v4, 0.0  ;;  %v2893_v23 = vld [vmem:[#allocation4_spill] sm:$0xff]  ;;  %v2899_v47 = vld [vmem:[#allocation14_spill] sm:$0xff]  ;;  %v2903_v9 = vld [vmem:[#allocation17_spill] sm:$0xff] }
  0xa5   : > { %v793_v30 = vmax.f32 %v2888_v2, 0.0  ;;  %v830_v59 = vmax.f32 %v829_v46, %v789_v51  ;;  %v794_v34 = vmax.f32 %v2889_v56, 0.0  ;;  %v795_v61 = vmax.f32 %v2890_v52, 0.0  ;;  %v2915_v52 = vld [vmem:[#allocation10_spill] sm:$0xff] }
  0xa6   : > { %v2892_v39 = vmax.f32 %v2891_v58, 0.0  ;;  %v2894_v21 = vmax.f32 %v2893_v23, 0.0  ;;  %v851_v57 = vmax.f32 %v850_v19, %v790_v48  ;;  %v872_v25 = vmax.f32 %v871_v18, %v791_v44  ;;  %v2905_v18 = vld [vmem:[#allocation7_spill] sm:$0xff]  ;;  %v2909_v48 = vld [vmem:[#allocation8_spill] sm:$0xff] }
  0xa7   : > { %v893_v26 = vmax.f32 %v892_v8, %v792_v29  ;;  %v914_v37 = vmax.f32 %v913_v7, %v793_v30  ;;  %v935_v13 = vmax.f32 %v934_v20, %v794_v34  ;;  %v956_v62 = vmax.f32 %v955_v54, %v795_v61  ;;  %v2907_v20 = vld [vmem:[#allocation20_spill] sm:$0xff]  ;;  %v2911_v44 = vld [vmem:[#allocation23_spill] sm:$0xff]  ;;  %v2913_v29 = vld [vmem:[#allocation9_spill] sm:$0xff] }
  0xa8   : > { %v796_v60 = vmax.f32 %v2894_v21, %v2892_v39  ;;  %v2896_v35 = vmax.f32 %v2895_v53, 0.0  ;;  %v2898_v11 = vmax.f32 %v2897_v0, 0.0  ;;  %v2900_v46 = vmax.f32 %v2899_v47, 0.0  ;;  %v2917_v39 = vld [vmem:[#allocation11_spill] sm:$0xff] }
  0xa9   : > { %v2902_v51 = vmax.f32 %v2901_v22, 0.0  ;;  %v2904_v19 = vmax.f32 %v2903_v9, 0.0  ;;  %v2906_v8 = vmax.f32 %v2905_v18, 0.0  ;;  %v2908_v54 = vmax.f32 %v2907_v20, 0.0 }
  0xaa   : > { %v797_v55 = vmax.f32 %v796_v60, %v684_v6  ;;  %v817_v63 = vmax.f32 %v2898_v11, %v2896_v35  ;;  %v2910_v15 = vmax.f32 %v2909_v48, 0.0  ;;  %v2912_v4 = vmax.f32 %v2911_v44, 0.0 }
  0xab   : > { %v838_v38 = vmax.f32 %v2902_v51, %v2900_v46  ;;  %v859_v7 = vmax.f32 %v2906_v8, %v2904_v19  ;;  %v2914_v2 = vmax.f32 %v2913_v29, 0.0  ;;  %v2916_v61 = vmax.f32 %v2915_v52, 0.0 }
  0xac   : > { %v880_v6 = vmax.f32 %v2910_v15, %v2908_v54  ;;  %v798_v56 = vmax.f32 %v797_v55, %v692_v28  ;;  %v831_v34 = vmax.f32 %v830_v59, %v817_v63  ;;  %v2918_v23 = vmax.f32 %v2917_v39, 0.0 }
  0xad   : > { %v901_v30 = vmax.f32 %v2914_v2, %v2912_v4  ;;  %v922_v58 = vmax.f32 %v2916_v61, %v682_v36  ;;  %v852_v60 = vmax.f32 %v851_v57, %v838_v38  ;;  %v873_v53 = vmax.f32 %v872_v25, %v859_v7 }
  0xae   : > { %v943_v21 = vmax.f32 %v2918_v23, %v683_v5  ;;  %v894_v35 = vmax.f32 %v893_v26, %v880_v6  ;;  %v799_v11 = vmax.f32 %v798_v56, %v700_v12  ;;  %v832_v3 = vrot.slane %v831_v34, 4 }
  0xaf   : > { %v915_v0 = vmax.f32 %v914_v37, %v901_v30  ;;  %v936_v28 = vmax.f32 %v935_v13, %v922_v58  ;;  %v853_v55 = vrot.slane %v852_v60, 4  ;;  %v874_v24 = vrot.slane %v873_v53, 4  ;;  %v2919_v58 = vld [vmem:[#allocation57_spill] sm:$0xff] }
  0xb0   : > { %v957_v59 = vmax.f32 %v956_v62, %v943_v21  ;;  %v895_v63 = vrot.slane %v894_v35, 4  ;;  %v800_v36 = vmax.f32 %v799_v11, %v708_v40  ;;  %v833_v10 = vmax.f32 %v831_v34, %v832_v3  ;;  %v2920_v21 = vld [vmem:[#allocation91_spill] sm:$0xff] }
  0xb1   : > { %v916_v47 = vrot.slane %v915_v0, 4  ;;  %v937_v46 = vrot.slane %v936_v28, 4  ;;  %v854_v57 = vmax.f32 %v852_v60, %v853_v55  ;;  %v875_v25 = vmax.f32 %v873_v53, %v874_v24  ;;  %v2921_v60 = vld [vmem:[#allocation3_spill] sm:$0xff] }
  0xb2   : > { %v958_v5 = vrot.slane %v957_v59, 4  ;;  %v896_v26 = vmax.f32 %v894_v35, %v895_v63  ;;  %v801_v41 = vmax.f32 %v800_v36, %v716_v49  ;;  %v834_v12 = vrot.slane %v833_v10, 2  ;;  %v2922_v35 = vld [vmem:[#allocation67_spill] sm:$0xff] }
  0xb3   : > { %v917_v37 = vmax.f32 %v915_v0, %v916_v47  ;;  %v938_v13 = vmax.f32 %v936_v28, %v937_v46  ;;  %v855_v22 = vrot.slane %v854_v57, 2  ;;  %v876_v51 = vrot.slane %v875_v25, 2  ;;  %v2923_v0 = vld [vmem:[#allocation79_spill] sm:$0xff] }
  0xb4   : > { %v959_v62 = vmax.f32 %v957_v59, %v958_v5  ;;  %v897_v38 = vrot.slane %v896_v26, 2  ;;  %v802_v43 = vmax.f32 %v801_v41, %v724_v32  ;;  %v835_v40 = vmax.f32 %v833_v10, %v834_v12 }
  0xb5   : > { %v918_v9 = vrot.slane %v917_v37, 2  ;;  %v939_v19 = vrot.slane %v938_v13, 2  ;;  %v856_v8 = vmax.f32 %v854_v57, %v855_v22  ;;  %v877_v7 = vmax.f32 %v875_v25, %v876_v51 }
  0xb6   : > { %v960_v18 = vrot.slane %v959_v62, 2  ;;  %v898_v20 = vmax.f32 %v896_v26, %v897_v38  ;;  %v803_v45 = vmax.f32 %v802_v43, %v732_v42  ;;  %v836_v49 = vrot.slane %v835_v40, 1 }
  0xb7   : > { %v919_v54 = vmax.f32 %v917_v37, %v918_v9  ;;  %v940_v48 = vmax.f32 %v938_v13, %v939_v19  ;;  %v857_v6 = vrot.slane %v856_v8, 1  ;;  %v878_v44 = vrot.slane %v877_v7, 1  ;;  %v2924_v37 = vld [vmem:[#allocation2_spill] sm:$0xff] (!%p1168_p7) }
  0xb8   : > { %v961_v15 = vmax.f32 %v959_v62, %v960_v18  ;;  %v899_v4 = vrot.slane %v898_v20, 1  ;;  %v804_v50 = vmax.f32 %v803_v45, %v740_v27  ;;  %v837_v32 = vmax.f32 %v835_v40, %v836_v49 }
  0xb9   : > { %v920_v29 = vrot.slane %v919_v54, 1  ;;  %v941_v2 = vrot.slane %v940_v48, 1  ;;  %v858_v56 = vmax.f32 %v856_v8, %v857_v6  ;;  %v879_v34 = vmax.f32 %v877_v7, %v878_v44 }
  0xba   : > { %v962_v30 = vrot.slane %v961_v15, 1  ;;  %v900_v52 = vmax.f32 %v898_v20, %v899_v4  ;;  %v764_v16 = vmax.f32 %v2919_v58, 0.0  ;;  %v805_v42 = vmax.f32 %v804_v50, %v748_v31 }
  0xbb   : > { %v921_v61 = vmax.f32 %v919_v54, %v920_v29  ;;  %v942_v39 = vmax.f32 %v940_v48, %v941_v2  ;;  %v660_v53 = vadd.f32 %v2921_v60, %v2920_v21  ;;  %v772_v17 = vmax.f32 %v2922_v35, 0.0 }
  0xbc   : > { %v963_v23 = vmax.f32 %v961_v15, %v962_v30  ;;  %v806_v27 = vmax.f32 %v805_v42, %v756_v33  ;;  %v780_v11 = vmax.f32 %v2923_v0, 0.0  ;;  %v1255_v46 = vmov (!%p1168_p7), 1966171168  }
  0xbd   : > { %v788_v28 = vmax.f32 %v660_v53, 0.0  ;;  %v981_v5 = vunpack.c.l.s4 (!%p1168_p7), %v1255_v46  ;;  %v977_v33 = vcombine.low (!%p1168_p7), %v858_v56, %v879_v34  ;;  %v978_v57 = vcombine.low (!%p1168_p7), %v900_v52, %v921_v61 }
  0xbe   : > { %v807_v3 = vmax.f32 %v806_v27, %v764_v16  ;;  %v979_v25 = vcombine.low (!%p1168_p7), %v942_v39, %v963_v23 }
  0xbf   : > { %v982_v26 = vunpack.c.0.s8 (!%p1168_p7), %v981_v5 }
  0xc0   : > { %v808_v59 = vmax.f32 %v807_v3, %v772_v17 }
  0xc1   : > { %v985_v41 = vsub.s32 (!%p1168_p7), %v982_v26, %v2924_v37 }
  0xc2   : > { %v809_v55 = vmax.f32 %v808_v59, %v780_v11 }
  0xc3   : > { %v993_v13 = vrot.slane (!%p1168_p7), %v977_v33, %v985_v41  ;;  %v1000_v62 = vrot.slane (!%p1168_p7), %v978_v57, %v985_v41  ;;  %v1007_v22 = vrot.slane (!%p1168_p7), %v979_v25, %v985_v41 }
  0xc4   : > { %v810_v24 = vmax.f32 %v809_v55, %v788_v28 }
  0xc5   : > { %v1009_v38 = vcombine.low (!%p1168_p7), %v1000_v62, %v1007_v22 }
  0xc6   : > { %v811_v63 = vrot.slane %v810_v24, 4 }
  0xc7   : > { %v1023_v43 = vrot.slane (!%p1168_p7), %v1009_v38, %v985_v41 }
  0xc8   : > { %v812_v1 = vmax.f32 %v810_v24, %v811_v63 }
  0xca   : > { %v813_v31 = vrot.slane %v812_v1, 2  ;;  %967 = sbr.rel (%p1168_p7) target bundleno = 221 (0xdd), region = 36 }
  0xcc   : > { %v814_v47 = vmax.f32 %v812_v1, %v813_v31 }
  0xce   : > { %v815_v36 = vrot.slane %v814_v47, 1 }
  0xd0   : > { %v816_v10 = vmax.f32 %v814_v47, %v815_v36 }
  0xd2   : > { %v976_v14 = vcombine.low %v816_v10, %v837_v32 }
  0xd4   : > { %v986_v12 = vrot.slane %v976_v14, %v985_v41 }
  0xd6   : > { %v1008_v51 = vcombine.low %v986_v12, %v993_v13 }
  0xd8   : > { %v1016_v9 = vrot.slane %v1008_v51, %v985_v41 }
  0xda   : > { %v1024_v40 = vcombine.low %v1016_v9, %v1023_v43 }
  0xdc   : > { %1026 = vst [vmem:[%s1331_s30] sm:$0xff] %v1024_v40 }
  0xdd PF: > { %p1169_p8 = scmp.le.s32.totalorder %s1237_s12, 0 }
  0xde   : > { %v1256_v19 = vmov (!%p1169_p8), 1966171168   ;;  %v1040_v8 = vcombine.low (!%p1169_p8), %v816_v10, %v837_v32  ;;  %v1041_v7 = vcombine.low (!%p1169_p8), %v858_v56, %v879_v34  ;;  %v1042_v20 = vcombine.low (!%p1169_p8), %v900_v52, %v921_v61  ;;  %v2925_v49 = vld [vmem:[#allocation2_spill] sm:$0xff] (!%p1169_p8) }
  0xdf   : > { %1030 = sbr.rel (%p1169_p8) target bundleno = 240 (0xf0), region = 40  ;;  %v1045_v18 = vunpack.c.l.s4 (!%p1169_p8), %v1256_v19  ;;  %v1043_v54 = vcombine.low (!%p1169_p8), %v942_v39, %v963_v23 }
  0xe1   : > { %v1046_v45 = vunpack.c.0.s8 (!%p1169_p8), %v1045_v18 }
  0xe3   : > { %v1049_v48 = vsub.s32 (!%p1169_p8), %v1046_v45, %v2925_v49  ;;  %v1031_v58 = vld [vmem:[%s1331_s30] sm:$0xff] (!%p1169_p8) }
  0xe5   : > { %v1050_v15 = vrot.slane (!%p1169_p8), %v1040_v8, %v1049_v48  ;;  %v1057_v6 = vrot.slane (!%p1169_p8), %v1041_v7, %v1049_v48  ;;  %v1064_v44 = vrot.slane (!%p1169_p8), %v1042_v20, %v1049_v48  ;;  %v1071_v4 = vrot.slane (!%p1169_p8), %v1043_v54, %v1049_v48 }
  0xe7   : > { %v1072_v29 = vcombine.low %v1050_v15, %v1057_v6  ;;  %v1073_v50 = vcombine.low %v1064_v44, %v1071_v4 }
  0xe9   : > { %v1080_v2 = vrot.slane %v1072_v29, %v1049_v48  ;;  %v1087_v30 = vrot.slane %v1073_v50, %v1049_v48 }
  0xeb   : > { %v1088_v16 = vcombine.low %v1080_v2, %v1087_v30 }
  0xed   : > { %v1090_v42 = vmax.f32 %v1031_v58, %v1088_v16 }
  0xef   : > { %1091 = vst [vmem:[%s1331_s30] sm:$0xff] %v1090_v42 }
  0xf0 PF: > { %s13_s16 = sadd.s32 1, %s1253_s16   ;;  %s2926_s12 = smov %s1245_s14 }
  0xf1   : > { %p10_p9 = scmp.ge.s32.totalorder %s13_s16, 6   ;;  %s2927_s13 = smov %s1249_s15 }
  0xf2   : > { %s2928_s14 = smov %s2931_s17  ;;  %s2929_s15 = smov %s2935_s18 }
  0xf3   :  { %12 = sbr.rel (!%p10_p9) target bundleno = 3 (0x3), region = 70 }

</bundles_post_ra>
